<compile_context>
chip_gen: v6e
topology: v6e:2x2x1
jax: 0.10.0
libtpu: 0.0.40
codegen_flags: <defaults>
</compile_context>

<pallas_src>
import jax
import jax.numpy as jnp
from jax import lax
from jax.experimental import pallas as pl
from jax.experimental.pallas import tpu as pltpu


# ---------------------------------------------------------------------------
# Problem sizes (small, consistent with the module's forward)
# ---------------------------------------------------------------------------
B = 2            # batch
T_IN = 8         # input_len
T_OUT = 12       # output_length
V_IN = 32        # input_vocab_size
V_OUT = 32       # output_vocab_size
E = 64           # embed_dim
H = 64           # hidden_dim

G = H + E        # 128 : fused hidden width  [h_enc | h_dec]
G3 = 3 * G       # 384 : fused gate width    [r_e|r_d|z_e|z_d|n_e|n_d]

# column offsets inside the packed weight slab (all 128-aligned)
_C_WRR = 0                    # (G, G3)   merged block-diag recurrent weights
_C_DWIH = G3                  # (G, G3)   decoder input gates (enc rows used, dec rows 0)
_C_X2G = 2 * G3               # (G, G3)   embed-folded encoder input gates (rows 0:V_IN)
_C_WPV = 3 * G3               # (G, V_OUT) vocab projection (dec rows used, enc rows 0)
WSLAB_COLS = 3 * G3 + V_OUT   # 1184

# column offsets inside the packed bias row
_B_GI = 0                     # (1, G3)  fused input-gate bias (b_hr/b_hz folded in)
_B_HN = G3                    # (1, G)   recurrent n-gate bias [e_bhn | d_bhn]
BSLAB_COLS = G3 + G           # 512


# ---------------------------------------------------------------------------
# Pallas kernel
# ---------------------------------------------------------------------------
def deobfuscator_kernel(
        x_ref,       # ((T_IN+1)*B, V_IN)  time-major input, last B rows zero
        wslab_ref,   # (G, WSLAB_COLS)     packed weights
        bslab_ref,   # (1, BSLAB_COLS)     packed biases
        wlen_ref,    # (B*T_OUT, T_IN*B)   batch-block-diagonal length projection
        blen_ref,    # (B*T_OUT, V_OUT)    length-proj bias with b_pv folded in
        out_ref,     # (B*T_OUT, V_OUT)
        pv_s):       # VMEM (T_IN*B, V_OUT) per-step vocab projections
    f32 = jnp.float32

    def sigmoid(v):  # exact identity; keeps the nonlinearity on the EUP
        return 0.5 * jnp.tanh(0.5 * v) + 0.5

    # All per-timestep input gates at once, off the serial chain (embedding Linear
    # folded into this weight at pack time).  Row block T_IN is bias-only and feeds
    # the decoder-only epilogue iteration.
    w_x2g = wslab_ref[0:V_IN, _C_X2G:_C_X2G + G3]
    b_gi = bslab_ref[:, _B_GI:_B_GI + G3]
    eg = jnp.dot(x_ref[...], w_x2g, preferred_element_type=f32) + b_gi  # (18, 384)

    # mask that keeps the decoder half of h_cat at exactly zero after step 0
    enc_mask = (lax.broadcasted_iota(jnp.int32, (1, G), 1) < H).astype(f32)

    h_cat = jnp.zeros((B, G), f32)    # [h_enc | h_dec]
    gi_d = jnp.zeros((B, G3), f32)    # decoder input gates from the previous iter

    # Fully unrolled fused recurrence.  Iteration t runs encoder step t and
    # decoder step t-1 with ONE merged recurrent matmul; iteration T_IN is the
    # decoder-only epilogue.
    for t in range(T_IN + 1):
        # weights re-read from VMEM every step (vld slots are idle; avoids
        # pinning ~48 vregs of recurrent weight across the unrolled loop)
        w_rr = wslab_ref[:, _C_WRR:_C_WRR + G3]
        bhn = bslab_ref[:, _B_HN:_B_HN + G]

        gi_full = eg[t * B:(t + 1) * B, :] + gi_d
        gh = jnp.dot(h_cat, w_rr, preferred_element_type=f32)   # serial-chain matmul

        # fused GRU gate math for both encoder and decoder (all slices 128-aligned)
        rz = sigmoid(gi_full[:, 0:2 * G] + gh[:, 0:2 * G])
        r = rz[:, 0:G]
        z = rz[:, G:2 * G]
        n = jnp.tanh(gi_full[:, 2 * G:3 * G] + r * (gh[:, 2 * G:3 * G] + bhn))
        h_new = (1.0 - z) * n + z * h_cat

        if t == 0:
            # decoder has not started yet: its initial hidden state must stay zero
            h_new = h_new * enc_mask

        if t >= 1:
            # decoder step t-1 output -> vocab projection (off the serial chain)
            w_pv = wslab_ref[:, _C_WPV:_C_WPV + V_OUT]
            pv_s[(t - 1) * B:t * B, :] = jnp.dot(
                h_new, w_pv, preferred_element_type=f32)

        if t < T_IN:
            # decoder input gates for the NEXT iteration (one-step skew:
            # this matmul is not on the path to the next merged matmul)
            w_dih = wslab_ref[:, _C_DWIH:_C_DWIH + G3]
            gi_d = jnp.dot(h_new, w_dih, preferred_element_type=f32)

        h_cat = h_new

    # transposed length projection as ONE matmul against the batch-block-diagonal
    # W_len; b_pv was folded into blen at pack time.
    out_ref[...] = (jnp.dot(wlen_ref[...], pv_s[...], preferred_element_type=f32)
                    + blen_ref[...]).astype(out_ref.dtype)


# ---------------------------------------------------------------------------
# Wrapper
# ---------------------------------------------------------------------------
def _full_spec(shape):
    zeros = (0,) * len(shape)
    return pl.BlockSpec(shape, lambda i, zeros=zeros: zeros)


@jax.jit
def deobfuscator_pallas(x, kernel_params):
    # time-major flatten: row t*B + b  <->  x[b, t, :]; append B zero rows for the
    # decoder-only epilogue iteration.
    x_tm = jnp.swapaxes(x, 0, 1).reshape(T_IN * B, V_IN)
    x_pad = jnp.concatenate([x_tm, jnp.zeros((B, V_IN), x_tm.dtype)], axis=0)
    args = (x_pad,) + tuple(kernel_params)

    grid_spec = pltpu.PrefetchScalarGridSpec(
        num_scalar_prefetch=0,
        grid=(1,),
        in_specs=[_full_spec(a.shape) for a in args],
        out_specs=_full_spec((B * T_OUT, V_OUT)),
        scratch_shapes=[pltpu.VMEM((T_IN * B, V_OUT), jnp.float32)],
    )

    out_flat = pl.pallas_call(
        deobfuscator_kernel,
        out_shape=jax.ShapeDtypeStruct((B * T_OUT, V_OUT), jnp.float32),
        grid_spec=grid_spec,
        compiler_params=pltpu.CompilerParams(
            dimension_semantics=("arbitrary",)),
    )(*args)

    return out_flat.reshape(B, T_OUT, V_OUT)


# ---------------------------------------------------------------------------
# Deterministic parameter init (PyTorch layouts) + repack for the kernel
# ---------------------------------------------------------------------------
def _pack_params(p):
    f32 = jnp.float32
    Wi_r, Wi_z, Wi_n = jnp.split(p["e_wih"], 3, axis=0)   # (H, E) each
    Wh_r, Wh_z, Wh_n = jnp.split(p["e_whh"], 3, axis=0)   # (H, H)
    e_bih_r, e_bih_z, e_bih_n = jnp.split(p["e_bih"], 3)
    e_bhh_r, e_bhh_z, e_bhh_n = jnp.split(p["e_bhh"], 3)
    Vi_r, Vi_z, Vi_n = jnp.split(p["d_wih"], 3, axis=0)   # (E, H)
    Vh_r, Vh_z, Vh_n = jnp.split(p["d_whh"], 3, axis=0)   # (E, E)
    d_bih_r, d_bih_z, d_bih_n = jnp.split(p["d_bih"], 3)
    d_bhh_r, d_bhh_z, d_bhh_n = jnp.split(p["d_bhh"], 3)

    # merged block-diagonal recurrent weight, interleaved gate columns
    wrr = jnp.zeros((G, G3), f32)
    wrr = wrr.at[0:H, 0:H].set(Wh_r.T)                     # r_e
    wrr = wrr.at[0:H, G:G + H].set(Wh_z.T)                 # z_e
    wrr = wrr.at[0:H, 2 * G:2 * G + H].set(Wh_n.T)         # n_e
    wrr = wrr.at[H:G, H:G].set(Vh_r.T)                     # r_d
    wrr = wrr.at[H:G, G + H:2 * G].set(Vh_z.T)             # z_d
    wrr = wrr.at[H:G, 2 * G + H:3 * G].set(Vh_n.T)         # n_d

    # decoder input-gate weight expanded to full h_cat rows / interleaved cols
    dwih = jnp.zeros((G, G3), f32)
    dwih = dwih.at[0:H, H:G].set(Vi_r.T)
    dwih = dwih.at[0:H, G + H:2 * G].set(Vi_z.T)
    dwih = dwih.at[0:H, 2 * G + H:3 * G].set(Vi_n.T)

    # embedding Linear folded into the encoder input-gate weight (rows 0:V_IN)
    x2g = jnp.zeros((G, G3), f32)
    emb_t = p["w_emb"].T                                   # (V_IN, E)
    x2g = x2g.at[0:V_IN, 0:H].set(emb_t @ Wi_r.T)
    x2g = x2g.at[0:V_IN, G:G + H].set(emb_t @ Wi_z.T)
    x2g = x2g.at[0:V_IN, 2 * G:2 * G + H].set(emb_t @ Wi_n.T)

    # vocab projection reading only the decoder half of h_cat
    wpv = jnp.zeros((G, V_OUT), f32).at[H:G, :].set(p["w_pv"].T)

    wslab = jnp.concatenate([wrr, dwih, x2g, wpv], axis=1)  # (128, 1184)

    # fused input-gate bias row (b_hr/b_hz folded in; b_hn must stay separate)
    b_emb = p["b_emb"]
    b_gi = jnp.zeros((G3,), f32)
    b_gi = b_gi.at[0:H].set(b_emb @ Wi_r.T + e_bih_r + e_bhh_r)
    b_gi = b_gi.at[G:G + H].set(b_emb @ Wi_z.T + e_bih_z + e_bhh_z)
    b_gi = b_gi.at[2 * G:2 * G + H].set(b_emb @ Wi_n.T + e_bih_n)
    b_gi = b_gi.at[H:G].set(d_bih_r + d_bhh_r)
    b_gi = b_gi.at[G + H:2 * G].set(d_bih_z + d_bhh_z)
    b_gi = b_gi.at[2 * G + H:3 * G].set(d_bih_n)
    bhn = jnp.concatenate([e_bhh_n, d_bhh_n])               # (128,)
    bslab = jnp.concatenate([b_gi, bhn]).reshape(1, BSLAB_COLS)   # (1, 512)

    # batch-block-diagonal length projection + bias (b_pv folded in):
    #   out[b*T_OUT+o, v] = sum_t w_len[o,t]*pv[t*B+b, v] + b_len[o] + sum_t w_len[o,t]*b_pv[v]
    w_len, b_len, b_pv = p["w_len"], p["b_len"], p["b_pv"]
    eye_b = jnp.eye(B, dtype=f32)
    wlen_exp = (w_len[None, :, :, None] * eye_b[:, None, None, :]
                ).reshape(B * T_OUT, T_IN * B)
    blen_adj = b_len[:, None] + w_len.sum(axis=1)[:, None] * b_pv[None, :]
    blen_adj = jnp.tile(blen_adj, (B, 1))                   # (B*T_OUT, V_OUT)

    return wslab, bslab, wlen_exp, blen_adj


def init_params(key):
    ks = jax.random.split(key, 16)
    sc = 0.1
    nrm = lambda k, s: sc * jax.random.normal(k, s, jnp.float32)

    # nn.Linear(V_IN, E)
    w_emb = nrm(ks[0], (E, V_IN));      b_emb = nrm(ks[1], (E,))
    # encoder GRU(E -> H)
    e_wih = nrm(ks[2], (3 * H, E));     e_whh = nrm(ks[3], (3 * H, H))
    e_bih = nrm(ks[4], (3 * H,));       e_bhh = nrm(ks[5], (3 * H,))
    # decoder GRU(H -> E)
    d_wih = nrm(ks[6], (3 * E, H));     d_whh = nrm(ks[7], (3 * E, E))
    d_bih = nrm(ks[8], (3 * E,));       d_bhh = nrm(ks[9], (3 * E,))
    # nn.Linear(E, V_OUT)
    w_pv = nrm(ks[10], (V_OUT, E));     b_pv = nrm(ks[11], (V_OUT,))
    # nn.Linear(T_IN, T_OUT)
    w_len = nrm(ks[12], (T_OUT, T_IN)); b_len = nrm(ks[13], (T_OUT,))

    torch_layout = dict(w_emb=w_emb, b_emb=b_emb,
                        e_wih=e_wih, e_whh=e_whh, e_bih=e_bih, e_bhh=e_bhh,
                        d_wih=d_wih, d_whh=d_whh, d_bih=d_bih, d_bhh=d_bhh,
                        w_pv=w_pv, b_pv=b_pv, w_len=w_len, b_len=b_len)
    return torch_layout, _pack_params(torch_layout)


# ---------------------------------------------------------------------------
# Pure-JAX reference (PyTorch semantics) for verification
# ---------------------------------------------------------------------------
def gru_ref(x, wih, whh, bih, bhh):
    hid = whh.shape[1]

    def step(h, x_t):
        gi = x_t @ wih.T + bih
        gh = h @ whh.T + bhh
        ir, iz, i_n = jnp.split(gi, 3, axis=-1)
        hr, hz, h_n = jnp.split(gh, 3, axis=-1)
        r = jax.nn.sigmoid(ir + hr)
        z = jax.nn.sigmoid(iz + hz)
        n = jnp.tanh(i_n + r * h_n)
        h_new = (1.0 - z) * n + z * h
        return h_new, h_new

    h0 = jnp.zeros((x.shape[0], hid), x.dtype)
    _, ys = lax.scan(step, h0, jnp.swapaxes(x, 0, 1))
    return jnp.swapaxes(ys, 0, 1)


def deobfuscator_ref(x, p):
    emb = x @ p["w_emb"].T + p["b_emb"]
    enc = gru_ref(emb, p["e_wih"], p["e_whh"], p["e_bih"], p["e_bhh"])
    dec = gru_ref(enc, p["d_wih"], p["d_whh"], p["d_bih"], p["d_bhh"])
    pv = dec @ p["w_pv"].T + p["b_pv"]                       # (B, T_IN, V_OUT)
    pv_t = jnp.swapaxes(pv, 1, 2)                            # (B, V_OUT, T_IN)
    y = pv_t @ p["w_len"].T + p["b_len"]                     # (B, V_OUT, T_OUT)
    return jnp.swapaxes(y, 1, 2)                             # (B, T_OUT, V_OUT)


# ---------------------------------------------------------------------------
if __name__ == "__main__":
    key = jax.random.PRNGKey(0)
    k_x, k_p = jax.random.split(key)
    x = jax.random.normal(k_x, (B, T_IN, V_IN), jnp.float32)

    torch_layout, kernel_params = init_params(k_p)

    out = deobfuscator_pallas(x, kernel_params)
    out = jax.block_until_ready(out)

    ref = deobfuscator_ref(x, torch_layout)
    assert out.shape == (B, T_OUT, V_OUT), out.shape
    max_err = float(jnp.max(jnp.abs(out - ref)))
    assert jnp.allclose(out, ref, atol=2e-4, rtol=2e-4), max_err

    print("KERNEL_OK")
</pallas_src>

<mosaic_0001>
module attributes {stable_mosaic.version = 11 : i64} {
  func.func @deobfuscator_kernel(%arg0: i32, %arg1: memref<18x32xf32, #tpu.memory_space<vmem>>, %arg2: memref<128x1184xf32, #tpu.memory_space<vmem>>, %arg3: memref<1x512xf32, #tpu.memory_space<vmem>>, %arg4: memref<24x16xf32, #tpu.memory_space<vmem>>, %arg5: memref<24x32xf32, #tpu.memory_space<vmem>>, %arg6: memref<24x32xf32, #tpu.memory_space<vmem>>, %arg7: memref<16x32xf32, #tpu.memory_space<vmem>>) attributes {dimension_semantics = [#tpu.dimension_semantics<arbitrary>], iteration_bounds = array<i64: 1>, scalar_prefetch = 0 : i64, scratch_operands = 1 : i64, tpu.core_type = #tpu.core_type<tc>, window_params = [{pipeline_mode = #tpu.pipeline_mode<synchronous>, transform_indices = @transform_0, window_bounds = array<i64: 18, 32>}, {pipeline_mode = #tpu.pipeline_mode<synchronous>, transform_indices = @transform_1, window_bounds = array<i64: 128, 1184>}, {pipeline_mode = #tpu.pipeline_mode<synchronous>, transform_indices = @transform_2, window_bounds = array<i64: 1, 512>}, {pipeline_mode = #tpu.pipeline_mode<synchronous>, transform_indices = @transform_3, window_bounds = array<i64: 24, 16>}, {pipeline_mode = #tpu.pipeline_mode<synchronous>, transform_indices = @transform_4, window_bounds = array<i64: 24, 32>}, {pipeline_mode = #tpu.pipeline_mode<synchronous>, transform_indices = @transform_5, window_bounds = array<i64: 24, 32>}]} {
    %c0 = arith.constant 0 : index
    %c768 = arith.constant 768 : index
    %0 = vector.load %arg2[%c0, %c768] : memref<128x1184xf32, #tpu.memory_space<vmem>>, vector<32x384xf32>
    %c0_0 = arith.constant 0 : index
    %c0_1 = arith.constant 0 : index
    %1 = vector.load %arg3[%c0_0, %c0_1] : memref<1x512xf32, #tpu.memory_space<vmem>>, vector<1x384xf32>
    %c0_2 = arith.constant 0 : index
    %c0_3 = arith.constant 0 : index
    %2 = vector.load %arg1[%c0_2, %c0_3] : memref<18x32xf32, #tpu.memory_space<vmem>>, vector<18x32xf32>
    %cst = arith.constant dense<0.000000e+00> : vector<18x384xf32>
    %3 = tpu.matmul %2, %0, %cst {dimension_numbers = #tpu.dot_dimension_numbers<[1], [0], [0], [1], [0, 0, 1, 1], [], []>} : vector<18x32xf32>, vector<32x384xf32>, vector<18x384xf32> -> vector<18x384xf32>
    %4 = vector.broadcast %1 : vector<1x384xf32> to vector<18x384xf32>
    %5 = arith.addf %3, %4 : vector<18x384xf32>
    %6 = tpu.iota {dimensions = array<i32: 1>} : vector<1x128xi32>
    %c64_i32 = arith.constant 64 : i32
    %7 = vector.broadcast %c64_i32 : i32 to vector<1x128xi32>
    %8 = arith.cmpi slt, %6, %7 : vector<1x128xi32>
    %9 = arith.extui %8 : vector<1x128xi1> to vector<1x128xi32>
    %10 = arith.sitofp %9 : vector<1x128xi32> to vector<1x128xf32>
    %cst_4 = arith.constant 0.000000e+00 : f32
    %11 = vector.broadcast %cst_4 : f32 to vector<2x128xf32>
    %cst_5 = arith.constant 0.000000e+00 : f32
    %12 = vector.broadcast %cst_5 : f32 to vector<2x384xf32>
    %c0_6 = arith.constant 0 : index
    %c0_7 = arith.constant 0 : index
    %13 = vector.load %arg2[%c0_6, %c0_7] : memref<128x1184xf32, #tpu.memory_space<vmem>>, vector<128x384xf32>
    %c0_8 = arith.constant 0 : index
    %c384 = arith.constant 384 : index
    %14 = vector.load %arg3[%c0_8, %c384] : memref<1x512xf32, #tpu.memory_space<vmem>>, vector<1x128xf32>
    %15 = vector.extract_strided_slice %5 {offsets = [0, 0], sizes = [2, 384], strides = [1, 1]} : vector<18x384xf32> to vector<2x384xf32>
    %16 = arith.addf %15, %12 : vector<2x384xf32>
    %cst_9 = arith.constant dense<0.000000e+00> : vector<2x384xf32>
    %17 = tpu.matmul %11, %13, %cst_9 {dimension_numbers = #tpu.dot_dimension_numbers<[1], [0], [0], [1], [0, 0, 1, 1], [], []>} : vector<2x128xf32>, vector<128x384xf32>, vector<2x384xf32> -> vector<2x384xf32>
    %18 = vector.extract_strided_slice %16 {offsets = [0, 0], sizes = [2, 256], strides = [1, 1]} : vector<2x384xf32> to vector<2x256xf32>
    %19 = vector.extract_strided_slice %17 {offsets = [0, 0], sizes = [2, 256], strides = [1, 1]} : vector<2x384xf32> to vector<2x256xf32>
    %20 = arith.addf %18, %19 : vector<2x256xf32>
    %cst_10 = arith.constant 5.000000e-01 : f32
    %21 = vector.broadcast %cst_10 : f32 to vector<2x256xf32>
    %22 = arith.mulf %21, %20 : vector<2x256xf32>
    %23 = math.tanh %22 : vector<2x256xf32>
    %cst_11 = arith.constant 5.000000e-01 : f32
    %24 = vector.broadcast %cst_11 : f32 to vector<2x256xf32>
    %25 = arith.mulf %24, %23 : vector<2x256xf32>
    %cst_12 = arith.constant 5.000000e-01 : f32
    %26 = vector.broadcast %cst_12 : f32 to vector<2x256xf32>
    %27 = arith.addf %25, %26 : vector<2x256xf32>
    %28 = vector.extract_strided_slice %27 {offsets = [0, 0], sizes = [2, 128], strides = [1, 1]} : vector<2x256xf32> to vector<2x128xf32>
    %29 = vector.extract_strided_slice %27 {offsets = [0, 128], sizes = [2, 128], strides = [1, 1]} : vector<2x256xf32> to vector<2x128xf32>
    %30 = vector.extract_strided_slice %16 {offsets = [0, 256], sizes = [2, 128], strides = [1, 1]} : vector<2x384xf32> to vector<2x128xf32>
    %31 = vector.extract_strided_slice %17 {offsets = [0, 256], sizes = [2, 128], strides = [1, 1]} : vector<2x384xf32> to vector<2x128xf32>
    %32 = vector.broadcast %14 : vector<1x128xf32> to vector<2x128xf32>
    %33 = arith.addf %31, %32 : vector<2x128xf32>
    %34 = arith.mulf %28, %33 : vector<2x128xf32>
    %35 = arith.addf %30, %34 : vector<2x128xf32>
    %36 = math.tanh %35 : vector<2x128xf32>
    %cst_13 = arith.constant 1.000000e+00 : f32
    %37 = vector.broadcast %cst_13 : f32 to vector<2x128xf32>
    %38 = arith.subf %37, %29 : vector<2x128xf32>
    %39 = arith.mulf %38, %36 : vector<2x128xf32>
    %40 = arith.mulf %29, %11 : vector<2x128xf32>
    %41 = arith.addf %39, %40 : vector<2x128xf32>
    %42 = vector.broadcast %10 : vector<1x128xf32> to vector<2x128xf32>
    %43 = arith.mulf %41, %42 : vector<2x128xf32>
    %c0_14 = arith.constant 0 : index
    %c384_15 = arith.constant 384 : index
    %44 = vector.load %arg2[%c0_14, %c384_15] : memref<128x1184xf32, #tpu.memory_space<vmem>>, vector<128x384xf32>
    %cst_16 = arith.constant dense<0.000000e+00> : vector<2x384xf32>
    %45 = tpu.matmul %43, %44, %cst_16 {dimension_numbers = #tpu.dot_dimension_numbers<[1], [0], [0], [1], [0, 0, 1, 1], [], []>} : vector<2x128xf32>, vector<128x384xf32>, vector<2x384xf32> -> vector<2x384xf32>
    %c0_17 = arith.constant 0 : index
    %c0_18 = arith.constant 0 : index
    %46 = vector.load %arg2[%c0_17, %c0_18] : memref<128x1184xf32, #tpu.memory_space<vmem>>, vector<128x384xf32>
    %c0_19 = arith.constant 0 : index
    %c384_20 = arith.constant 384 : index
    %47 = vector.load %arg3[%c0_19, %c384_20] : memref<1x512xf32, #tpu.memory_space<vmem>>, vector<1x128xf32>
    %48 = vector.extract_strided_slice %5 {offsets = [2, 0], sizes = [2, 384], strides = [1, 1]} : vector<18x384xf32> to vector<2x384xf32>
    %49 = arith.addf %48, %45 : vector<2x384xf32>
    %cst_21 = arith.constant dense<0.000000e+00> : vector<2x384xf32>
    %50 = tpu.matmul %43, %46, %cst_21 {dimension_numbers = #tpu.dot_dimension_numbers<[1], [0], [0], [1], [0, 0, 1, 1], [], []>} : vector<2x128xf32>, vector<128x384xf32>, vector<2x384xf32> -> vector<2x384xf32>
    %51 = vector.extract_strided_slice %49 {offsets = [0, 0], sizes = [2, 256], strides = [1, 1]} : vector<2x384xf32> to vector<2x256xf32>
    %52 = vector.extract_strided_slice %50 {offsets = [0, 0], sizes = [2, 256], strides = [1, 1]} : vector<2x384xf32> to vector<2x256xf32>
    %53 = arith.addf %51, %52 : vector<2x256xf32>
    %cst_22 = arith.constant 5.000000e-01 : f32
    %54 = vector.broadcast %cst_22 : f32 to vector<2x256xf32>
    %55 = arith.mulf %54, %53 : vector<2x256xf32>
    %56 = math.tanh %55 : vector<2x256xf32>
    %cst_23 = arith.constant 5.000000e-01 : f32
    %57 = vector.broadcast %cst_23 : f32 to vector<2x256xf32>
    %58 = arith.mulf %57, %56 : vector<2x256xf32>
    %cst_24 = arith.constant 5.000000e-01 : f32
    %59 = vector.broadcast %cst_24 : f32 to vector<2x256xf32>
    %60 = arith.addf %58, %59 : vector<2x256xf32>
    %61 = vector.extract_strided_slice %60 {offsets = [0, 0], sizes = [2, 128], strides = [1, 1]} : vector<2x256xf32> to vector<2x128xf32>
    %62 = vector.extract_strided_slice %60 {offsets = [0, 128], sizes = [2, 128], strides = [1, 1]} : vector<2x256xf32> to vector<2x128xf32>
    %63 = vector.extract_strided_slice %49 {offsets = [0, 256], sizes = [2, 128], strides = [1, 1]} : vector<2x384xf32> to vector<2x128xf32>
    %64 = vector.extract_strided_slice %50 {offsets = [0, 256], sizes = [2, 128], strides = [1, 1]} : vector<2x384xf32> to vector<2x128xf32>
    %65 = vector.broadcast %47 : vector<1x128xf32> to vector<2x128xf32>
    %66 = arith.addf %64, %65 : vector<2x128xf32>
    %67 = arith.mulf %61, %66 : vector<2x128xf32>
    %68 = arith.addf %63, %67 : vector<2x128xf32>
    %69 = math.tanh %68 : vector<2x128xf32>
    %cst_25 = arith.constant 1.000000e+00 : f32
    %70 = vector.broadcast %cst_25 : f32 to vector<2x128xf32>
    %71 = arith.subf %70, %62 : vector<2x128xf32>
    %72 = arith.mulf %71, %69 : vector<2x128xf32>
    %73 = arith.mulf %62, %43 : vector<2x128xf32>
    %74 = arith.addf %72, %73 : vector<2x128xf32>
    %c0_26 = arith.constant 0 : index
    %c1152 = arith.constant 1152 : index
    %75 = vector.load %arg2[%c0_26, %c1152] : memref<128x1184xf32, #tpu.memory_space<vmem>>, vector<128x32xf32>
    %cst_27 = arith.constant dense<0.000000e+00> : vector<2x32xf32>
    %76 = tpu.matmul %74, %75, %cst_27 {dimension_numbers = #tpu.dot_dimension_numbers<[1], [0], [0], [1], [0, 0, 1, 1], [], []>} : vector<2x128xf32>, vector<128x32xf32>, vector<2x32xf32> -> vector<2x32xf32>
    %c0_28 = arith.constant 0 : index
    %c0_29 = arith.constant 0 : index
    %77 = vector.load %arg7[%c0_28, %c0_29] : memref<16x32xf32, #tpu.memory_space<vmem>>, vector<2x32xf32>
    tpu.vector_store %arg7[%c0_28, %c0_29], %76 {strides = array<i32>} : memref<16x32xf32, #tpu.memory_space<vmem>>, vector<2x32xf32>,
    %c0_30 = arith.constant 0 : index
    %c384_31 = arith.constant 384 : index
    %78 = vector.load %arg2[%c0_30, %c384_31] : memref<128x1184xf32, #tpu.memory_space<vmem>>, vector<128x384xf32>
    %cst_32 = arith.constant dense<0.000000e+00> : vector<2x384xf32>
    %79 = tpu.matmul %74, %78, %cst_32 {dimension_numbers = #tpu.dot_dimension_numbers<[1], [0], [0], [1], [0, 0, 1, 1], [], []>} : vector<2x128xf32>, vector<128x384xf32>, vector<2x384xf32> -> vector<2x384xf32>
    %c0_33 = arith.constant 0 : index
    %c0_34 = arith.constant 0 : index
    %80 = vector.load %arg2[%c0_33, %c0_34] : memref<128x1184xf32, #tpu.memory_space<vmem>>, vector<128x384xf32>
    %c0_35 = arith.constant 0 : index
    %c384_36 = arith.constant 384 : index
    %81 = vector.load %arg3[%c0_35, %c384_36] : memref<1x512xf32, #tpu.memory_space<vmem>>, vector<1x128xf32>
    %82 = vector.extract_strided_slice %5 {offsets = [4, 0], sizes = [2, 384], strides = [1, 1]} : vector<18x384xf32> to vector<2x384xf32>
    %83 = arith.addf %82, %79 : vector<2x384xf32>
    %cst_37 = arith.constant dense<0.000000e+00> : vector<2x384xf32>
    %84 = tpu.matmul %74, %80, %cst_37 {dimension_numbers = #tpu.dot_dimension_numbers<[1], [0], [0], [1], [0, 0, 1, 1], [], []>} : vector<2x128xf32>, vector<128x384xf32>, vector<2x384xf32> -> vector<2x384xf32>
    %85 = vector.extract_strided_slice %83 {offsets = [0, 0], sizes = [2, 256], strides = [1, 1]} : vector<2x384xf32> to vector<2x256xf32>
    %86 = vector.extract_strided_slice %84 {offsets = [0, 0], sizes = [2, 256], strides = [1, 1]} : vector<2x384xf32> to vector<2x256xf32>
    %87 = arith.addf %85, %86 : vector<2x256xf32>
    %cst_38 = arith.constant 5.000000e-01 : f32
    %88 = vector.broadcast %cst_38 : f32 to vector<2x256xf32>
    %89 = arith.mulf %88, %87 : vector<2x256xf32>
    %90 = math.tanh %89 : vector<2x256xf32>
    %cst_39 = arith.constant 5.000000e-01 : f32
    %91 = vector.broadcast %cst_39 : f32 to vector<2x256xf32>
    %92 = arith.mulf %91, %90 : vector<2x256xf32>
    %cst_40 = arith.constant 5.000000e-01 : f32
    %93 = vector.broadcast %cst_40 : f32 to vector<2x256xf32>
    %94 = arith.addf %92, %93 : vector<2x256xf32>
    %95 = vector.extract_strided_slice %94 {offsets = [0, 0], sizes = [2, 128], strides = [1, 1]} : vector<2x256xf32> to vector<2x128xf32>
    %96 = vector.extract_strided_slice %94 {offsets = [0, 128], sizes = [2, 128], strides = [1, 1]} : vector<2x256xf32> to vector<2x128xf32>
    %97 = vector.extract_strided_slice %83 {offsets = [0, 256], sizes = [2, 128], strides = [1, 1]} : vector<2x384xf32> to vector<2x128xf32>
    %98 = vector.extract_strided_slice %84 {offsets = [0, 256], sizes = [2, 128], strides = [1, 1]} : vector<2x384xf32> to vector<2x128xf32>
    %99 = vector.broadcast %81 : vector<1x128xf32> to vector<2x128xf32>
    %100 = arith.addf %98, %99 : vector<2x128xf32>
    %101 = arith.mulf %95, %100 : vector<2x128xf32>
    %102 = arith.addf %97, %101 : vector<2x128xf32>
    %103 = math.tanh %102 : vector<2x128xf32>
    %cst_41 = arith.constant 1.000000e+00 : f32
    %104 = vector.broadcast %cst_41 : f32 to vector<2x128xf32>
    %105 = arith.subf %104, %96 : vector<2x128xf32>
    %106 = arith.mulf %105, %103 : vector<2x128xf32>
    %107 = arith.mulf %96, %74 : vector<2x128xf32>
    %108 = arith.addf %106, %107 : vector<2x128xf32>
    %c0_42 = arith.constant 0 : index
    %c1152_43 = arith.constant 1152 : index
    %109 = vector.load %arg2[%c0_42, %c1152_43] : memref<128x1184xf32, #tpu.memory_space<vmem>>, vector<128x32xf32>
    %cst_44 = arith.constant dense<0.000000e+00> : vector<2x32xf32>
    %110 = tpu.matmul %108, %109, %cst_44 {dimension_numbers = #tpu.dot_dimension_numbers<[1], [0], [0], [1], [0, 0, 1, 1], [], []>} : vector<2x128xf32>, vector<128x32xf32>, vector<2x32xf32> -> vector<2x32xf32>
    %c2 = arith.constant 2 : index
    %c0_45 = arith.constant 0 : index
    %111 = vector.load %arg7[%c2, %c0_45] : memref<16x32xf32, #tpu.memory_space<vmem>>, vector<2x32xf32>
    tpu.vector_store %arg7[%c2, %c0_45], %110 {strides = array<i32>} : memref<16x32xf32, #tpu.memory_space<vmem>>, vector<2x32xf32>,
    %c0_46 = arith.constant 0 : index
    %c384_47 = arith.constant 384 : index
    %112 = vector.load %arg2[%c0_46, %c384_47] : memref<128x1184xf32, #tpu.memory_space<vmem>>, vector<128x384xf32>
    %cst_48 = arith.constant dense<0.000000e+00> : vector<2x384xf32>
    %113 = tpu.matmul %108, %112, %cst_48 {dimension_numbers = #tpu.dot_dimension_numbers<[1], [0], [0], [1], [0, 0, 1, 1], [], []>} : vector<2x128xf32>, vector<128x384xf32>, vector<2x384xf32> -> vector<2x384xf32>
    %c0_49 = arith.constant 0 : index
    %c0_50 = arith.constant 0 : index
    %114 = vector.load %arg2[%c0_49, %c0_50] : memref<128x1184xf32, #tpu.memory_space<vmem>>, vector<128x384xf32>
    %c0_51 = arith.constant 0 : index
    %c384_52 = arith.constant 384 : index
    %115 = vector.load %arg3[%c0_51, %c384_52] : memref<1x512xf32, #tpu.memory_space<vmem>>, vector<1x128xf32>
    %116 = vector.extract_strided_slice %5 {offsets = [6, 0], sizes = [2, 384], strides = [1, 1]} : vector<18x384xf32> to vector<2x384xf32>
    %117 = arith.addf %116, %113 : vector<2x384xf32>
    %cst_53 = arith.constant dense<0.000000e+00> : vector<2x384xf32>
    %118 = tpu.matmul %108, %114, %cst_53 {dimension_numbers = #tpu.dot_dimension_numbers<[1], [0], [0], [1], [0, 0, 1, 1], [], []>} : vector<2x128xf32>, vector<128x384xf32>, vector<2x384xf32> -> vector<2x384xf32>
    %119 = vector.extract_strided_slice %117 {offsets = [0, 0], sizes = [2, 256], strides = [1, 1]} : vector<2x384xf32> to vector<2x256xf32>
    %120 = vector.extract_strided_slice %118 {offsets = [0, 0], sizes = [2, 256], strides = [1, 1]} : vector<2x384xf32> to vector<2x256xf32>
    %121 = arith.addf %119, %120 : vector<2x256xf32>
    %cst_54 = arith.constant 5.000000e-01 : f32
    %122 = vector.broadcast %cst_54 : f32 to vector<2x256xf32>
    %123 = arith.mulf %122, %121 : vector<2x256xf32>
    %124 = math.tanh %123 : vector<2x256xf32>
    %cst_55 = arith.constant 5.000000e-01 : f32
    %125 = vector.broadcast %cst_55 : f32 to vector<2x256xf32>
    %126 = arith.mulf %125, %124 : vector<2x256xf32>
    %cst_56 = arith.constant 5.000000e-01 : f32
    %127 = vector.broadcast %cst_56 : f32 to vector<2x256xf32>
    %128 = arith.addf %126, %127 : vector<2x256xf32>
    %129 = vector.extract_strided_slice %128 {offsets = [0, 0], sizes = [2, 128], strides = [1, 1]} : vector<2x256xf32> to vector<2x128xf32>
    %130 = vector.extract_strided_slice %128 {offsets = [0, 128], sizes = [2, 128], strides = [1, 1]} : vector<2x256xf32> to vector<2x128xf32>
    %131 = vector.extract_strided_slice %117 {offsets = [0, 256], sizes = [2, 128], strides = [1, 1]} : vector<2x384xf32> to vector<2x128xf32>
    %132 = vector.extract_strided_slice %118 {offsets = [0, 256], sizes = [2, 128], strides = [1, 1]} : vector<2x384xf32> to vector<2x128xf32>
    %133 = vector.broadcast %115 : vector<1x128xf32> to vector<2x128xf32>
    %134 = arith.addf %132, %133 : vector<2x128xf32>
    %135 = arith.mulf %129, %134 : vector<2x128xf32>
    %136 = arith.addf %131, %135 : vector<2x128xf32>
    %137 = math.tanh %136 : vector<2x128xf32>
    %cst_57 = arith.constant 1.000000e+00 : f32
    %138 = vector.broadcast %cst_57 : f32 to vector<2x128xf32>
    %139 = arith.subf %138, %130 : vector<2x128xf32>
    %140 = arith.mulf %139, %137 : vector<2x128xf32>
    %141 = arith.mulf %130, %108 : vector<2x128xf32>
    %142 = arith.addf %140, %141 : vector<2x128xf32>
    %c0_58 = arith.constant 0 : index
    %c1152_59 = arith.constant 1152 : index
    %143 = vector.load %arg2[%c0_58, %c1152_59] : memref<128x1184xf32, #tpu.memory_space<vmem>>, vector<128x32xf32>
    %cst_60 = arith.constant dense<0.000000e+00> : vector<2x32xf32>
    %144 = tpu.matmul %142, %143, %cst_60 {dimension_numbers = #tpu.dot_dimension_numbers<[1], [0], [0], [1], [0, 0, 1, 1], [], []>} : vector<2x128xf32>, vector<128x32xf32>, vector<2x32xf32> -> vector<2x32xf32>
    %c4 = arith.constant 4 : index
    %c0_61 = arith.constant 0 : index
    %145 = vector.load %arg7[%c4, %c0_61] : memref<16x32xf32, #tpu.memory_space<vmem>>, vector<2x32xf32>
    tpu.vector_store %arg7[%c4, %c0_61], %144 {strides = array<i32>} : memref<16x32xf32, #tpu.memory_space<vmem>>, vector<2x32xf32>,
    %c0_62 = arith.constant 0 : index
    %c384_63 = arith.constant 384 : index
    %146 = vector.load %arg2[%c0_62, %c384_63] : memref<128x1184xf32, #tpu.memory_space<vmem>>, vector<128x384xf32>
    %cst_64 = arith.constant dense<0.000000e+00> : vector<2x384xf32>
    %147 = tpu.matmul %142, %146, %cst_64 {dimension_numbers = #tpu.dot_dimension_numbers<[1], [0], [0], [1], [0, 0, 1, 1], [], []>} : vector<2x128xf32>, vector<128x384xf32>, vector<2x384xf32> -> vector<2x384xf32>
    %c0_65 = arith.constant 0 : index
    %c0_66 = arith.constant 0 : index
    %148 = vector.load %arg2[%c0_65, %c0_66] : memref<128x1184xf32, #tpu.memory_space<vmem>>, vector<128x384xf32>
    %c0_67 = arith.constant 0 : index
    %c384_68 = arith.constant 384 : index
    %149 = vector.load %arg3[%c0_67, %c384_68] : memref<1x512xf32, #tpu.memory_space<vmem>>, vector<1x128xf32>
    %150 = vector.extract_strided_slice %5 {offsets = [8, 0], sizes = [2, 384], strides = [1, 1]} : vector<18x384xf32> to vector<2x384xf32>
    %151 = arith.addf %150, %147 : vector<2x384xf32>
    %cst_69 = arith.constant dense<0.000000e+00> : vector<2x384xf32>
    %152 = tpu.matmul %142, %148, %cst_69 {dimension_numbers = #tpu.dot_dimension_numbers<[1], [0], [0], [1], [0, 0, 1, 1], [], []>} : vector<2x128xf32>, vector<128x384xf32>, vector<2x384xf32> -> vector<2x384xf32>
    %153 = vector.extract_strided_slice %151 {offsets = [0, 0], sizes = [2, 256], strides = [1, 1]} : vector<2x384xf32> to vector<2x256xf32>
    %154 = vector.extract_strided_slice %152 {offsets = [0, 0], sizes = [2, 256], strides = [1, 1]} : vector<2x384xf32> to vector<2x256xf32>
    %155 = arith.addf %153, %154 : vector<2x256xf32>
    %cst_70 = arith.constant 5.000000e-01 : f32
    %156 = vector.broadcast %cst_70 : f32 to vector<2x256xf32>
    %157 = arith.mulf %156, %155 : vector<2x256xf32>
    %158 = math.tanh %157 : vector<2x256xf32>
    %cst_71 = arith.constant 5.000000e-01 : f32
    %159 = vector.broadcast %cst_71 : f32 to vector<2x256xf32>
    %160 = arith.mulf %159, %158 : vector<2x256xf32>
    %cst_72 = arith.constant 5.000000e-01 : f32
    %161 = vector.broadcast %cst_72 : f32 to vector<2x256xf32>
    %162 = arith.addf %160, %161 : vector<2x256xf32>
    %163 = vector.extract_strided_slice %162 {offsets = [0, 0], sizes = [2, 128], strides = [1, 1]} : vector<2x256xf32> to vector<2x128xf32>
    %164 = vector.extract_strided_slice %162 {offsets = [0, 128], sizes = [2, 128], strides = [1, 1]} : vector<2x256xf32> to vector<2x128xf32>
    %165 = vector.extract_strided_slice %151 {offsets = [0, 256], sizes = [2, 128], strides = [1, 1]} : vector<2x384xf32> to vector<2x128xf32>
    %166 = vector.extract_strided_slice %152 {offsets = [0, 256], sizes = [2, 128], strides = [1, 1]} : vector<2x384xf32> to vector<2x128xf32>
    %167 = vector.broadcast %149 : vector<1x128xf32> to vector<2x128xf32>
    %168 = arith.addf %166, %167 : vector<2x128xf32>
    %169 = arith.mulf %163, %168 : vector<2x128xf32>
    %170 = arith.addf %165, %169 : vector<2x128xf32>
    %171 = math.tanh %170 : vector<2x128xf32>
    %cst_73 = arith.constant 1.000000e+00 : f32
    %172 = vector.broadcast %cst_73 : f32 to vector<2x128xf32>
    %173 = arith.subf %172, %164 : vector<2x128xf32>
    %174 = arith.mulf %173, %171 : vector<2x128xf32>
    %175 = arith.mulf %164, %142 : vector<2x128xf32>
    %176 = arith.addf %174, %175 : vector<2x128xf32>
    %c0_74 = arith.constant 0 : index
    %c1152_75 = arith.constant 1152 : index
    %177 = vector.load %arg2[%c0_74, %c1152_75] : memref<128x1184xf32, #tpu.memory_space<vmem>>, vector<128x32xf32>
    %cst_76 = arith.constant dense<0.000000e+00> : vector<2x32xf32>
    %178 = tpu.matmul %176, %177, %cst_76 {dimension_numbers = #tpu.dot_dimension_numbers<[1], [0], [0], [1], [0, 0, 1, 1], [], []>} : vector<2x128xf32>, vector<128x32xf32>, vector<2x32xf32> -> vector<2x32xf32>
    %c6 = arith.constant 6 : index
    %c0_77 = arith.constant 0 : index
    %179 = vector.load %arg7[%c6, %c0_77] : memref<16x32xf32, #tpu.memory_space<vmem>>, vector<2x32xf32>
    tpu.vector_store %arg7[%c6, %c0_77], %178 {strides = array<i32>} : memref<16x32xf32, #tpu.memory_space<vmem>>, vector<2x32xf32>,
    %c0_78 = arith.constant 0 : index
    %c384_79 = arith.constant 384 : index
    %180 = vector.load %arg2[%c0_78, %c384_79] : memref<128x1184xf32, #tpu.memory_space<vmem>>, vector<128x384xf32>
    %cst_80 = arith.constant dense<0.000000e+00> : vector<2x384xf32>
    %181 = tpu.matmul %176, %180, %cst_80 {dimension_numbers = #tpu.dot_dimension_numbers<[1], [0], [0], [1], [0, 0, 1, 1], [], []>} : vector<2x128xf32>, vector<128x384xf32>, vector<2x384xf32> -> vector<2x384xf32>
    %c0_81 = arith.constant 0 : index
    %c0_82 = arith.constant 0 : index
    %182 = vector.load %arg2[%c0_81, %c0_82] : memref<128x1184xf32, #tpu.memory_space<vmem>>, vector<128x384xf32>
    %c0_83 = arith.constant 0 : index
    %c384_84 = arith.constant 384 : index
    %183 = vector.load %arg3[%c0_83, %c384_84] : memref<1x512xf32, #tpu.memory_space<vmem>>, vector<1x128xf32>
    %184 = vector.extract_strided_slice %5 {offsets = [10, 0], sizes = [2, 384], strides = [1, 1]} : vector<18x384xf32> to vector<2x384xf32>
    %185 = arith.addf %184, %181 : vector<2x384xf32>
    %cst_85 = arith.constant dense<0.000000e+00> : vector<2x384xf32>
    %186 = tpu.matmul %176, %182, %cst_85 {dimension_numbers = #tpu.dot_dimension_numbers<[1], [0], [0], [1], [0, 0, 1, 1], [], []>} : vector<2x128xf32>, vector<128x384xf32>, vector<2x384xf32> -> vector<2x384xf32>
    %187 = vector.extract_strided_slice %185 {offsets = [0, 0], sizes = [2, 256], strides = [1, 1]} : vector<2x384xf32> to vector<2x256xf32>
    %188 = vector.extract_strided_slice %186 {offsets = [0, 0], sizes = [2, 256], strides = [1, 1]} : vector<2x384xf32> to vector<2x256xf32>
    %189 = arith.addf %187, %188 : vector<2x256xf32>
    %cst_86 = arith.constant 5.000000e-01 : f32
    %190 = vector.broadcast %cst_86 : f32 to vector<2x256xf32>
    %191 = arith.mulf %190, %189 : vector<2x256xf32>
    %192 = math.tanh %191 : vector<2x256xf32>
    %cst_87 = arith.constant 5.000000e-01 : f32
    %193 = vector.broadcast %cst_87 : f32 to vector<2x256xf32>
    %194 = arith.mulf %193, %192 : vector<2x256xf32>
    %cst_88 = arith.constant 5.000000e-01 : f32
    %195 = vector.broadcast %cst_88 : f32 to vector<2x256xf32>
    %196 = arith.addf %194, %195 : vector<2x256xf32>
    %197 = vector.extract_strided_slice %196 {offsets = [0, 0], sizes = [2, 128], strides = [1, 1]} : vector<2x256xf32> to vector<2x128xf32>
    %198 = vector.extract_strided_slice %196 {offsets = [0, 128], sizes = [2, 128], strides = [1, 1]} : vector<2x256xf32> to vector<2x128xf32>
    %199 = vector.extract_strided_slice %185 {offsets = [0, 256], sizes = [2, 128], strides = [1, 1]} : vector<2x384xf32> to vector<2x128xf32>
    %200 = vector.extract_strided_slice %186 {offsets = [0, 256], sizes = [2, 128], strides = [1, 1]} : vector<2x384xf32> to vector<2x128xf32>
    %201 = vector.broadcast %183 : vector<1x128xf32> to vector<2x128xf32>
    %202 = arith.addf %200, %201 : vector<2x128xf32>
    %203 = arith.mulf %197, %202 : vector<2x128xf32>
    %204 = arith.addf %199, %203 : vector<2x128xf32>
    %205 = math.tanh %204 : vector<2x128xf32>
    %cst_89 = arith.constant 1.000000e+00 : f32
    %206 = vector.broadcast %cst_89 : f32 to vector<2x128xf32>
    %207 = arith.subf %206, %198 : vector<2x128xf32>
    %208 = arith.mulf %207, %205 : vector<2x128xf32>
    %209 = arith.mulf %198, %176 : vector<2x128xf32>
    %210 = arith.addf %208, %209 : vector<2x128xf32>
    %c0_90 = arith.constant 0 : index
    %c1152_91 = arith.constant 1152 : index
    %211 = vector.load %arg2[%c0_90, %c1152_91] : memref<128x1184xf32, #tpu.memory_space<vmem>>, vector<128x32xf32>
    %cst_92 = arith.constant dense<0.000000e+00> : vector<2x32xf32>
    %212 = tpu.matmul %210, %211, %cst_92 {dimension_numbers = #tpu.dot_dimension_numbers<[1], [0], [0], [1], [0, 0, 1, 1], [], []>} : vector<2x128xf32>, vector<128x32xf32>, vector<2x32xf32> -> vector<2x32xf32>
    %c8 = arith.constant 8 : index
    %c0_93 = arith.constant 0 : index
    %213 = vector.load %arg7[%c8, %c0_93] : memref<16x32xf32, #tpu.memory_space<vmem>>, vector<2x32xf32>
    tpu.vector_store %arg7[%c8, %c0_93], %212 {strides = array<i32>} : memref<16x32xf32, #tpu.memory_space<vmem>>, vector<2x32xf32>,
    %c0_94 = arith.constant 0 : index
    %c384_95 = arith.constant 384 : index
    %214 = vector.load %arg2[%c0_94, %c384_95] : memref<128x1184xf32, #tpu.memory_space<vmem>>, vector<128x384xf32>
    %cst_96 = arith.constant dense<0.000000e+00> : vector<2x384xf32>
    %215 = tpu.matmul %210, %214, %cst_96 {dimension_numbers = #tpu.dot_dimension_numbers<[1], [0], [0], [1], [0, 0, 1, 1], [], []>} : vector<2x128xf32>, vector<128x384xf32>, vector<2x384xf32> -> vector<2x384xf32>
    %c0_97 = arith.constant 0 : index
    %c0_98 = arith.constant 0 : index
    %216 = vector.load %arg2[%c0_97, %c0_98] : memref<128x1184xf32, #tpu.memory_space<vmem>>, vector<128x384xf32>
    %c0_99 = arith.constant 0 : index
    %c384_100 = arith.constant 384 : index
    %217 = vector.load %arg3[%c0_99, %c384_100] : memref<1x512xf32, #tpu.memory_space<vmem>>, vector<1x128xf32>
    %218 = vector.extract_strided_slice %5 {offsets = [12, 0], sizes = [2, 384], strides = [1, 1]} : vector<18x384xf32> to vector<2x384xf32>
    %219 = arith.addf %218, %215 : vector<2x384xf32>
    %cst_101 = arith.constant dense<0.000000e+00> : vector<2x384xf32>
    %220 = tpu.matmul %210, %216, %cst_101 {dimension_numbers = #tpu.dot_dimension_numbers<[1], [0], [0], [1], [0, 0, 1, 1], [], []>} : vector<2x128xf32>, vector<128x384xf32>, vector<2x384xf32> -> vector<2x384xf32>
    %221 = vector.extract_strided_slice %219 {offsets = [0, 0], sizes = [2, 256], strides = [1, 1]} : vector<2x384xf32> to vector<2x256xf32>
    %222 = vector.extract_strided_slice %220 {offsets = [0, 0], sizes = [2, 256], strides = [1, 1]} : vector<2x384xf32> to vector<2x256xf32>
    %223 = arith.addf %221, %222 : vector<2x256xf32>
    %cst_102 = arith.constant 5.000000e-01 : f32
    %224 = vector.broadcast %cst_102 : f32 to vector<2x256xf32>
    %225 = arith.mulf %224, %223 : vector<2x256xf32>
    %226 = math.tanh %225 : vector<2x256xf32>
    %cst_103 = arith.constant 5.000000e-01 : f32
    %227 = vector.broadcast %cst_103 : f32 to vector<2x256xf32>
    %228 = arith.mulf %227, %226 : vector<2x256xf32>
    %cst_104 = arith.constant 5.000000e-01 : f32
    %229 = vector.broadcast %cst_104 : f32 to vector<2x256xf32>
    %230 = arith.addf %228, %229 : vector<2x256xf32>
    %231 = vector.extract_strided_slice %230 {offsets = [0, 0], sizes = [2, 128], strides = [1, 1]} : vector<2x256xf32> to vector<2x128xf32>
    %232 = vector.extract_strided_slice %230 {offsets = [0, 128], sizes = [2, 128], strides = [1, 1]} : vector<2x256xf32> to vector<2x128xf32>
    %233 = vector.extract_strided_slice %219 {offsets = [0, 256], sizes = [2, 128], strides = [1, 1]} : vector<2x384xf32> to vector<2x128xf32>
    %234 = vector.extract_strided_slice %220 {offsets = [0, 256], sizes = [2, 128], strides = [1, 1]} : vector<2x384xf32> to vector<2x128xf32>
    %235 = vector.broadcast %217 : vector<1x128xf32> to vector<2x128xf32>
    %236 = arith.addf %234, %235 : vector<2x128xf32>
    %237 = arith.mulf %231, %236 : vector<2x128xf32>
    %238 = arith.addf %233, %237 : vector<2x128xf32>
    %239 = math.tanh %238 : vector<2x128xf32>
    %cst_105 = arith.constant 1.000000e+00 : f32
    %240 = vector.broadcast %cst_105 : f32 to vector<2x128xf32>
    %241 = arith.subf %240, %232 : vector<2x128xf32>
    %242 = arith.mulf %241, %239 : vector<2x128xf32>
    %243 = arith.mulf %232, %210 : vector<2x128xf32>
    %244 = arith.addf %242, %243 : vector<2x128xf32>
    %c0_106 = arith.constant 0 : index
    %c1152_107 = arith.constant 1152 : index
    %245 = vector.load %arg2[%c0_106, %c1152_107] : memref<128x1184xf32, #tpu.memory_space<vmem>>, vector<128x32xf32>
    %cst_108 = arith.constant dense<0.000000e+00> : vector<2x32xf32>
    %246 = tpu.matmul %244, %245, %cst_108 {dimension_numbers = #tpu.dot_dimension_numbers<[1], [0], [0], [1], [0, 0, 1, 1], [], []>} : vector<2x128xf32>, vector<128x32xf32>, vector<2x32xf32> -> vector<2x32xf32>
    %c10 = arith.constant 10 : index
    %c0_109 = arith.constant 0 : index
    %247 = vector.load %arg7[%c10, %c0_109] : memref<16x32xf32, #tpu.memory_space<vmem>>, vector<2x32xf32>
    tpu.vector_store %arg7[%c10, %c0_109], %246 {strides = array<i32>} : memref<16x32xf32, #tpu.memory_space<vmem>>, vector<2x32xf32>,
    %c0_110 = arith.constant 0 : index
    %c384_111 = arith.constant 384 : index
    %248 = vector.load %arg2[%c0_110, %c384_111] : memref<128x1184xf32, #tpu.memory_space<vmem>>, vector<128x384xf32>
    %cst_112 = arith.constant dense<0.000000e+00> : vector<2x384xf32>
    %249 = tpu.matmul %244, %248, %cst_112 {dimension_numbers = #tpu.dot_dimension_numbers<[1], [0], [0], [1], [0, 0, 1, 1], [], []>} : vector<2x128xf32>, vector<128x384xf32>, vector<2x384xf32> -> vector<2x384xf32>
    %c0_113 = arith.constant 0 : index
    %c0_114 = arith.constant 0 : index
    %250 = vector.load %arg2[%c0_113, %c0_114] : memref<128x1184xf32, #tpu.memory_space<vmem>>, vector<128x384xf32>
    %c0_115 = arith.constant 0 : index
    %c384_116 = arith.constant 384 : index
    %251 = vector.load %arg3[%c0_115, %c384_116] : memref<1x512xf32, #tpu.memory_space<vmem>>, vector<1x128xf32>
    %252 = vector.extract_strided_slice %5 {offsets = [14, 0], sizes = [2, 384], strides = [1, 1]} : vector<18x384xf32> to vector<2x384xf32>
    %253 = arith.addf %252, %249 : vector<2x384xf32>
    %cst_117 = arith.constant dense<0.000000e+00> : vector<2x384xf32>
    %254 = tpu.matmul %244, %250, %cst_117 {dimension_numbers = #tpu.dot_dimension_numbers<[1], [0], [0], [1], [0, 0, 1, 1], [], []>} : vector<2x128xf32>, vector<128x384xf32>, vector<2x384xf32> -> vector<2x384xf32>
    %255 = vector.extract_strided_slice %253 {offsets = [0, 0], sizes = [2, 256], strides = [1, 1]} : vector<2x384xf32> to vector<2x256xf32>
    %256 = vector.extract_strided_slice %254 {offsets = [0, 0], sizes = [2, 256], strides = [1, 1]} : vector<2x384xf32> to vector<2x256xf32>
    %257 = arith.addf %255, %256 : vector<2x256xf32>
    %cst_118 = arith.constant 5.000000e-01 : f32
    %258 = vector.broadcast %cst_118 : f32 to vector<2x256xf32>
    %259 = arith.mulf %258, %257 : vector<2x256xf32>
    %260 = math.tanh %259 : vector<2x256xf32>
    %cst_119 = arith.constant 5.000000e-01 : f32
    %261 = vector.broadcast %cst_119 : f32 to vector<2x256xf32>
    %262 = arith.mulf %261, %260 : vector<2x256xf32>
    %cst_120 = arith.constant 5.000000e-01 : f32
    %263 = vector.broadcast %cst_120 : f32 to vector<2x256xf32>
    %264 = arith.addf %262, %263 : vector<2x256xf32>
    %265 = vector.extract_strided_slice %264 {offsets = [0, 0], sizes = [2, 128], strides = [1, 1]} : vector<2x256xf32> to vector<2x128xf32>
    %266 = vector.extract_strided_slice %264 {offsets = [0, 128], sizes = [2, 128], strides = [1, 1]} : vector<2x256xf32> to vector<2x128xf32>
    %267 = vector.extract_strided_slice %253 {offsets = [0, 256], sizes = [2, 128], strides = [1, 1]} : vector<2x384xf32> to vector<2x128xf32>
    %268 = vector.extract_strided_slice %254 {offsets = [0, 256], sizes = [2, 128], strides = [1, 1]} : vector<2x384xf32> to vector<2x128xf32>
    %269 = vector.broadcast %251 : vector<1x128xf32> to vector<2x128xf32>
    %270 = arith.addf %268, %269 : vector<2x128xf32>
    %271 = arith.mulf %265, %270 : vector<2x128xf32>
    %272 = arith.addf %267, %271 : vector<2x128xf32>
    %273 = math.tanh %272 : vector<2x128xf32>
    %cst_121 = arith.constant 1.000000e+00 : f32
    %274 = vector.broadcast %cst_121 : f32 to vector<2x128xf32>
    %275 = arith.subf %274, %266 : vector<2x128xf32>
    %276 = arith.mulf %275, %273 : vector<2x128xf32>
    %277 = arith.mulf %266, %244 : vector<2x128xf32>
    %278 = arith.addf %276, %277 : vector<2x128xf32>
    %c0_122 = arith.constant 0 : index
    %c1152_123 = arith.constant 1152 : index
    %279 = vector.load %arg2[%c0_122, %c1152_123] : memref<128x1184xf32, #tpu.memory_space<vmem>>, vector<128x32xf32>
    %cst_124 = arith.constant dense<0.000000e+00> : vector<2x32xf32>
    %280 = tpu.matmul %278, %279, %cst_124 {dimension_numbers = #tpu.dot_dimension_numbers<[1], [0], [0], [1], [0, 0, 1, 1], [], []>} : vector<2x128xf32>, vector<128x32xf32>, vector<2x32xf32> -> vector<2x32xf32>
    %c12 = arith.constant 12 : index
    %c0_125 = arith.constant 0 : index
    %281 = vector.load %arg7[%c12, %c0_125] : memref<16x32xf32, #tpu.memory_space<vmem>>, vector<2x32xf32>
    tpu.vector_store %arg7[%c12, %c0_125], %280 {strides = array<i32>} : memref<16x32xf32, #tpu.memory_space<vmem>>, vector<2x32xf32>,
    %c0_126 = arith.constant 0 : index
    %c384_127 = arith.constant 384 : index
    %282 = vector.load %arg2[%c0_126, %c384_127] : memref<128x1184xf32, #tpu.memory_space<vmem>>, vector<128x384xf32>
    %cst_128 = arith.constant dense<0.000000e+00> : vector<2x384xf32>
    %283 = tpu.matmul %278, %282, %cst_128 {dimension_numbers = #tpu.dot_dimension_numbers<[1], [0], [0], [1], [0, 0, 1, 1], [], []>} : vector<2x128xf32>, vector<128x384xf32>, vector<2x384xf32> -> vector<2x384xf32>
    %c0_129 = arith.constant 0 : index
    %c0_130 = arith.constant 0 : index
    %284 = vector.load %arg2[%c0_129, %c0_130] : memref<128x1184xf32, #tpu.memory_space<vmem>>, vector<128x384xf32>
    %c0_131 = arith.constant 0 : index
    %c384_132 = arith.constant 384 : index
    %285 = vector.load %arg3[%c0_131, %c384_132] : memref<1x512xf32, #tpu.memory_space<vmem>>, vector<1x128xf32>
    %286 = vector.extract_strided_slice %5 {offsets = [16, 0], sizes = [2, 384], strides = [1, 1]} : vector<18x384xf32> to vector<2x384xf32>
    %287 = arith.addf %286, %283 : vector<2x384xf32>
    %cst_133 = arith.constant dense<0.000000e+00> : vector<2x384xf32>
    %288 = tpu.matmul %278, %284, %cst_133 {dimension_numbers = #tpu.dot_dimension_numbers<[1], [0], [0], [1], [0, 0, 1, 1], [], []>} : vector<2x128xf32>, vector<128x384xf32>, vector<2x384xf32> -> vector<2x384xf32>
    %289 = vector.extract_strided_slice %287 {offsets = [0, 0], sizes = [2, 256], strides = [1, 1]} : vector<2x384xf32> to vector<2x256xf32>
    %290 = vector.extract_strided_slice %288 {offsets = [0, 0], sizes = [2, 256], strides = [1, 1]} : vector<2x384xf32> to vector<2x256xf32>
    %291 = arith.addf %289, %290 : vector<2x256xf32>
    %cst_134 = arith.constant 5.000000e-01 : f32
    %292 = vector.broadcast %cst_134 : f32 to vector<2x256xf32>
    %293 = arith.mulf %292, %291 : vector<2x256xf32>
    %294 = math.tanh %293 : vector<2x256xf32>
    %cst_135 = arith.constant 5.000000e-01 : f32
    %295 = vector.broadcast %cst_135 : f32 to vector<2x256xf32>
    %296 = arith.mulf %295, %294 : vector<2x256xf32>
    %cst_136 = arith.constant 5.000000e-01 : f32
    %297 = vector.broadcast %cst_136 : f32 to vector<2x256xf32>
    %298 = arith.addf %296, %297 : vector<2x256xf32>
    %299 = vector.extract_strided_slice %298 {offsets = [0, 0], sizes = [2, 128], strides = [1, 1]} : vector<2x256xf32> to vector<2x128xf32>
    %300 = vector.extract_strided_slice %298 {offsets = [0, 128], sizes = [2, 128], strides = [1, 1]} : vector<2x256xf32> to vector<2x128xf32>
    %301 = vector.extract_strided_slice %287 {offsets = [0, 256], sizes = [2, 128], strides = [1, 1]} : vector<2x384xf32> to vector<2x128xf32>
    %302 = vector.extract_strided_slice %288 {offsets = [0, 256], sizes = [2, 128], strides = [1, 1]} : vector<2x384xf32> to vector<2x128xf32>
    %303 = vector.broadcast %285 : vector<1x128xf32> to vector<2x128xf32>
    %304 = arith.addf %302, %303 : vector<2x128xf32>
    %305 = arith.mulf %299, %304 : vector<2x128xf32>
    %306 = arith.addf %301, %305 : vector<2x128xf32>
    %307 = math.tanh %306 : vector<2x128xf32>
    %cst_137 = arith.constant 1.000000e+00 : f32
    %308 = vector.broadcast %cst_137 : f32 to vector<2x128xf32>
    %309 = arith.subf %308, %300 : vector<2x128xf32>
    %310 = arith.mulf %309, %307 : vector<2x128xf32>
    %311 = arith.mulf %300, %278 : vector<2x128xf32>
    %312 = arith.addf %310, %311 : vector<2x128xf32>
    %c0_138 = arith.constant 0 : index
    %c1152_139 = arith.constant 1152 : index
    %313 = vector.load %arg2[%c0_138, %c1152_139] : memref<128x1184xf32, #tpu.memory_space<vmem>>, vector<128x32xf32>
    %cst_140 = arith.constant dense<0.000000e+00> : vector<2x32xf32>
    %314 = tpu.matmul %312, %313, %cst_140 {dimension_numbers = #tpu.dot_dimension_numbers<[1], [0], [0], [1], [0, 0, 1, 1], [], []>} : vector<2x128xf32>, vector<128x32xf32>, vector<2x32xf32> -> vector<2x32xf32>
    %c14 = arith.constant 14 : index
    %c0_141 = arith.constant 0 : index
    %315 = vector.load %arg7[%c14, %c0_141] : memref<16x32xf32, #tpu.memory_space<vmem>>, vector<2x32xf32>
    tpu.vector_store %arg7[%c14, %c0_141], %314 {strides = array<i32>} : memref<16x32xf32, #tpu.memory_space<vmem>>, vector<2x32xf32>,
    %c0_142 = arith.constant 0 : index
    %c0_143 = arith.constant 0 : index
    %316 = vector.load %arg4[%c0_142, %c0_143] : memref<24x16xf32, #tpu.memory_space<vmem>>, vector<24x16xf32>
    %c0_144 = arith.constant 0 : index
    %c0_145 = arith.constant 0 : index
    %317 = vector.load %arg7[%c0_144, %c0_145] : memref<16x32xf32, #tpu.memory_space<vmem>>, vector<16x32xf32>
    %cst_146 = arith.constant dense<0.000000e+00> : vector<24x32xf32>
    %318 = tpu.matmul %316, %317, %cst_146 {dimension_numbers = #tpu.dot_dimension_numbers<[1], [0], [0], [1], [0, 0, 1, 1], [], []>} : vector<24x16xf32>, vector<16x32xf32>, vector<24x32xf32> -> vector<24x32xf32>
    %c0_147 = arith.constant 0 : index
    %c0_148 = arith.constant 0 : index
    %319 = vector.load %arg5[%c0_147, %c0_148] : memref<24x32xf32, #tpu.memory_space<vmem>>, vector<24x32xf32>
    %320 = arith.addf %318, %319 : vector<24x32xf32>
    %c0_149 = arith.constant 0 : index
    %c0_150 = arith.constant 0 : index
    %321 = vector.load %arg6[%c0_149, %c0_150] : memref<24x32xf32, #tpu.memory_space<vmem>>, vector<24x32xf32>
    tpu.vector_store %arg6[%c0_149, %c0_150], %320 {strides = array<i32>} : memref<24x32xf32, #tpu.memory_space<vmem>>, vector<24x32xf32>,
    return
  }
  func.func @transform_0(%arg0: i32) -> (i32, i32) {
    %c0_i32 = arith.constant 0 : i32
    %c0_i32_0 = arith.constant 0 : i32
    %c0_i32_1 = arith.constant 0 : i32
    return %c0_i32, %c0_i32_0 : i32, i32
  }
  func.func @transform_1(%arg0: i32) -> (i32, i32) {
    %c0_i32 = arith.constant 0 : i32
    %c0_i32_0 = arith.constant 0 : i32
    %c0_i32_1 = arith.constant 0 : i32
    return %c0_i32, %c0_i32_0 : i32, i32
  }
  func.func @transform_2(%arg0: i32) -> (i32, i32) {
    %c0_i32 = arith.constant 0 : i32
    %c0_i32_0 = arith.constant 0 : i32
    %c0_i32_1 = arith.constant 0 : i32
    return %c0_i32, %c0_i32_0 : i32, i32
  }
  func.func @transform_3(%arg0: i32) -> (i32, i32) {
    %c0_i32 = arith.constant 0 : i32
    %c0_i32_0 = arith.constant 0 : i32
    %c0_i32_1 = arith.constant 0 : i32
    return %c0_i32, %c0_i32_0 : i32, i32
  }
  func.func @transform_4(%arg0: i32) -> (i32, i32) {
    %c0_i32 = arith.constant 0 : i32
    %c0_i32_0 = arith.constant 0 : i32
    %c0_i32_1 = arith.constant 0 : i32
    return %c0_i32, %c0_i32_0 : i32, i32
  }
  func.func @transform_5(%arg0: i32) -> (i32, i32) {
    %c0_i32 = arith.constant 0 : i32
    %c0_i32_0 = arith.constant 0 : i32
    %c0_i32_1 = arith.constant 0 : i32
    return %c0_i32, %c0_i32_0 : i32, i32
  }
}

</mosaic_0001>

<bundles_post_ra>
// kernel: deobfuscator_pallas.1
= control target key start
LH: loop header
LB: loop body
LE: loop exit
PB: predicated region body
PF: predicated region fallthrough
CT: control target
= control target key end

     0   :  { %v10072_v3 = vmov 0.0   ;;  %vm6004_vm0 = vmmov 0   ;;  %vm52_vm1 = vcmask 261120   ;;  %vm909_vm3 = vcmask 254976   ;;  %s10059_s1 = inlined_call_operand.vmem [shape: f32[128,1184], index: 1, kind: input, shape index: {}]   ;;  %s10060_s0 = inlined_call_operand.vmem [shape: f32[18,32], index: 0, kind: input, shape index: {}]   ;;  %s10061_s2 = inlined_call_operand.vmem [shape: f32[1,512], index: 2, kind: input, shape index: {}]   ;;  %s10062_s3 = inlined_call_operand.vmem [shape: f32[24,16], index: 3, kind: input, shape index: {}]   ;;  %s10063_s4 = inlined_call_operand.vmem [shape: f32[24,32], index: 4, kind: input, shape index: {}]   ;;  %s10064_s5 = inlined_call_operand.vmem [shape: f32[24,32], index: 5, kind: output, shape index: {}]  }
   0x1   :  { %v30_v0 = vld [vmem:[%s10059_s1 + $0x128] sm:$0xff]  ;;  %v29_v1 = vld [vmem:[%s10059_s1 + $0x120] sm:$0xff]  ;;  %v27_v2 = vld [vmem:[%s10059_s1 + $0xd8] sm:$0xff]  ;;  %126 = vmatprep.mubr.f32.mxu0 %v10072_v3  ;;  %5038 = vmatprep.subr.mxu1 %v10072_v3  ;;  %vm4486_vm4 = vcmask 130048  }
   0x2   :  { %86 = vmatprep.subr.mxu0 %v30_v0  ;;  %v26_v4 = vld [vmem:[%s10059_s1 + $0xd0] sm:$0xff]  ;;  %5046 = vmatprep.mubr.msk.f32.mxu1 %vm6004_vm0, %v10072_v3  ;;  %v24_v5 = vld [vmem:[%s10059_s1 + $0x88] sm:$0xff]  ;;  %v23_v6 = vld [vmem:[%s10059_s1 + $0x80] sm:$0xff] }
   0x3   :  { %87 = vmatpush1.msra.mxu0 %v29_v1  ;;  %v21_v7 = vld [vmem:[%s10059_s1 + $0x38] sm:$0xff]  ;;  %v20_v8 = vld [vmem:[%s10059_s1 + $0x30] sm:$0xff]  ;;  %v33_v9 = vld [vmem:[%s10060_s0] sm:$0xff] }
   0x4   :  { %88 = vmatprep.subr.mxu0 %v27_v2  ;;  %v6069_v10 = vld [vmem:[%s10059_s1 + $0x4b8] sm:$0xff]  ;;  %v31_v11 = vld [vmem:[%s10059_s1 + $0x130] sm:$0xff]  ;;  %v28_v13 = vld [vmem:[%s10059_s1 + $0xe0] sm:$0xff] }
   0x5   :  { %89 = vmatpush1.msra.mxu0 %v26_v4  ;;  %v6077_v12 = vld [vmem:[%s10059_s1 + $0x4b0] sm:$0xff]  ;;  %5039 = vmatpush3.msra.mxu1 %v31_v11  ;;  %v6085_v14 = vld [vmem:[%s10059_s1 + $0x468] sm:$0xff]  ;;  %v6093_v15 = vld [vmem:[%s10059_s1 + $0x460] sm:$0xff] }
   0x6   :  { %90 = vmatprep.subr.mxu0 %v24_v5  ;;  %5040 = vmatprep.subr.mxu1 %v10072_v3  ;;  %v25_v16 = vld [vmem:[%s10059_s1 + $0x90] sm:$0xff]  ;;  %v6102_v17 = vld [vmem:[%s10059_s1 + $0x418] sm:$0xff]  ;;  %v22_v19 = vld [vmem:[%s10059_s1 + $0x40] sm:$0xff] }
   0x7   :  { %91 = vmatpush1.msra.mxu0 %v23_v6  ;;  %5041 = vmatpush3.msra.mxu1 %v28_v13  ;;  %v6108_v18 = vld [vmem:[%s10059_s1 + $0x410] sm:$0xff]  ;;  %v6118_v20 = vld [vmem:[%s10059_s1 + $0x3c8] sm:$0xff]  ;;  %v6124_v21 = vld [vmem:[%s10059_s1 + $0x3c0] sm:$0xff] }
   0x8   :  { %92 = vmatprep.subr.mxu0 %v21_v7  ;;  %5042 = vmatprep.subr.mxu1 %v10072_v3  ;;  %v6131_v22 = vld [vmem:[%s10059_s1 + $0x378] sm:$0xff]  ;;  %v6136_v23 = vld [vmem:[%s10059_s1 + $0x4c0] sm:$0xff]  ;;  %v6142_v24 = vld [vmem:[%s10059_s1 + $0x370] sm:$0xff] }
   0x9   :  { %93 = vmatpush1.msra.mxu0 %v20_v8  ;;  %5043 = vmatpush3.msra.mxu1 %v25_v16  ;;  %v6149_v25 = vld [vmem:[%s10059_s1 + $0x328] sm:$0xff]  ;;  %v6156_v26 = vld [vmem:[%s10059_s1 + $0x320] sm:$0xff]  ;;  %v6162_v27 = vld [vmem:[%s10059_s1 + $0x470] sm:$0xff] }
   0xa   :  { %4583 = vmatmul.mubr.msk.f32.vlgmr.msra.gmra.mxu0 %vm52_vm1, %v33_v9  ;;  %282 = vmatprep.subr.mxu0 %v6069_v10  ;;  %v6168_v28 = vld [vmem:[%s10059_s1 + $0x2d8] sm:$0xff]  ;;  %v6174_v29 = vld [vmem:[%s10060_s0 + $0x8] sm:$0xff]  ;;  %v6180_v30 = vld [vmem:[%s10059_s1 + $0x2d0] sm:$0xff] }
   0xb   :  { %283 = vmatpush1.msra.mxu0 %v6077_v12  ;;  %5044 = vmatprep.subr.mxu1 %v10072_v3  ;;  %v6187_v31 = vld [vmem:[%s10059_s1 + $0x288] sm:$0xff]  ;;  %v6193_v32 = vld [vmem:[%s10059_s1 + $0x420] sm:$0xff]  ;;  %v6207_v34 = vld [vmem:[%s10059_s1 + $0x238] sm:$0xff] }
   0xc   :  { %284 = vmatprep.subr.mxu0 %v6085_v14  ;;  %5045 = vmatpush3.msra.mxu1 %v22_v19  ;;  %v6199_v33 = vld [vmem:[%s10059_s1 + $0x280] sm:$0xff]  ;;  %v6214_v35 = vld [vmem:[%s10059_s1 + $0x230] sm:$0xff]  ;;  %v6226_v37 = vld [vmem:[%s10059_s1 + $0x1e8] sm:$0xff] }
   0xd   :  { %285 = vmatpush1.msra.mxu0 %v6093_v15  ;;  %5055 = vmatprep.subr.mxu1 %v10072_v3  ;;  %v6220_v36 = vld [vmem:[%s10059_s1 + $0x3d0] sm:$0xff]  ;;  %v6238_v39 = vld [vmem:[%s10059_s1 + $0x1e0] sm:$0xff]  ;;  %v6245_v40 = vld [vmem:[%s10059_s1 + $0x198] sm:$0xff] }
   0xe   :  { %286 = vmatprep.subr.mxu0 %v6102_v17  ;;  %5047 = vmatmul.mubr.msk.f32.vlgmr.msra.gmra.mxu1 %vm52_vm1, %v33_v9  ;;  %v6232_v38 = vld [vmem:[%s10060_s0 + $0x10] sm:$0x3]  ;;  %v6251_v41 = vld [vmem:[%s10059_s1 + $0x380] sm:$0xff]  ;;  %v6265_v43 = vld [vmem:[%s10059_s1 + $0x148] sm:$0xff] }
   0xf   :  { %287 = vmatpush1.msra.mxu0 %v6108_v18  ;;  %5056 = vmatpush3.msra.mxu1 %v6136_v23  ;;  %v6257_v42 = vld [vmem:[%s10059_s1 + $0x190] sm:$0xff]  ;;  %v6277_v45 = vld [vmem:[%s10059_s1 + $0x140] sm:$0xff]  ;;  %v6284_v46 = vld [vmem:[%s10059_s1 + $0xf8] sm:$0xff] }
  0x10   :  { %288 = vmatprep.subr.mxu0 %v6118_v20  ;;  %5057 = vmatprep.subr.mxu1 %v10072_v3  ;;  %v6271_v44 = vld [vmem:[%s10059_s1 + $0x330] sm:$0xff]  ;;  %v6297_v48 = vld [vmem:[%s10059_s1 + $0x2e0] sm:$0xff]  ;;  %v6303_v49 = vld [vmem:[%s10059_s1 + $0xa8] sm:$0xff] }
  0x11   :  { %289 = vmatpush1.msra.mxu0 %v6124_v21  ;;  %132 = vmatprep.mubr.f32.mxu0 %v10072_v3  ;;  %v6291_v47 = vld [vmem:[%s10059_s1 + $0xf0] sm:$0xff]  ;;  %v6310_v50 = vld [vmem:[%s10059_s1 + $0xa0] sm:$0xff]  ;;  %v6322_v52 = vld [vmem:[%s10059_s1 + $0x58] sm:$0xff] }
  0x12   :  { %290 = vmatprep.subr.mxu0 %v6131_v22  ;;  %5058 = vmatpush3.msra.mxu1 %v6162_v27  ;;  %v6316_v51 = vld [vmem:[%s10059_s1 + $0x290] sm:$0xff]  ;;  %10241 = vst [vmem:[#allocation3_spill] sm:$0xff] %v6322_v52  ;;  %v6335_v54 = vld [vmem:[%s10059_s1 + $0x240] sm:$0xff]  ;;  %v6341_v55 = vld [vmem:[%s10059_s1 + $0x8] sm:$0xff] }
  0x13   :  { %291 = vmatpush1.msra.mxu0 %v6142_v24  ;;  %5059 = vmatprep.subr.mxu1 %v10072_v3  ;;  %v6329_v53 = vld [vmem:[%s10059_s1 + $0x50] sm:$0xff]  ;;  %10243 = vst [vmem:[#allocation5_spill] sm:$0xff] %v6341_v55  ;;  %v6348_v56 = vld [vmem:[%s10059_s1] sm:$0xff]  ;;  %v6429_v1 = vld [vmem:[%s10059_s1 + $0x4c8] sm:$0xff] }
  0x14   :  { %292 = vmatprep.subr.mxu0 %v6149_v25  ;;  %4584 = vmatmul.mubr.msk.f32.gmra.mxu0 %vm52_vm1, %v6174_v29  ;;  %10242 = vst [vmem:[#allocation4_spill] sm:$0xff] %v6329_v53  ;;  %10244 = vst [vmem:[#allocation6_spill] sm:$0xff] %v6348_v56  ;;  %v6354_v57 = vld [vmem:[%s10059_s1 + $0x1f0] sm:$0xff]  ;;  %v6363_v58 = vld [vmem:[%s10059_s1 + $0x1a0] sm:$0xff] }
  0x15   :  { %293 = vmatpush1.msra.mxu0 %v6156_v26  ;;  %5060 = vmatpush3.msra.mxu1 %v6193_v32  ;;  %v6372_v59 = vld [vmem:[%s10059_s1 + $0x150] sm:$0xff]  ;;  %v6383_v60 = vld [vmem:[%s10059_s1 + $0x100] sm:$0xff]  ;;  %10249 = vst [vmem:[#allocation11_spill] sm:$0xff] %v6429_v1  ;;  %v6434_v2 = vld [vmem:[%s10059_s1 + $0x4d8] sm:$0xff] }
  0x16   :  { %294 = vmatprep.subr.mxu0 %v6168_v28  ;;  %5061 = vmatprep.subr.mxu1 %v10072_v3  ;;  %v6392_v61 = vld [vmem:[%s10059_s1 + $0xb0] sm:$0xff]  ;;  %v6402_v62 = vld [vmem:[%s10059_s1 + $0x60] sm:$0xff]  ;;  %10250 = vst [vmem:[#allocation12_spill] sm:$0xff] %v6434_v2  ;;  %v6448_v5 = vld [vmem:[%s10059_s1 + $0x478] sm:$0xff] }
  0x17   :  { %295 = vmatpush1.msra.mxu0 %v6180_v30  ;;  %138 = vmatprep.mubr.f32.mxu0 %v10072_v3  ;;  %10245 = vst [vmem:[#allocation7_spill] sm:$0xff] %v6392_v61  ;;  %10246 = vst [vmem:[#allocation8_spill] sm:$0xff] %v6402_v62  ;;  %v6411_v63 = vld [vmem:[%s10059_s1 + $0x10] sm:$0xff]  ;;  %v6441_v4 = vld [vmem:[%s10059_s1 + $0x480] sm:$0xff] }
  0x18   :  { %296 = vmatprep.subr.mxu0 %v6187_v31  ;;  %5062 = vmatpush3.msra.mxu1 %v6220_v36  ;;  %10247 = vst [vmem:[#allocation9_spill] sm:$0xff] %v6411_v63  ;;  %v6423_v0 = vld [vmem:[%s10059_s1 + $0x4d0] sm:$0xff]  ;;  %10251 = vst [vmem:[#allocation13_spill] sm:$0xff] %v6441_v4  ;;  %v6453_v6 = vld [vmem:[%s10059_s1 + $0x488] sm:$0xff] }
  0x19   :  { %297 = vmatpush1.msra.mxu0 %v6199_v33  ;;  %5063 = vmatprep.subr.mxu1 %v10072_v3  ;;  %10248 = vst [vmem:[#allocation10_spill] sm:$0xff] %v6423_v0  ;;  %10252 = vst [vmem:[#allocation14_spill] sm:$0xff] %v6448_v5  ;;  %v6460_v7 = vld [vmem:[%s10059_s1 + $0x430] sm:$0xff]  ;;  %v6467_v8 = vld [vmem:[%s10059_s1 + $0x428] sm:$0xff] }
  0x1a   :  { %298 = vmatprep.subr.mxu0 %v6207_v34  ;;  %4585 = vmatmul.mubr.msk.f32.gmra.mxu0 %vm52_vm1, %v6232_v38  ;;  %10253 = vst [vmem:[#allocation15_spill] sm:$0xff] %v6453_v6  ;;  %10254 = vst [vmem:[#allocation16_spill] sm:$0xff] %v6460_v7  ;;  %v6472_v9 = vld [vmem:[%s10059_s1 + $0x438] sm:$0xff]  ;;  %v6479_v11 = vld [vmem:[%s10059_s1 + $0x3e0] sm:$0xff] }
  0x1b   :  { %299 = vmatpush1.msra.mxu0 %v6214_v35  ;;  %5064 = vmatpush3.msra.mxu1 %v6251_v41  ;;  %10255 = vst [vmem:[#allocation17_spill] sm:$0xff] %v6467_v8  ;;  %10256 = vst [vmem:[#allocation18_spill] sm:$0xff] %v6472_v9  ;;  %v6486_v13 = vld [vmem:[%s10059_s1 + $0x3d8] sm:$0xff]  ;;  %v6491_v16 = vld [vmem:[%s10059_s1 + $0x3e8] sm:$0xff] }
  0x1c   :  { %300 = vmatprep.subr.mxu0 %v6226_v37  ;;  %5065 = vmatprep.subr.mxu1 %v10072_v3  ;;  %10257 = vst [vmem:[#allocation19_spill] sm:$0xff] %v6479_v11  ;;  %10258 = vst [vmem:[#allocation20_spill] sm:$0xff] %v6486_v13  ;;  %v6498_v19 = vld [vmem:[%s10059_s1 + $0x390] sm:$0xff] }
  0x1d   :  { %301 = vmatpush1.msra.mxu0 %v6238_v39  ;;  %5066 = vmatpush3.msra.mxu1 %v6271_v44  ;;  %10259 = vst [vmem:[#allocation21_spill] sm:$0xff] %v6491_v16  ;;  %10260 = vst [vmem:[#allocation22_spill] sm:$0xff] %v6498_v19 }
  0x1e   :  { %302 = vmatprep.subr.mxu0 %v6245_v40  ;;  %5067 = vmatprep.subr.mxu1 %v10072_v3 }
  0x1f   :  { %303 = vmatpush1.msra.mxu0 %v6257_v42  ;;  %346 = vmatprep.mubr.f32.mxu0 %v10072_v3 }
  0x20   :  { %304 = vmatprep.subr.mxu0 %v6265_v43  ;;  %5068 = vmatpush3.msra.mxu1 %v6297_v48 }
  0x21   :  { %305 = vmatpush1.msra.mxu0 %v6277_v45  ;;  %5069 = vmatprep.subr.mxu1 %v10072_v3 }
  0x22   :  { %306 = vmatprep.subr.mxu0 %v6284_v46  ;;  %5070 = vmatpush3.msra.mxu1 %v6316_v51 }
  0x23   :  { %307 = vmatpush1.msra.mxu0 %v6291_v47  ;;  %5071 = vmatprep.subr.mxu1 %v10072_v3 }
  0x24   :  { %308 = vmatprep.subr.mxu0 %v6303_v49  ;;  %5072 = vmatpush3.msra.mxu1 %v6335_v54 }
  0x25   :  { %309 = vmatpush1.msra.mxu0 %v6310_v50  ;;  %5073 = vmatprep.subr.mxu1 %v10072_v3 }
  0x26   :  { %310 = vmatprep.subr.mxu0 %v6322_v52  ;;  %5074 = vmatpush3.msra.mxu1 %v6354_v57 }
  0x27   :  { %311 = vmatpush1.msra.mxu0 %v6329_v53  ;;  %5075 = vmatprep.subr.mxu1 %v10072_v3 }
  0x28   :  { %312 = vmatprep.subr.mxu0 %v6341_v55  ;;  %5076 = vmatpush3.msra.mxu1 %v6363_v58 }
  0x29   :  { %313 = vmatpush1.msra.mxu0 %v6348_v56  ;;  %5049 = vmatprep.mubr.msk.f32.mxu1 %vm6004_vm0, %v10072_v3 }
  0x2a   :  { %347 = vmatmul.mubr.f32.vlgmr.msra.gmra.mxu0 %v10072_v3  ;;  %5077 = vmatprep.subr.mxu1 %v10072_v3 }
  0x2b   :  { %5050 = vmatmul.mubr.msk.f32.gmra.mxu1 %vm52_vm1, %v6174_v29  ;;  %560 = vmatprep.mubr.f32.mxu0 %v10072_v3  ;;  %v6505_v29 = vld [vmem:[%s10059_s1 + $0x388] sm:$0xff] }
  0x2c   :  { %5078 = vmatpush3.msra.mxu1 %v6372_v59  ;;  %5052 = vmatprep.mubr.msk.f32.mxu1 %vm6004_vm0, %v10072_v3  ;;  %10261 = vst [vmem:[#allocation23_spill] sm:$0xff] %v6505_v29 }
  0x2d   :  { %5079 = vmatprep.subr.mxu1 %v10072_v3  ;;  %496 = vmatprep.subr.mxu0 %v6423_v0 }
  0x2e   :  { %5080 = vmatpush3.msra.mxu1 %v6383_v60  ;;  %497 = vmatpush1.msra.mxu0 %v6429_v1 }
  0x2f   :  { %5081 = vmatprep.subr.mxu1 %v10072_v3  ;;  %5053 = vmatmul.mubr.msk.f32.gmra.mxu1 %vm52_vm1, %v6232_v38  ;;  %v6510_v38 = vld [vmem:[%s10059_s1 + $0x398] sm:$0xff] }
  0x30   :  { %5082 = vmatpush3.msra.mxu1 %v6392_v61  ;;  %5087 = vmatprep.mubr.msk.f32.mxu1 %vm6004_vm0, %v10072_v3  ;;  %10262 = vst [vmem:[#allocation24_spill] sm:$0xff] %v6510_v38 }
  0x31   :  { %5083 = vmatprep.subr.mxu1 %v10072_v3  ;;  %498 = vmatprep.subr.mxu0 %v6441_v4 }
  0x32   :  { %5084 = vmatpush3.msra.mxu1 %v6402_v62  ;;  %499 = vmatpush1.msra.mxu0 %v6448_v5 }
  0x33   :  { %5085 = vmatprep.subr.mxu1 %v10072_v3  ;;  %500 = vmatprep.subr.mxu0 %v6460_v7 }
  0x34   :  { %5086 = vmatpush3.msra.mxu1 %v6411_v63  ;;  %501 = vmatpush1.msra.mxu0 %v6467_v8 }
  0x35   :  { %5088 = vmatmul.mubr.f32.vlgmr.msra.gmra.mxu1 %v10072_v3  ;;  %5090 = vmatprep.subr.mxu1 %v10072_v3 }
  0x36   :  { %5122 = vmatprep.mubr.msk.f32.mxu1 %vm6004_vm0, %v10072_v3  ;;  %5091 = vmatpush3.msra.mxu1 %v6434_v2  ;;  %v6543_v2 = vld [vmem:[%s10059_s1 + $0x2e8] sm:$0xff] }
  0x37   :  { %5092 = vmatprep.subr.mxu1 %v10072_v3  ;;  %502 = vmatprep.subr.mxu0 %v6479_v11  ;;  %10267 = vst [vmem:[#allocation29_spill] sm:$0xff] %v6543_v2 }
  0x38   :  { %5093 = vmatpush3.msra.mxu1 %v6453_v6  ;;  %503 = vmatpush1.msra.mxu0 %v6486_v13  ;;  %v6529_v6 = vld [vmem:[%s10059_s1 + $0x348] sm:$0xff] }
  0x39   :  { %5094 = vmatprep.subr.mxu1 %v10072_v3  ;;  %504 = vmatprep.subr.mxu0 %v6498_v19  ;;  %10265 = vst [vmem:[#allocation27_spill] sm:$0xff] %v6529_v6  ;;  %v6596_v19 = vld [vmem:[%s10059_s1 + $0x1f8] sm:$0xff] }
  0x3a   :  { %5095 = vmatpush3.msra.mxu1 %v6472_v9  ;;  %505 = vmatpush1.msra.mxu0 %v6505_v29  ;;  %v6524_v9 = vld [vmem:[%s10059_s1 + $0x338] sm:$0xff]  ;;  %10277 = vst [vmem:[#allocation38_spill] sm:$0xff] %v6596_v19 }
  0x3b   :  { %5096 = vmatprep.subr.mxu1 %v10072_v3  ;;  %10264 = vst [vmem:[#allocation26_spill] sm:$0xff] %v6524_v9  ;;  %v6582_v29 = vld [vmem:[%s10059_s1 + $0x258] sm:$0xff] }
  0x3c   :  { %5097 = vmatpush3.msra.mxu1 %v6491_v16  ;;  %v6517_v16 = vld [vmem:[%s10059_s1 + $0x340] sm:$0xff]  ;;  %10275 = vst [vmem:[#allocation36_spill] sm:$0xff] %v6582_v29 }
  0x3d   :  { %5098 = vmatprep.subr.mxu1 %v10072_v3  ;;  %10263 = vst [vmem:[#allocation25_spill] sm:$0xff] %v6517_v16  ;;  %506 = vmatprep.subr.mxu0 %v6517_v16  ;;  %v6577_v16 = vld [vmem:[%s10059_s1 + $0x248] sm:$0xff] }
  0x3e   :  { %5099 = vmatpush3.msra.mxu1 %v6510_v38  ;;  %507 = vmatpush1.msra.mxu0 %v6524_v9  ;;  %v6536_v38 = vld [vmem:[%s10059_s1 + $0x2f0] sm:$0xff]  ;;  %v6548_v9 = vld [vmem:[%s10059_s1 + $0x2f8] sm:$0xff]  ;;  %10274 = vst [vmem:[#allocation35_spill] sm:$0xff] %v6577_v16 }
  0x3f   :  { %5100 = vmatprep.subr.mxu1 %v10072_v3  ;;  %10266 = vst [vmem:[#allocation28_spill] sm:$0xff] %v6536_v38  ;;  %508 = vmatprep.subr.mxu0 %v6536_v38  ;;  %10268 = vst [vmem:[#allocation30_spill] sm:$0xff] %v6548_v9  ;;  %v6565_v38 = vld [vmem:[%s10059_s1 + $0x2a8] sm:$0xff] }
  0x40   :  { %5101 = vmatpush3.msra.mxu1 %v6529_v6  ;;  %509 = vmatpush1.msra.mxu0 %v6543_v2  ;;  %v6555_v6 = vld [vmem:[%s10059_s1 + $0x2a0] sm:$0xff]  ;;  %10271 = vst [vmem:[#allocation33_spill] sm:$0xff] %v6565_v38  ;;  %v10272_v2 = vmov 0.0  }
  0x41   :  { %5102 = vmatprep.subr.mxu1 %v10072_v3  ;;  %10269 = vst [vmem:[#allocation31_spill] sm:$0xff] %v6555_v6  ;;  %v6560_v3 = vld [vmem:[%s10059_s1 + $0x298] sm:$0xff]  ;;  %510 = vmatprep.subr.mxu0 %v6555_v6  ;;  %v6589_v6 = vld [vmem:[%s10059_s1 + $0x200] sm:$0xff] }
  0x42   :  { %5103 = vmatpush3.msra.mxu1 %v6548_v9  ;;  %10270 = vst [vmem:[#allocation32_spill] sm:$0xff] %v6560_v3  ;;  %v6572_v9 = vld [vmem:[%s10059_s1 + $0x250] sm:$0xff]  ;;  %511 = vmatpush1.msra.mxu0 %v6560_v3  ;;  %10276 = vst [vmem:[#allocation37_spill] sm:$0xff] %v6589_v6  ;;  %v6601_v3 = vld [vmem:[%s10059_s1 + $0x208] sm:$0xff] }
  0x43   :  { %5104 = vmatprep.subr.mxu1 %v10272_v2  ;;  %10273 = vst [vmem:[#allocation34_spill] sm:$0xff] %v6572_v9  ;;  %512 = vmatprep.subr.mxu0 %v6572_v9  ;;  %10278 = vst [vmem:[#allocation39_spill] sm:$0xff] %v6601_v3  ;;  %v6615_v9 = vld [vmem:[%s10059_s1 + $0x1a8] sm:$0xff] }
  0x44   :  { %5105 = vmatpush3.msra.mxu1 %v6565_v38  ;;  %513 = vmatpush1.msra.mxu0 %v6577_v16  ;;  %v6608_v38 = vld [vmem:[%s10059_s1 + $0x1b0] sm:$0xff]  ;;  %10280 = vst [vmem:[#allocation41_spill] sm:$0xff] %v6615_v9  ;;  %v6620_v16 = vld [vmem:[%s10059_s1 + $0x1b8] sm:$0xff] }
  0x45   :  { %5106 = vmatprep.subr.mxu1 %v10272_v2  ;;  %10279 = vst [vmem:[#allocation40_spill] sm:$0xff] %v6608_v38  ;;  %514 = vmatprep.subr.mxu0 %v6589_v6  ;;  %10281 = vst [vmem:[#allocation42_spill] sm:$0xff] %v6620_v16  ;;  %v6634_v6 = vld [vmem:[%s10059_s1 + $0x158] sm:$0xff] }
  0x46   :  { %5107 = vmatpush3.msra.mxu1 %v6582_v29  ;;  %515 = vmatpush1.msra.mxu0 %v6596_v19  ;;  %v6627_v29 = vld [vmem:[%s10059_s1 + $0x160] sm:$0xff]  ;;  %10283 = vst [vmem:[#allocation44_spill] sm:$0xff] %v6634_v6  ;;  %v6639_v19 = vld [vmem:[%s10059_s1 + $0x168] sm:$0xff] }
  0x47   :  { %5108 = vmatprep.subr.mxu1 %v10272_v2  ;;  %10282 = vst [vmem:[#allocation43_spill] sm:$0xff] %v6627_v29  ;;  %516 = vmatprep.subr.mxu0 %v6608_v38  ;;  %10284 = vst [vmem:[#allocation45_spill] sm:$0xff] %v6639_v19  ;;  %v6653_v38 = vld [vmem:[%s10059_s1 + $0x108] sm:$0xff] }
  0x48   :  { %5109 = vmatpush3.msra.mxu1 %v6601_v3  ;;  %517 = vmatpush1.msra.mxu0 %v6615_v9  ;;  %v6646_v3 = vld [vmem:[%s10059_s1 + $0x110] sm:$0xff]  ;;  %10286 = vst [vmem:[#allocation47_spill] sm:$0xff] %v6653_v38  ;;  %v6658_v9 = vld [vmem:[%s10059_s1 + $0x118] sm:$0xff] }
  0x49   :  { %5110 = vmatprep.subr.mxu1 %v10272_v2  ;;  %10285 = vst [vmem:[#allocation46_spill] sm:$0xff] %v6646_v3  ;;  %518 = vmatprep.subr.mxu0 %v6627_v29  ;;  %10287 = vst [vmem:[#allocation48_spill] sm:$0xff] %v6658_v9  ;;  %v6672_v29 = vld [vmem:[%s10059_s1 + $0xb8] sm:$0xff] }
  0x4a   :  { %5111 = vmatpush3.msra.mxu1 %v6620_v16  ;;  %519 = vmatpush1.msra.mxu0 %v6634_v6  ;;  %v6665_v16 = vld [vmem:[%s10059_s1 + $0xc0] sm:$0xff]  ;;  %10289 = vst [vmem:[#allocation50_spill] sm:$0xff] %v6672_v29  ;;  %v6677_v6 = vld [vmem:[%s10059_s1 + $0xc8] sm:$0xff] }
  0x4b   :  { %5112 = vmatprep.subr.mxu1 %v10272_v2  ;;  %10288 = vst [vmem:[#allocation49_spill] sm:$0xff] %v6665_v16  ;;  %520 = vmatprep.subr.mxu0 %v6646_v3  ;;  %10290 = vst [vmem:[#allocation51_spill] sm:$0xff] %v6677_v6  ;;  %v6691_v3 = vld [vmem:[%s10059_s1 + $0x68] sm:$0xff] }
  0x4c   :  { %5113 = vmatpush3.msra.mxu1 %v6639_v19  ;;  %521 = vmatpush1.msra.mxu0 %v6653_v38  ;;  %v6684_v19 = vld [vmem:[%s10059_s1 + $0x70] sm:$0xff]  ;;  %10292 = vst [vmem:[#allocation53_spill] sm:$0xff] %v6691_v3  ;;  %v6696_v38 = vld [vmem:[%s10059_s1 + $0x78] sm:$0xff] }
  0x4d   :  { %5114 = vmatprep.subr.mxu1 %v10272_v2  ;;  %10291 = vst [vmem:[#allocation52_spill] sm:$0xff] %v6684_v19  ;;  %522 = vmatprep.subr.mxu0 %v6665_v16  ;;  %10293 = vst [vmem:[#allocation54_spill] sm:$0xff] %v6696_v38  ;;  %v6710_v16 = vld [vmem:[%s10059_s1 + $0x18] sm:$0xff] }
  0x4e   :  { %5115 = vmatpush3.msra.mxu1 %v6658_v9  ;;  %523 = vmatpush1.msra.mxu0 %v6672_v29  ;;  %v6703_v9 = vld [vmem:[%s10059_s1 + $0x20] sm:$0xff]  ;;  %10295 = vst [vmem:[#allocation56_spill] sm:$0xff] %v6710_v16  ;;  %v6715_v29 = vld [vmem:[%s10059_s1 + $0x28] sm:$0xff] }
  0x4f   :  { %5116 = vmatprep.subr.mxu1 %v10272_v2  ;;  %10294 = vst [vmem:[#allocation55_spill] sm:$0xff] %v6703_v9  ;;  %524 = vmatprep.subr.mxu0 %v6684_v19  ;;  %10296 = vst [vmem:[#allocation57_spill] sm:$0xff] %v6715_v29 }
  0x50   :  { %5117 = vmatpush3.msra.mxu1 %v6677_v6  ;;  %525 = vmatpush1.msra.mxu0 %v6691_v3  ;;  %v37_v6 = vlaneseq }
  0x51   :  { %5118 = vmatprep.subr.mxu1 %v10272_v2  ;;  %526 = vmatprep.subr.mxu0 %v6703_v9 }
  0x52   :  { %5119 = vmatpush3.msra.mxu1 %v6696_v38  ;;  %527 = vmatpush1.msra.mxu0 %v6710_v16  ;;  %v38_v19 = vshrl.u32 %v37_v6, 7  ;;  %v32_v38 = vld [vmem:[%s10061_s2] sm:$0x7] }
  0x53   :  { %5120 = vmatprep.subr.mxu1 %v10272_v2  ;;  %649 = vmatprep.subr.mxu0 %v6069_v10 }
  0x54   :  { %5121 = vmatpush3.msra.mxu1 %v6715_v29  ;;  %v39_v11 = vsub.s32 0, %v38_v19  ;;  %v43_v9 = vsub.s32 1, %v38_v19  ;;  %v47_v62 = vsub.s32 2, %v38_v19 }
  0x55   :  { %5125 = vmatprep.subr.mxu1 %v10272_v2 }
  0x56   :  { %v40_v5 = vrot.slane %v32_v38, %v39_v11  ;;  %v44_v4 = vrot.slane %v32_v38, %v43_v9 }
  0xca   :  { %v128_v13 = vpop.f32.mrf.mxu0 }
  0xcb   :  { %v6736_v53 = vadd.f32 %v128_v13, %v40_v5 }
  0xcc   :  { %v130_v7 = vpop.f32.mrf.mxu0 }
  0xcd   :  { %10301 = vst [vmem:[#allocation62_spill] sm:$0xff] %v6736_v53 }
  0xce   :  { %v211_v8 = vpop.f32.mrf.mxu1 }
  0xd0   :  { %v5048_v3 = vpop.f32.mrf.mxu1 }
  0xd1   :  { %v48_v3 = vrot.slane %v32_v38, %v47_v62 }
  0xd4   :  { %v134_v16 = vpop.f32.mrf.mxu0 }
  0xd5   :  { %v6728_v29 = vadd.f32 %v134_v16, %v40_v5 }
  0xd6   :  { %v136_v10 = vpop.f32.mrf.mxu0 }
  0xd7   :  { %10297 = vst [vmem:[#allocation58_spill] sm:$0xff] %v6728_v29  ;;  %v6730_v1 = vadd.f32 %v136_v10, %v44_v4 }
  0xd9   :  { %10298 = vst [vmem:[#allocation59_spill] sm:$0xff] %v6730_v1  ;;  %v6741_v1 = vadd.f32 %v130_v7, %v44_v4 }
  0xda   :  { %v140_v0 = vpop.f32.mrf.mxu0 }
  0xdb   :  { %v6732_v63 = vadd.f32 %v140_v0, %v40_v5  ;;  %10303 = vst [vmem:[#allocation64_spill] sm:$0xff] %v6741_v1 }
  0xdc   :  { %v142_v56 = vpop.f32.mrf.mxu0 }
  0xdd   :  { %10299 = vst [vmem:[#allocation60_spill] sm:$0xff] %v6732_v63  ;;  %v6734_v55 = vadd.f32 %v142_v56, %v44_v4 }
  0xdf   :  { %10300 = vst [vmem:[#allocation61_spill] sm:$0xff] %v6734_v55 }
  0xea   :  { %v348_v52 = vpop.f32.mrf.mxu0 }
  0xeb   :  { %v423_v11 = vadd.f32 %v348_v52, %v6736_v53  ;;  %v216_v61 = vpop.f32.mrf.mxu1  ;;  %v6749_v52 = vld [vmem:[%s10061_s2 + $0x3] ss:$0 sm:$0xff] }
  0xec   :  { %v6739_v16 = vadd.f32 %v216_v61, %v48_v3  ;;  %v350_v29 = vpop.f32.mrf.mxu0 }
  0xed   :  { %v425_v9 = vmul.f32 0.5, %v423_v11  ;;  %v5051_v10 = vpop.f32.mrf.mxu1  ;;  %v424_v56 = vadd.f32 %v350_v29, %v6741_v1  ;;  %v6752_v11 = vadd.f32 %v211_v8, %v48_v3  ;;  %v6894_v8 = vld [vmem:[%s10059_s1 + $0x3b8] sm:$0xff] }
  0xee   :  { %10302 = vst [vmem:[#allocation63_spill] sm:$0xff] %v6739_v16 }
  0xef   :  { %5949 = vtanh.f32 %v425_v9  ;;  %v221_v0 = vpop.f32.mrf.mxu1  ;;  %v426_v13 = vmul.f32 0.5, %v424_v56 }
  0xf0   :  { %v6744_v55 = vadd.f32 %v221_v0, %v48_v3  ;;  %v6901_v3 = vld [vmem:[%s10059_s1 + $0x368] sm:$0xff] }
  0xf1   :  { %v5054_v5 = vpop.f32.mrf.mxu1  ;;  %5951 = vtanh.f32 %v426_v13 }
  0xf2   :  { %10304 = vst [vmem:[#allocation65_spill] sm:$0xff] %v6744_v55  ;;  %v226_v5 = vand.u32 127, %v37_v6  ;;  %v6887_v6 = vld [vmem:[%s10059_s1 + $0x408] sm:$0xff] }
  0xf4   :  { %vm227_vm2 = vcmp.lt.s32.totalorder %v226_v5, 64  ;;  %v6970_v5 = vld [vmem:[%s10059_s1 + $0x48] sm:$0xff] }
  0xf5   :  { %v419_v19 = vpop.f32.mrf.mxu1 }
  0xf6   :  { %v439_v4 = vadd.f32 %v6749_v52, %v419_v19 }
  0xf7   :  { %v5089_v62 = vpop.f32.mrf.mxu1 }
  0xfc   :  { %v5950_v61 = vpop.eup %5949 }
  0xfd   :  { %v429_v38 = vmul.f32 0.5, %v5950_v61  ;;  %v4589_v61 = vsel %vm227_vm2, 1.0, %v10272_v2 }
  0xfe   :  { %v5952_v10 = vpop.eup %5951 }
  0xff   :  { %v431_v7 = vadd.f32 0.5, %v429_v38  ;;  %v430_v0 = vmul.f32 0.5, %v5952_v10  ;;  %v6915_v38 = vld [vmem:[%s10059_s1 + $0x2c8] sm:$0xff]  ;;  %v6950_v10 = vld [vmem:[%s10059_s1 + $0x138] sm:$0xff] }
 0x101   :  { %v440_v29 = vmul.f32 %v439_v4, %v431_v7  ;;  %v432_v56 = vadd.f32 0.5, %v430_v0  ;;  %v6922_v4 = vld [vmem:[%s10059_s1 + $0x278] sm:$0xff]  ;;  %v6929_v7 = vld [vmem:[%s10059_s1 + $0x228] sm:$0xff] }
 0x102   :  { %v6957_v0 = vld [vmem:[%s10059_s1 + $0xe8] sm:$0xff] }
 0x103   :  { %v441_v9 = vadd.f32 %v440_v29, %v6752_v11  ;;  %v443_v13 = vsub.f32 1.0, %v432_v56  ;;  %v445_v55 = vmul.f32 0.0, %v432_v56  ;;  %v6936_v29 = vld [vmem:[%s10059_s1 + $0x1d8] sm:$0xff] }
 0x104   :  { %v6964_v56 = vld [vmem:[%s10059_s1 + $0x98] sm:$0xff] }
 0x105   :  { %5953 = vtanh.f32 %v441_v9  ;;  %v6943_v9 = vld [vmem:[%s10059_s1 + $0x188] sm:$0xff] }
 0x112   :  { %v5954_v62 = vpop.eup %5953 }
 0x113   :  { %v444_v63 = vmul.f32 %v5954_v62, %v443_v13  ;;  %v6975_v13 = vld [vmem:[%s10059_s1 + $0x4b8] sm:$0xff] }
 0x115   :  { %v446_v16 = vadd.f32 %v445_v55, %v444_v63  ;;  %v10341_v55 = vld [vmem:[#allocation53_spill] sm:$0xff]  ;;  %v6880_v63 = vld [vmem:[%s10059_s1 + $0x458] sm:$0xff] }
 0x117   :  { %v6756_v19 = vmul.f32 %v4589_v61, %v446_v16  ;;  %v6908_v16 = vld [vmem:[%s10059_s1 + $0x318] sm:$0xff] }
 0x119   :  { %561 = vmatmul.mubr.f32.vlgmr.msra.gmra.mxu0 %v6756_v19  ;;  %5123 = vmatmul.mubr.f32.vlgmr.msra.gmra.mxu1 %v6756_v19 }
 0x11a   :  { %650 = vmatpush1.msra.mxu0 %v6077_v12  ;;  %5126 = vmatpush3.msra.mxu1 %v6136_v23  ;;  %v10305_v12 = vld [vmem:[#allocation7_spill] sm:$0xff] }
 0x11b   :  { %651 = vmatprep.subr.mxu0 %v6085_v14  ;;  %5127 = vmatprep.subr.mxu1 %v10272_v2  ;;  %v10306_v14 = vld [vmem:[#allocation3_spill] sm:$0xff] }
 0x11c   :  { %652 = vmatpush1.msra.mxu0 %v6093_v15  ;;  %5128 = vmatpush3.msra.mxu1 %v6162_v27  ;;  %v10307_v15 = vld [vmem:[#allocation4_spill] sm:$0xff]  ;;  %v10313_v23 = vld [vmem:[#allocation11_spill] sm:$0xff]  ;;  %v10317_v27 = vld [vmem:[#allocation17_spill] sm:$0xff] }
 0x11d   :  { %653 = vmatprep.subr.mxu0 %v6102_v17  ;;  %5129 = vmatprep.subr.mxu1 %v10272_v2  ;;  %v10308_v17 = vld [vmem:[#allocation8_spill] sm:$0xff] }
 0x11e   :  { %654 = vmatpush1.msra.mxu0 %v6108_v18  ;;  %5130 = vmatpush3.msra.mxu1 %v6193_v32  ;;  %v10309_v18 = vld [vmem:[#allocation5_spill] sm:$0xff]  ;;  %v10321_v32 = vld [vmem:[#allocation23_spill] sm:$0xff] }
 0x11f   :  { %655 = vmatprep.subr.mxu0 %v6118_v20  ;;  %5131 = vmatprep.subr.mxu1 %v10272_v2  ;;  %v10310_v20 = vld [vmem:[#allocation6_spill] sm:$0xff] }
 0x120   :  { %656 = vmatpush1.msra.mxu0 %v6124_v21  ;;  %5132 = vmatpush3.msra.mxu1 %v6220_v36  ;;  %v10311_v21 = vld [vmem:[#allocation9_spill] sm:$0xff] }
 0x121   :  { %657 = vmatprep.subr.mxu0 %v6131_v22  ;;  %5133 = vmatprep.subr.mxu1 %v10272_v2  ;;  %v10312_v22 = vld [vmem:[#allocation10_spill] sm:$0xff]  ;;  %v10325_v36 = vld [vmem:[#allocation29_spill] sm:$0xff] }
 0x122   :  { %658 = vmatpush1.msra.mxu0 %v6142_v24  ;;  %5134 = vmatpush3.msra.mxu1 %v6251_v41  ;;  %v10314_v24 = vld [vmem:[#allocation13_spill] sm:$0xff]  ;;  %v10329_v41 = vld [vmem:[#allocation35_spill] sm:$0xff] }
 0x123   :  { %659 = vmatprep.subr.mxu0 %v6149_v25  ;;  %5135 = vmatprep.subr.mxu1 %v10272_v2  ;;  %v10315_v25 = vld [vmem:[#allocation14_spill] sm:$0xff] }
 0x124   :  { %660 = vmatpush1.msra.mxu0 %v6156_v26  ;;  %5136 = vmatpush3.msra.mxu1 %v6271_v44  ;;  %v10316_v26 = vld [vmem:[#allocation16_spill] sm:$0xff] }
 0x125   :  { %661 = vmatprep.subr.mxu0 %v6168_v28  ;;  %5137 = vmatprep.subr.mxu1 %v10272_v2  ;;  %v10318_v28 = vld [vmem:[#allocation19_spill] sm:$0xff]  ;;  %v10332_v44 = vld [vmem:[#allocation40_spill] sm:$0xff] }
 0x126   :  { %662 = vmatpush1.msra.mxu0 %v6180_v30  ;;  %5138 = vmatpush3.msra.mxu1 %v6297_v48  ;;  %v10319_v30 = vld [vmem:[#allocation20_spill] sm:$0xff]  ;;  %v10336_v48 = vld [vmem:[#allocation46_spill] sm:$0xff] }
 0x127   :  { %663 = vmatprep.subr.mxu0 %v6187_v31  ;;  %5139 = vmatprep.subr.mxu1 %v10272_v2  ;;  %v10320_v31 = vld [vmem:[#allocation22_spill] sm:$0xff] }
 0x128   :  { %664 = vmatpush1.msra.mxu0 %v6199_v33  ;;  %5140 = vmatpush3.msra.mxu1 %v6316_v51  ;;  %v10322_v33 = vld [vmem:[#allocation25_spill] sm:$0xff]  ;;  %v10339_v51 = vld [vmem:[#allocation50_spill] sm:$0xff] }
 0x129   :  { %665 = vmatprep.subr.mxu0 %v6207_v34  ;;  %5141 = vmatprep.subr.mxu1 %v10272_v2  ;;  %v10323_v34 = vld [vmem:[#allocation26_spill] sm:$0xff] }
 0x12a   :  { %666 = vmatpush1.msra.mxu0 %v6214_v35  ;;  %5142 = vmatpush3.msra.mxu1 %v6335_v54  ;;  %v10324_v35 = vld [vmem:[#allocation28_spill] sm:$0xff] }
 0x12b   :  { %667 = vmatprep.subr.mxu0 %v6226_v37  ;;  %5143 = vmatprep.subr.mxu1 %v10272_v2  ;;  %v10326_v37 = vld [vmem:[#allocation31_spill] sm:$0xff]  ;;  %v10340_v54 = vld [vmem:[#allocation52_spill] sm:$0xff] }
 0x12c   :  { %668 = vmatpush1.msra.mxu0 %v6238_v39  ;;  %5144 = vmatpush3.msra.mxu1 %v6354_v57  ;;  %v10327_v39 = vld [vmem:[#allocation32_spill] sm:$0xff]  ;;  %v10342_v57 = vld [vmem:[#allocation55_spill] sm:$0xff] }
 0x12d   :  { %669 = vmatprep.subr.mxu0 %v6245_v40  ;;  %5145 = vmatprep.subr.mxu1 %v10272_v2  ;;  %v10328_v40 = vld [vmem:[#allocation34_spill] sm:$0xff] }
 0x12e   :  { %670 = vmatpush1.msra.mxu0 %v6257_v42  ;;  %5146 = vmatpush3.msra.mxu1 %v6363_v58  ;;  %v10330_v42 = vld [vmem:[#allocation37_spill] sm:$0xff]  ;;  %v10343_v58 = vld [vmem:[#allocation56_spill] sm:$0xff] }
 0x12f   :  { %671 = vmatprep.subr.mxu0 %v6265_v43  ;;  %5147 = vmatprep.subr.mxu1 %v10272_v2  ;;  %v10331_v43 = vld [vmem:[#allocation38_spill] sm:$0xff] }
 0x130   :  { %672 = vmatpush1.msra.mxu0 %v6277_v45  ;;  %5148 = vmatpush3.msra.mxu1 %v6372_v59  ;;  %v10333_v45 = vld [vmem:[#allocation41_spill] sm:$0xff]  ;;  %v6866_v59 = vld [vmem:[%s10059_s1 + $0x4f8] sm:$0xff] }
 0x131   :  { %673 = vmatprep.subr.mxu0 %v6284_v46  ;;  %5149 = vmatprep.subr.mxu1 %v10272_v2  ;;  %v10334_v46 = vld [vmem:[#allocation43_spill] sm:$0xff] }
 0x132   :  { %674 = vmatpush1.msra.mxu0 %v6291_v47  ;;  %5150 = vmatpush3.msra.mxu1 %v6383_v60  ;;  %v10335_v47 = vld [vmem:[#allocation44_spill] sm:$0xff]  ;;  %v6873_v60 = vld [vmem:[%s10059_s1 + $0x4a8] sm:$0xff] }
 0x133   :  { %675 = vmatprep.subr.mxu0 %v6303_v49  ;;  %5151 = vmatprep.subr.mxu1 %v10272_v2  ;;  %v10337_v49 = vld [vmem:[#allocation47_spill] sm:$0xff] }
 0x134   :  { %676 = vmatpush1.msra.mxu0 %v6310_v50  ;;  %5152 = vmatpush3.msra.mxu1 %v10305_v12  ;;  %v10338_v50 = vld [vmem:[#allocation49_spill] sm:$0xff] }
 0x135   :  { %677 = vmatprep.subr.mxu0 %v10306_v14  ;;  %5153 = vmatprep.subr.mxu1 %v10272_v2 }
 0x136   :  { %678 = vmatpush1.msra.mxu0 %v10307_v15  ;;  %5154 = vmatpush3.msra.mxu1 %v10308_v17 }
 0x137   :  { %679 = vmatprep.subr.mxu0 %v10309_v18  ;;  %5155 = vmatprep.subr.mxu1 %v10272_v2 }
 0x138   :  { %680 = vmatpush1.msra.mxu0 %v10310_v20  ;;  %713 = vmatprep.mubr.f32.mxu0 %v10272_v2 }
 0x139   :  { %5156 = vmatpush3.msra.mxu1 %v10311_v21  ;;  %5157 = vmatprep.mubr.msk.f32.mxu1 %vm6004_vm0, %v10272_v2 }
 0x13a   :  { %714 = vmatmul.mubr.f32.vlgmr.msra.gmra.mxu0 %v6756_v19  ;;  %5158 = vmatmul.mubr.f32.vlgmr.msra.gmra.mxu1 %v6756_v19 }
 0x13b   :  { %5160 = vmatprep.subr.mxu0 %v10272_v2  ;;  %959 = vmatprep.subr.mxu1 %v10312_v22 }
 0x13c   :  { %960 = vmatpush1.msra.mxu1 %v10313_v23  ;;  %5192 = vmatprep.mubr.msk.f32.mxu0 %vm6004_vm0, %v10272_v2 }
 0x13d   :  { %961 = vmatprep.subr.mxu1 %v10314_v24  ;;  %1023 = vmatprep.mubr.f32.mxu1 %v10272_v2 }
 0x13e   :  { %962 = vmatpush1.msra.mxu1 %v10315_v25  ;;  %5161 = vmatpush3.msra.mxu0 %v6866_v59 }
 0x13f   :  { %963 = vmatprep.subr.mxu1 %v10316_v26  ;;  %5162 = vmatprep.subr.mxu0 %v10272_v2 }
 0x140   :  { %964 = vmatpush1.msra.mxu1 %v10317_v27  ;;  %5163 = vmatpush3.msra.mxu0 %v6873_v60 }
 0x141   :  { %965 = vmatprep.subr.mxu1 %v10318_v28  ;;  %5164 = vmatprep.subr.mxu0 %v10272_v2 }
 0x142   :  { %966 = vmatpush1.msra.mxu1 %v10319_v30  ;;  %5165 = vmatpush3.msra.mxu0 %v6880_v63 }
 0x143   :  { %967 = vmatprep.subr.mxu1 %v10320_v31  ;;  %5166 = vmatprep.subr.mxu0 %v10272_v2 }
 0x144   :  { %968 = vmatpush1.msra.mxu1 %v10321_v32  ;;  %5167 = vmatpush3.msra.mxu0 %v6887_v6 }
 0x145   :  { %969 = vmatprep.subr.mxu1 %v10322_v33  ;;  %5168 = vmatprep.subr.mxu0 %v10272_v2 }
 0x146   :  { %970 = vmatpush1.msra.mxu1 %v10323_v34  ;;  %5169 = vmatpush3.msra.mxu0 %v6894_v8 }
 0x147   :  { %971 = vmatprep.subr.mxu1 %v10324_v35  ;;  %5170 = vmatprep.subr.mxu0 %v10272_v2 }
 0x148   :  { %972 = vmatpush1.msra.mxu1 %v10325_v36  ;;  %5171 = vmatpush3.msra.mxu0 %v6901_v3 }
 0x149   :  { %973 = vmatprep.subr.mxu1 %v10326_v37  ;;  %5172 = vmatprep.subr.mxu0 %v10272_v2 }
 0x14a   :  { %974 = vmatpush1.msra.mxu1 %v10327_v39  ;;  %5173 = vmatpush3.msra.mxu0 %v6908_v16 }
 0x14b   :  { %975 = vmatprep.subr.mxu1 %v10328_v40  ;;  %5174 = vmatprep.subr.mxu0 %v10272_v2 }
 0x14c   :  { %976 = vmatpush1.msra.mxu1 %v10329_v41  ;;  %5175 = vmatpush3.msra.mxu0 %v6915_v38 }
 0x14d   :  { %977 = vmatprep.subr.mxu1 %v10330_v42  ;;  %5176 = vmatprep.subr.mxu0 %v10272_v2 }
 0x14e   :  { %978 = vmatpush1.msra.mxu1 %v10331_v43  ;;  %5177 = vmatpush3.msra.mxu0 %v6922_v4 }
 0x14f   :  { %979 = vmatprep.subr.mxu1 %v10332_v44  ;;  %5178 = vmatprep.subr.mxu0 %v10272_v2 }
 0x150   :  { %980 = vmatpush1.msra.mxu1 %v10333_v45  ;;  %5179 = vmatpush3.msra.mxu0 %v6929_v7 }
 0x151   :  { %981 = vmatprep.subr.mxu1 %v10334_v46  ;;  %5180 = vmatprep.subr.mxu0 %v10272_v2  ;;  %v816_v46 = vrot.slane %v6756_v19, 6  ;;  %v7006_v19 = vld [vmem:[%s10059_s1 + $0x460] sm:$0xff] }
 0x152   :  { %982 = vmatpush1.msra.mxu1 %v10335_v47  ;;  %5181 = vmatpush3.msra.mxu0 %v6936_v29 }
 0x153   :  { %983 = vmatprep.subr.mxu1 %v10336_v48  ;;  %5182 = vmatprep.subr.mxu0 %v10272_v2 }
 0x154   :  { %984 = vmatpush1.msra.mxu1 %v10337_v49  ;;  %5183 = vmatpush3.msra.mxu0 %v6943_v9 }
 0x155   :  { %985 = vmatprep.subr.mxu1 %v10338_v50  ;;  %5184 = vmatprep.subr.mxu0 %v10272_v2 }
 0x156   :  { %986 = vmatpush1.msra.mxu1 %v10339_v51  ;;  %5185 = vmatpush3.msra.mxu0 %v6950_v10  ;;  %v6994_v51 = vld [vmem:[%s10059_s1 + $0x4b0] sm:$0xff] }
 0x157   :  { %987 = vmatprep.subr.mxu1 %v10340_v54  ;;  %5186 = vmatprep.subr.mxu0 %v10272_v2  ;;  %v6999_v54 = vld [vmem:[%s10059_s1 + $0x468] sm:$0xff] }
 0x158   :  { %988 = vmatpush1.msra.mxu1 %v10341_v55  ;;  %5187 = vmatpush3.msra.mxu0 %v6957_v0  ;;  %v10344_v55 = vld [vmem:[#allocation12_spill] sm:$0xff] }
 0x159   :  { %989 = vmatprep.subr.mxu1 %v10342_v57  ;;  %5188 = vmatprep.subr.mxu0 %v10272_v2  ;;  %v7013_v57 = vld [vmem:[%s10059_s1 + $0x418] sm:$0xff] }
 0x15a   :  { %990 = vmatpush1.msra.mxu1 %v10343_v58  ;;  %5189 = vmatpush3.msra.mxu0 %v6964_v56  ;;  %v7020_v58 = vld [vmem:[%s10059_s1 + $0x410] sm:$0xff] }
 0x15b   :  { %5190 = vmatprep.subr.mxu0 %v10272_v2  ;;  %1161 = vmatprep.subr.mxu1 %v6975_v13 }
 0x15c   :  { %5191 = vmatpush3.msra.mxu0 %v6970_v5 }
 0x15d   :  { %5195 = vmatprep.subr.mxu0 %v10272_v2 }
 0x1d9   :  { %v633_v62 = vpop.f32.mrf.mxu1  ;;  %v562_v12 = vpop.f32.mrf.mxu0 }
 0x1da   :  { %v640_v14 = vrot.slane %v562_v12, 6  ;;  %v642_v34 = vrot.slane %v633_v62, 6  ;;  %v10345_v62 = vld [vmem:[#allocation15_spill] sm:$0xff]  ;;  %v7034_v12 = vld [vmem:[%s10059_s1 + $0x3c0] sm:$0xff] }
 0x1db   :  { %v5124_v61 = vpop.f32.mrf.mxu1  ;;  %v564_v15 = vpop.f32.mrf.mxu0 }
 0x1dc   :  { %v646_v20 = vadd.f32 %v640_v14, %v6736_v53  ;;  %v641_v24 = vrot.slane %v564_v15, 6  ;;  %v648_v39 = vadd.f32 %v642_v34, %v6752_v11  ;;  %v7027_v61 = vld [vmem:[%s10059_s1 + $0x3c8] sm:$0xff]  ;;  %v7041_v15 = vld [vmem:[%s10059_s1 + $0x378] sm:$0xff]  ;;  %v7118_v34 = vld [vmem:[%s10059_s1 + $0x1e0] sm:$0xff] }
 0x1dd   :  { %v10346_v14 = vld [vmem:[#allocation18_spill] sm:$0xff] }
 0x1de   :  { %v647_v28 = vadd.f32 %v641_v24, %v6741_v1  ;;  %v7076_v24 = vld [vmem:[%s10059_s1 + $0x2d0] sm:$0xff] }
 0x1fa   :  { %v715_v17 = vpop.f32.mrf.mxu0  ;;  %v786_v18 = vpop.f32.mrf.mxu1 }
 0x1fb   :  { %v792_v21 = vrot.slane %v715_v17, 6  ;;  %v806_v32 = vadd.f32 %v6749_v52, %v786_v18  ;;  %v7048_v17 = vld [vmem:[%s10059_s1 + $0x370] sm:$0xff]  ;;  %v10347_v18 = vld [vmem:[#allocation21_spill] sm:$0xff] }
 0x1fc   :  { %v717_v22 = vpop.f32.mrf.mxu0  ;;  %v5159_v23 = vpop.f32.mrf.mxu1 }
 0x1fd   :  { %v796_v25 = vadd.f32 %v792_v21, %v646_v20  ;;  %v793_v27 = vrot.slane %v717_v22, 6  ;;  %v808_v37 = vrot.slane %v806_v32, 6  ;;  %v7055_v20 = vld [vmem:[%s10059_s1 + $0x328] sm:$0xff]  ;;  %v7062_v21 = vld [vmem:[%s10059_s1 + $0x320] sm:$0xff]  ;;  %v10348_v22 = vld [vmem:[#allocation24_spill] sm:$0xff] }
 0x1fe   :  { %v7069_v23 = vld [vmem:[%s10059_s1 + $0x2d8] sm:$0xff]  ;;  %v10351_v32 = vld [vmem:[#allocation33_spill] sm:$0xff] }
 0x1ff   :  { %v798_v26 = vmul.f32 0.5, %v796_v25  ;;  %v797_v30 = vadd.f32 %v793_v27, %v647_v28  ;;  %v10349_v25 = vld [vmem:[#allocation27_spill] sm:$0xff]  ;;  %v7090_v27 = vld [vmem:[%s10059_s1 + $0x280] sm:$0xff]  ;;  %v10350_v28 = vld [vmem:[#allocation30_spill] sm:$0xff] }
 0x201   :  { %5955 = vtanh.f32 %v798_v26  ;;  %v799_v31 = vmul.f32 0.5, %v797_v30  ;;  %v7083_v26 = vld [vmem:[%s10059_s1 + $0x288] sm:$0xff]  ;;  %v7097_v30 = vld [vmem:[%s10059_s1 + $0x238] sm:$0xff] }
 0x203   :  { %5957 = vtanh.f32 %v799_v31  ;;  %v7104_v31 = vld [vmem:[%s10059_s1 + $0x230] sm:$0xff] }
 0x20e   :  { %v5956_v33 = vpop.eup %5955 }
 0x20f   :  { %v802_v35 = vmul.f32 0.5, %v5956_v33  ;;  %v7111_v33 = vld [vmem:[%s10059_s1 + $0x1e8] sm:$0xff] }
 0x210   :  { %v5958_v42 = vpop.eup %5957 }
 0x211   :  { %v804_v36 = vadd.f32 0.5, %v802_v35  ;;  %v803_v43 = vmul.f32 0.5, %v5958_v42  ;;  %v10352_v35 = vld [vmem:[#allocation36_spill] sm:$0xff]  ;;  %v10354_v42 = vld [vmem:[#allocation42_spill] sm:$0xff] }
 0x213   :  { %v810_v40 = vmul.f32 %v808_v37, %v804_v36  ;;  %v805_v44 = vadd.f32 0.5, %v803_v43  ;;  %v7125_v36 = vld [vmem:[%s10059_s1 + $0x198] sm:$0xff]  ;;  %v7132_v37 = vld [vmem:[%s10059_s1 + $0x190] sm:$0xff] }
 0x214   :  { %v7153_v43 = vld [vmem:[%s10059_s1 + $0xf8] sm:$0xff] }
 0x215   :  { %v811_v41 = vadd.f32 %v810_v40, %v648_v39  ;;  %v813_v45 = vsub.f32 1.0, %v805_v44  ;;  %v818_v49 = vmul.f32 %v816_v46, %v805_v44  ;;  %v10353_v39 = vld [vmem:[#allocation39_spill] sm:$0xff]  ;;  %v7139_v40 = vld [vmem:[%s10059_s1 + $0x148] sm:$0xff] }
 0x216   :  { %v7160_v44 = vld [vmem:[%s10059_s1 + $0xf0] sm:$0xff]  ;;  %v7167_v46 = vld [vmem:[%s10059_s1 + $0xa8] sm:$0xff] }
 0x217   :  { %5959 = vtanh.f32 %v811_v41  ;;  %v7146_v41 = vld [vmem:[%s10059_s1 + $0x140] sm:$0xff] }
 0x224   :  { %v5960_v47 = vpop.eup %5959 }
 0x225   :  { %v814_v48 = vmul.f32 %v5960_v47, %v813_v45  ;;  %v10355_v45 = vld [vmem:[#allocation45_spill] sm:$0xff] }
 0x226   :  { %v7174_v47 = vld [vmem:[%s10059_s1 + $0xa0] sm:$0xff] }
 0x227   :  { %v6986_v52 = vadd.f32 %v818_v49, %v814_v48  ;;  %v10356_v48 = vld [vmem:[#allocation48_spill] sm:$0xff] }
 0x228   :  { %v7181_v49 = vld [vmem:[%s10059_s1 + $0x58] sm:$0xff] }
 0x229   :  { %v6989_v50 = vrot.slane %v6986_v52, 2 }
 0x22b   :  { %5193 = vmatmul.mubr.f32.vlgmr.msra.gmra.mxu0 %v6989_v50  ;;  %1024 = vmatmul.mubr.f32.vlgmr.msra.gmra.mxu1 %v6989_v50 }
 0x22c   :  { %5196 = vmatpush3.msra.mxu0 %v10344_v55  ;;  %1162 = vmatpush1.msra.mxu1 %v6994_v51  ;;  %v7188_v55 = vld [vmem:[%s10059_s1 + $0x50] sm:$0xff] }
 0x22d   :  { %5197 = vmatprep.subr.mxu0 %v10272_v2  ;;  %1163 = vmatprep.subr.mxu1 %v6999_v54 }
 0x22e   :  { %5198 = vmatpush3.msra.mxu0 %v10345_v62  ;;  %1164 = vmatpush1.msra.mxu1 %v7006_v19  ;;  %v10357_v62 = vld [vmem:[#allocation51_spill] sm:$0xff] }
 0x22f   :  { %5199 = vmatprep.subr.mxu0 %v10272_v2  ;;  %1165 = vmatprep.subr.mxu1 %v7013_v57 }
 0x230   :  { %5200 = vmatpush3.msra.mxu0 %v10346_v14  ;;  %1166 = vmatpush1.msra.mxu1 %v7020_v58  ;;  %v7195_v14 = vld [vmem:[%s10059_s1 + $0x8] sm:$0xff] }
 0x231   :  { %5201 = vmatprep.subr.mxu0 %v10272_v2  ;;  %1167 = vmatprep.subr.mxu1 %v7027_v61 }
 0x232   :  { %5202 = vmatpush3.msra.mxu0 %v10347_v18  ;;  %1168 = vmatpush1.msra.mxu1 %v7034_v12  ;;  %v10358_v18 = vld [vmem:[#allocation54_spill] sm:$0xff] }
 0x233   :  { %5203 = vmatprep.subr.mxu0 %v10272_v2  ;;  %1169 = vmatprep.subr.mxu1 %v7041_v15 }
 0x234   :  { %5204 = vmatpush3.msra.mxu0 %v10348_v22  ;;  %1170 = vmatpush1.msra.mxu1 %v7048_v17  ;;  %v7204_v22 = vld [vmem:[%s10059_s1] sm:$0xff] }
 0x235   :  { %5205 = vmatprep.subr.mxu0 %v10272_v2  ;;  %1171 = vmatprep.subr.mxu1 %v7055_v20 }
 0x236   :  { %5206 = vmatpush3.msra.mxu0 %v10349_v25  ;;  %1172 = vmatpush1.msra.mxu1 %v7062_v21  ;;  %v10359_v25 = vld [vmem:[#allocation57_spill] sm:$0xff] }
 0x237   :  { %5207 = vmatprep.subr.mxu0 %v10272_v2  ;;  %1173 = vmatprep.subr.mxu1 %v7069_v23 }
 0x238   :  { %5208 = vmatpush3.msra.mxu0 %v10350_v28  ;;  %1174 = vmatpush1.msra.mxu1 %v7076_v24  ;;  %v7216_v28 = vld [vmem:[%s10059_s1 + $0x4c0] sm:$0xff] }
 0x239   :  { %5209 = vmatprep.subr.mxu0 %v10272_v2  ;;  %1175 = vmatprep.subr.mxu1 %v7083_v26 }
 0x23a   :  { %5210 = vmatpush3.msra.mxu0 %v10351_v32  ;;  %1176 = vmatpush1.msra.mxu1 %v7090_v27  ;;  %v7224_v32 = vld [vmem:[%s10059_s1 + $0x470] sm:$0xff] }
 0x23b   :  { %5211 = vmatprep.subr.mxu0 %v10272_v2  ;;  %1177 = vmatprep.subr.mxu1 %v7097_v30 }
 0x23c   :  { %5212 = vmatpush3.msra.mxu0 %v10352_v35  ;;  %1178 = vmatpush1.msra.mxu1 %v7104_v31  ;;  %v7234_v35 = vld [vmem:[%s10059_s1 + $0x420] sm:$0xff] }
 0x23d   :  { %5213 = vmatprep.subr.mxu0 %v10272_v2  ;;  %1179 = vmatprep.subr.mxu1 %v7111_v33 }
 0x23e   :  { %5214 = vmatpush3.msra.mxu0 %v10353_v39  ;;  %1180 = vmatpush1.msra.mxu1 %v7118_v34  ;;  %v7243_v39 = vld [vmem:[%s10059_s1 + $0x3d0] sm:$0xff] }
 0x23f   :  { %5215 = vmatprep.subr.mxu0 %v10272_v2  ;;  %1181 = vmatprep.subr.mxu1 %v7125_v36 }
 0x240   :  { %5216 = vmatpush3.msra.mxu0 %v10354_v42  ;;  %1182 = vmatpush1.msra.mxu1 %v7132_v37  ;;  %v7399_v42 = vld [vmem:[%s10059_s1 + $0x428] sm:$0xff] }
 0x241   :  { %5217 = vmatprep.subr.mxu0 %v10272_v2  ;;  %1183 = vmatprep.subr.mxu1 %v7139_v40  ;;  %10371 = vst [vmem:[#allocation16_spill] sm:$0xff] %v7399_v42 }
 0x242   :  { %5218 = vmatpush3.msra.mxu0 %v10355_v45  ;;  %1184 = vmatpush1.msra.mxu1 %v7146_v41  ;;  %v7405_v45 = vld [vmem:[%s10059_s1 + $0x3e0] sm:$0xff] }
 0x243   :  { %5219 = vmatprep.subr.mxu0 %v10272_v2  ;;  %1185 = vmatprep.subr.mxu1 %v7153_v43  ;;  %10372 = vst [vmem:[#allocation17_spill] sm:$0xff] %v7405_v45 }
 0x244   :  { %5220 = vmatpush3.msra.mxu0 %v10356_v48  ;;  %1186 = vmatpush1.msra.mxu1 %v7160_v44  ;;  %v7411_v48 = vld [vmem:[%s10059_s1 + $0x3d8] sm:$0xff] }
 0x245   :  { %5221 = vmatprep.subr.mxu0 %v10272_v2  ;;  %1187 = vmatprep.subr.mxu1 %v7167_v46  ;;  %10373 = vst [vmem:[#allocation19_spill] sm:$0xff] %v7411_v48 }
 0x246   :  { %5222 = vmatpush3.msra.mxu0 %v10357_v62  ;;  %1188 = vmatpush1.msra.mxu1 %v7174_v47  ;;  %v7417_v62 = vld [vmem:[%s10059_s1 + $0x390] sm:$0xff] }
 0x247   :  { %5223 = vmatprep.subr.mxu0 %v10272_v2  ;;  %1189 = vmatprep.subr.mxu1 %v7181_v49  ;;  %10374 = vst [vmem:[#allocation20_spill] sm:$0xff] %v7417_v62 }
 0x248   :  { %5224 = vmatpush3.msra.mxu0 %v10358_v18  ;;  %1190 = vmatpush1.msra.mxu1 %v7188_v55  ;;  %v7423_v18 = vld [vmem:[%s10059_s1 + $0x388] sm:$0xff] }
 0x249   :  { %5225 = vmatprep.subr.mxu0 %v10272_v2  ;;  %1191 = vmatprep.subr.mxu1 %v7195_v14  ;;  %10375 = vst [vmem:[#allocation22_spill] sm:$0xff] %v7423_v18 }
 0x24a   :  { %5226 = vmatpush3.msra.mxu0 %v10359_v25  ;;  %5227 = vmatprep.mubr.msk.f32.mxu0 %vm6004_vm0, %v10272_v2  ;;  %v7429_v25 = vld [vmem:[%s10059_s1 + $0x340] sm:$0xff] }
 0x24b   :  { %1192 = vmatpush1.msra.mxu1 %v7204_v22  ;;  %1225 = vmatprep.mubr.f32.mxu1 %v10272_v2  ;;  %10376 = vst [vmem:[#allocation23_spill] sm:$0xff] %v7429_v25 }
 0x24c   :  { %5228 = vmatmul.mubr.f32.vlgmr.msra.gmra.mxu0 %v6989_v50  ;;  %1226 = vmatmul.mubr.f32.vlgmr.msra.gmra.mxu1 %v6989_v50 }
 0x24d   :  { %5230 = vmatprep.subr.mxu0 %v10272_v2  ;;  %5262 = vmatprep.mubr.msk.f32.mxu0 %vm6004_vm0, %v10272_v2 }
 0x24e   :  { %5231 = vmatpush3.msra.mxu0 %v7216_v28  ;;  %5265 = vmatprep.subr.mxu1 %v10272_v2 }
 0x24f   :  { %5232 = vmatprep.subr.mxu0 %v10272_v2  ;;  %5266 = vmatpush3.msra.mxu1 %v6866_v59  ;;  %v7252_v59 = vld [vmem:[%s10059_s1 + $0x380] sm:$0xff] }
 0x250   :  { %5233 = vmatpush3.msra.mxu0 %v7224_v32  ;;  %5267 = vmatprep.subr.mxu1 %v10272_v2 }
 0x251   :  { %5234 = vmatprep.subr.mxu0 %v10272_v2  ;;  %5268 = vmatpush3.msra.mxu1 %v6873_v60  ;;  %v7261_v60 = vld [vmem:[%s10059_s1 + $0x330] sm:$0xff] }
 0x252   :  { %5235 = vmatpush3.msra.mxu0 %v7234_v35  ;;  %5269 = vmatprep.subr.mxu1 %v10272_v2 }
 0x253   :  { %5236 = vmatprep.subr.mxu0 %v10272_v2  ;;  %5270 = vmatpush3.msra.mxu1 %v6880_v63  ;;  %v7270_v63 = vld [vmem:[%s10059_s1 + $0x2e0] sm:$0xff] }
 0x254   :  { %5237 = vmatpush3.msra.mxu0 %v7243_v39  ;;  %5271 = vmatprep.subr.mxu1 %v10272_v2 }
 0x255   :  { %5238 = vmatprep.subr.mxu0 %v10272_v2  ;;  %5272 = vmatpush3.msra.mxu1 %v6887_v6  ;;  %v7279_v6 = vld [vmem:[%s10059_s1 + $0x290] sm:$0xff] }
 0x256   :  { %5239 = vmatpush3.msra.mxu0 %v7252_v59  ;;  %5273 = vmatprep.subr.mxu1 %v10272_v2 }
 0x257   :  { %5240 = vmatprep.subr.mxu0 %v10272_v2  ;;  %5274 = vmatpush3.msra.mxu1 %v6894_v8  ;;  %v7288_v8 = vld [vmem:[%s10059_s1 + $0x240] sm:$0xff] }
 0x258   :  { %5241 = vmatpush3.msra.mxu0 %v7261_v60  ;;  %5275 = vmatprep.subr.mxu1 %v10272_v2 }
 0x259   :  { %5242 = vmatprep.subr.mxu0 %v10272_v2  ;;  %5276 = vmatpush3.msra.mxu1 %v6901_v3  ;;  %v7297_v3 = vld [vmem:[%s10059_s1 + $0x1f0] sm:$0xff] }
 0x25a   :  { %5243 = vmatpush3.msra.mxu0 %v7270_v63  ;;  %5277 = vmatprep.subr.mxu1 %v10272_v2 }
 0x25b   :  { %5244 = vmatprep.subr.mxu0 %v10272_v2  ;;  %5278 = vmatpush3.msra.mxu1 %v6908_v16  ;;  %v7306_v16 = vld [vmem:[%s10059_s1 + $0x1a0] sm:$0xff] }
 0x25c   :  { %5245 = vmatpush3.msra.mxu0 %v7279_v6  ;;  %5279 = vmatprep.subr.mxu1 %v10272_v2  ;;  %10360 = vst [vmem:[#allocation7_spill] sm:$0xff] %v7306_v16 }
 0x25d   :  { %5246 = vmatprep.subr.mxu0 %v10272_v2  ;;  %5280 = vmatpush3.msra.mxu1 %v6915_v38  ;;  %v7315_v38 = vld [vmem:[%s10059_s1 + $0x150] sm:$0xff] }
 0x25e   :  { %5247 = vmatpush3.msra.mxu0 %v7288_v8  ;;  %5281 = vmatprep.subr.mxu1 %v10272_v2  ;;  %10361 = vst [vmem:[#allocation3_spill] sm:$0xff] %v7315_v38 }
 0x25f   :  { %5248 = vmatprep.subr.mxu0 %v10272_v2  ;;  %5282 = vmatpush3.msra.mxu1 %v6922_v4  ;;  %v7324_v4 = vld [vmem:[%s10059_s1 + $0x100] sm:$0xff] }
 0x260   :  { %5249 = vmatpush3.msra.mxu0 %v7297_v3  ;;  %5283 = vmatprep.subr.mxu1 %v10272_v2  ;;  %10362 = vst [vmem:[#allocation4_spill] sm:$0xff] %v7324_v4 }
 0x261   :  { %5250 = vmatprep.subr.mxu0 %v10272_v2  ;;  %5284 = vmatpush3.msra.mxu1 %v6929_v7  ;;  %v7333_v7 = vld [vmem:[%s10059_s1 + $0xb0] sm:$0xff] }
 0x262   :  { %5251 = vmatpush3.msra.mxu0 %v7306_v16  ;;  %5285 = vmatprep.subr.mxu1 %v10272_v2  ;;  %10363 = vst [vmem:[#allocation8_spill] sm:$0xff] %v7333_v7 }
 0x263   :  { %5252 = vmatprep.subr.mxu0 %v10272_v2  ;;  %5286 = vmatpush3.msra.mxu1 %v6936_v29  ;;  %v7342_v29 = vld [vmem:[%s10059_s1 + $0x60] sm:$0xff] }
 0x264   :  { %5253 = vmatpush3.msra.mxu0 %v7315_v38  ;;  %5287 = vmatprep.subr.mxu1 %v10272_v2  ;;  %10364 = vst [vmem:[#allocation5_spill] sm:$0xff] %v7342_v29 }
 0x265   :  { %5254 = vmatprep.subr.mxu0 %v10272_v2  ;;  %5288 = vmatpush3.msra.mxu1 %v6943_v9  ;;  %v7351_v9 = vld [vmem:[%s10059_s1 + $0x10] sm:$0xff] }
 0x266   :  { %5255 = vmatpush3.msra.mxu0 %v7324_v4  ;;  %5289 = vmatprep.subr.mxu1 %v10272_v2  ;;  %10365 = vst [vmem:[#allocation6_spill] sm:$0xff] %v7351_v9 }
 0x267   :  { %5256 = vmatprep.subr.mxu0 %v10272_v2  ;;  %5290 = vmatpush3.msra.mxu1 %v6950_v10  ;;  %v7369_v10 = vld [vmem:[%s10059_s1 + $0x4d0] sm:$0xff] }
 0x268   :  { %5257 = vmatpush3.msra.mxu0 %v7333_v7  ;;  %5291 = vmatprep.subr.mxu1 %v10272_v2  ;;  %10366 = vst [vmem:[#allocation9_spill] sm:$0xff] %v7369_v10 }
 0x269   :  { %5258 = vmatprep.subr.mxu0 %v10272_v2  ;;  %5292 = vmatpush3.msra.mxu1 %v6957_v0  ;;  %v7374_v0 = vld [vmem:[%s10059_s1 + $0x4c8] sm:$0xff] }
 0x26a   :  { %5259 = vmatpush3.msra.mxu0 %v7342_v29  ;;  %5293 = vmatprep.subr.mxu1 %v10272_v2  ;;  %10367 = vst [vmem:[#allocation10_spill] sm:$0xff] %v7374_v0 }
 0x26b   :  { %5260 = vmatprep.subr.mxu0 %v10272_v2  ;;  %5294 = vmatpush3.msra.mxu1 %v6964_v56  ;;  %v7379_v56 = vld [vmem:[%s10059_s1 + $0x480] sm:$0xff] }
 0x26c   :  { %5261 = vmatpush3.msra.mxu0 %v7351_v9  ;;  %5295 = vmatprep.subr.mxu1 %v10272_v2  ;;  %10368 = vst [vmem:[#allocation11_spill] sm:$0xff] %v7379_v56 }
 0x26d   :  { %5263 = vmatmul.mubr.f32.vlgmr.msra.gmra.mxu0 %v6989_v50  ;;  %5296 = vmatpush3.msra.mxu1 %v6970_v5  ;;  %v7385_v5 = vld [vmem:[%s10059_s1 + $0x478] sm:$0xff]  ;;  %v7393_v50 = vld [vmem:[%s10059_s1 + $0x430] sm:$0xff] }
 0x26e   :  { %5297 = vmatprep.mubr.msk.f32.mxu1 %vm6004_vm0, %v10272_v2  ;;  %1539 = vmatprep.mubr.f32.mxu0 %v10272_v2  ;;  %10369 = vst [vmem:[#allocation13_spill] sm:$0xff] %v7385_v5  ;;  %10370 = vst [vmem:[#allocation14_spill] sm:$0xff] %v7393_v50 }
 0x26f   :  { %5300 = vmatprep.subr.mxu1 %v10272_v2  ;;  %1475 = vmatprep.subr.mxu0 %v7369_v10 }
 0x270   :  { %1476 = vmatpush1.msra.mxu0 %v7374_v0 }
 0x271   :  { %1477 = vmatprep.subr.mxu0 %v7379_v56 }
 0x272   :  { %1478 = vmatpush1.msra.mxu0 %v7385_v5 }
 0x273   :  { %1479 = vmatprep.subr.mxu0 %v7393_v50 }
 0x274   :  { %1480 = vmatpush1.msra.mxu0 %v7399_v42  ;;  %v7481_v42 = vld [vmem:[%s10059_s1 + $0x1f8] sm:$0xff] }
 0x275   :  { %1481 = vmatprep.subr.mxu0 %v7405_v45  ;;  %v7475_v45 = vld [vmem:[%s10059_s1 + $0x200] sm:$0xff]  ;;  %10385 = vst [vmem:[#allocation37_spill] sm:$0xff] %v7481_v42 }
 0x276   :  { %1482 = vmatpush1.msra.mxu0 %v7411_v48  ;;  %v7435_v48 = vld [vmem:[%s10059_s1 + $0x338] sm:$0xff]  ;;  %10384 = vst [vmem:[#allocation35_spill] sm:$0xff] %v7475_v45 }
 0x277   :  { %1483 = vmatprep.subr.mxu0 %v7417_v62  ;;  %10377 = vst [vmem:[#allocation25_spill] sm:$0xff] %v7435_v48  ;;  %v7441_v62 = vld [vmem:[%s10059_s1 + $0x2f0] sm:$0xff] }
 0x278   :  { %1484 = vmatpush1.msra.mxu0 %v7423_v18  ;;  %10378 = vst [vmem:[#allocation26_spill] sm:$0xff] %v7441_v62  ;;  %v7447_v18 = vld [vmem:[%s10059_s1 + $0x2e8] sm:$0xff] }
 0x279   :  { %1485 = vmatprep.subr.mxu0 %v7429_v25  ;;  %10379 = vst [vmem:[#allocation28_spill] sm:$0xff] %v7447_v18  ;;  %v7453_v25 = vld [vmem:[%s10059_s1 + $0x2a0] sm:$0xff] }
 0x27a   :  { %1486 = vmatpush1.msra.mxu0 %v7435_v48  ;;  %10380 = vst [vmem:[#allocation29_spill] sm:$0xff] %v7453_v25  ;;  %v7458_v48 = vld [vmem:[%s10059_s1 + $0x298] sm:$0xff] }
 0x27b   :  { %1487 = vmatprep.subr.mxu0 %v7441_v62  ;;  %10381 = vst [vmem:[#allocation31_spill] sm:$0xff] %v7458_v48  ;;  %v7463_v62 = vld [vmem:[%s10059_s1 + $0x250] sm:$0xff] }
 0x27c   :  { %1488 = vmatpush1.msra.mxu0 %v7447_v18  ;;  %10382 = vst [vmem:[#allocation32_spill] sm:$0xff] %v7463_v62  ;;  %v7469_v18 = vld [vmem:[%s10059_s1 + $0x248] sm:$0xff] }
 0x27d   :  { %1489 = vmatprep.subr.mxu0 %v7453_v25  ;;  %10383 = vst [vmem:[#allocation34_spill] sm:$0xff] %v7469_v18  ;;  %v7487_v25 = vld [vmem:[%s10059_s1 + $0x1b0] sm:$0xff] }
 0x27e   :  { %1490 = vmatpush1.msra.mxu0 %v7458_v48  ;;  %10386 = vst [vmem:[#allocation38_spill] sm:$0xff] %v7487_v25  ;;  %v7493_v48 = vld [vmem:[%s10059_s1 + $0x1a8] sm:$0xff] }
 0x27f   :  { %1491 = vmatprep.subr.mxu0 %v7463_v62  ;;  %10387 = vst [vmem:[#allocation40_spill] sm:$0xff] %v7493_v48  ;;  %v7499_v62 = vld [vmem:[%s10059_s1 + $0x160] sm:$0xff] }
 0x280   :  { %1492 = vmatpush1.msra.mxu0 %v7469_v18  ;;  %10388 = vst [vmem:[#allocation41_spill] sm:$0xff] %v7499_v62  ;;  %v7505_v18 = vld [vmem:[%s10059_s1 + $0x158] sm:$0xff] }
 0x281   :  { %1493 = vmatprep.subr.mxu0 %v7475_v45  ;;  %10389 = vst [vmem:[#allocation43_spill] sm:$0xff] %v7505_v18  ;;  %v7511_v45 = vld [vmem:[%s10059_s1 + $0x110] sm:$0xff] }
 0x282   :  { %1494 = vmatpush1.msra.mxu0 %v7481_v42  ;;  %10390 = vst [vmem:[#allocation44_spill] sm:$0xff] %v7511_v45  ;;  %v7517_v42 = vld [vmem:[%s10059_s1 + $0x108] sm:$0xff] }
 0x283   :  { %1495 = vmatprep.subr.mxu0 %v7487_v25  ;;  %10391 = vst [vmem:[#allocation46_spill] sm:$0xff] %v7517_v42  ;;  %v7523_v25 = vld [vmem:[%s10059_s1 + $0xc0] sm:$0xff] }
 0x284   :  { %1496 = vmatpush1.msra.mxu0 %v7493_v48  ;;  %10392 = vst [vmem:[#allocation47_spill] sm:$0xff] %v7523_v25  ;;  %v7529_v48 = vld [vmem:[%s10059_s1 + $0xb8] sm:$0xff] }
 0x285   :  { %1497 = vmatprep.subr.mxu0 %v7499_v62  ;;  %10393 = vst [vmem:[#allocation49_spill] sm:$0xff] %v7529_v48  ;;  %v7535_v62 = vld [vmem:[%s10059_s1 + $0x70] sm:$0xff] }
 0x286   :  { %1498 = vmatpush1.msra.mxu0 %v7505_v18  ;;  %10394 = vst [vmem:[#allocation50_spill] sm:$0xff] %v7535_v62  ;;  %v7541_v18 = vld [vmem:[%s10059_s1 + $0x68] sm:$0xff] }
 0x287   :  { %1499 = vmatprep.subr.mxu0 %v7511_v45  ;;  %10395 = vst [vmem:[#allocation52_spill] sm:$0xff] %v7541_v18  ;;  %v7547_v45 = vld [vmem:[%s10059_s1 + $0x20] sm:$0xff] }
 0x288   :  { %1500 = vmatpush1.msra.mxu0 %v7517_v42  ;;  %10396 = vst [vmem:[#allocation53_spill] sm:$0xff] %v7547_v45  ;;  %v7553_v42 = vld [vmem:[%s10059_s1 + $0x18] sm:$0xff] }
 0x289   :  { %1501 = vmatprep.subr.mxu0 %v7523_v25  ;;  %10397 = vst [vmem:[#allocation55_spill] sm:$0xff] %v7553_v42 }
 0x28a   :  { %1502 = vmatpush1.msra.mxu0 %v7529_v48 }
 0x28b   :  { %1503 = vmatprep.subr.mxu0 %v7535_v62 }
 0x28c   :  { %1504 = vmatpush1.msra.mxu0 %v7541_v18 }
 0x28d   :  { %1505 = vmatprep.subr.mxu0 %v7547_v45 }
 0x28e   :  { %1506 = vmatpush1.msra.mxu0 %v7553_v42 }
 0x28f   :  { %1677 = vmatprep.subr.mxu0 %v6975_v13 }
 0x2eb   :  { %v905_v48 = vpop.f32.mrf.mxu0  ;;  %v1025_v50 = vpop.f32.mrf.mxu1 }
 0x2ec   :  { %910 = vst.msk [vmem:[#allocation2] sm:$0x3] %vm909_vm3, %v905_v48  ;;  %v1152_v0 = vrot.slane %v1025_v50, 4  ;;  %v7565_v50 = vld [vmem:[%s10061_s2 + $0x3] ss:$0 sm:$0xff] }
 0x2ed   :  { %v5194_v25 = vpop.f32.mrf.mxu0  ;;  %v1027_v62 = vpop.f32.mrf.mxu1 }
 0x2ee   :  { %v1158_v18 = vadd.f32 %v1152_v0, %v6736_v53  ;;  %v1153_v42 = vrot.slane %v1027_v62, 4 }
 0x2f0   :  { %v1159_v4 = vadd.f32 %v1153_v42, %v6741_v1  ;;  %v1333_v1 = vrot.slane %v6986_v52, 6  ;;  %v7585_v52 = vld [vmem:[%s10059_s1 + $0x488] sm:$0xff] }
 0x30c   :  { %v1096_v5 = vpop.f32.mrf.mxu0  ;;  %v1227_v56 = vpop.f32.mrf.mxu1 }
 0x30d   :  { %v1304_v9 = vrot.slane %v1227_v56, 4  ;;  %v1154_v0 = vrot.slane %v1096_v5, 4 }
 0x30e   :  { %v5229_v10 = vpop.f32.mrf.mxu0  ;;  %v1229_v7 = vpop.f32.mrf.mxu1 }
 0x30f   :  { %v1308_v29 = vadd.f32 %v1304_v9, %v1158_v18  ;;  %v1305_v13 = vrot.slane %v1229_v7, 4  ;;  %v1160_v7 = vadd.f32 %v1154_v0, %v6752_v11  ;;  %v10428_v0 = vld [vmem:[#allocation44_spill] sm:$0xff] }
 0x311   :  { %v1310_v45 = vmul.f32 0.5, %v1308_v29  ;;  %v1309_v38 = vadd.f32 %v1305_v13, %v1159_v4 }
 0x313   :  { %5961 = vtanh.f32 %v1310_v45  ;;  %v1311_v48 = vmul.f32 0.5, %v1309_v38 }
 0x315   :  { %5963 = vtanh.f32 %v1311_v48 }
 0x320   :  { %v5962_v25 = vpop.eup %5961 }
 0x321   :  { %v1314_v10 = vmul.f32 0.5, %v5962_v25 }
 0x322   :  { %v5964_v38 = vpop.eup %5963 }
 0x323   :  { %v1316_v62 = vadd.f32 0.5, %v1314_v10  ;;  %v1315_v18 = vmul.f32 0.5, %v5964_v38  ;;  %v7578_v10 = vld [vmem:[%s10059_s1 + $0x4d8] sm:$0xff] }
 0x324   :  { %v7798_v38 = vld [vmem:[%s10059_s1 + $0x4f8] sm:$0xff] }
 0x325   :  { %v1317_v13 = vadd.f32 0.5, %v1315_v18  ;;  %v7803_v18 = vld [vmem:[%s10059_s1 + $0x4a8] sm:$0xff] }
 0x327   :  { %v1331_v48 = vsub.f32 1.0, %v1317_v13  ;;  %v1335_v25 = vmul.f32 %v1333_v1, %v1317_v13  ;;  %v7603_v1 = vld [vmem:[%s10059_s1 + $0x3e8] sm:$0xff]  ;;  %v7812_v13 = vld [vmem:[%s10059_s1 + $0x458] sm:$0xff] }
 0x32d   :  { %v1298_v56 = vpop.f32.mrf.mxu0 }
 0x32e   :  { %v1324_v29 = vadd.f32 %v7565_v50, %v1298_v56 }
 0x32f   :  { %v5264_v9 = vpop.f32.mrf.mxu0 }
 0x330   :  { %v1326_v45 = vrot.slane %v1324_v29, 4  ;;  %v10429_v29 = vld [vmem:[#allocation46_spill] sm:$0xff]  ;;  %v10430_v9 = vld [vmem:[#allocation47_spill] sm:$0xff] }
 0x332   :  { %v1328_v42 = vmul.f32 %v1326_v45, %v1316_v62  ;;  %v10431_v62 = vld [vmem:[#allocation49_spill] sm:$0xff]  ;;  %v10432_v45 = vld [vmem:[#allocation50_spill] sm:$0xff] }
 0x334   :  { %v1329_v4 = vadd.f32 %v1328_v42, %v1160_v7  ;;  %v10433_v7 = vld [vmem:[#allocation52_spill] sm:$0xff]  ;;  %v10434_v42 = vld [vmem:[#allocation53_spill] sm:$0xff] }
 0x336   :  { %5965 = vtanh.f32 %v1329_v4  ;;  %v10435_v4 = vld [vmem:[#allocation55_spill] sm:$0xff] }
 0x343   :  { %v5966_v53 = vpop.eup %5965 }
 0x344   :  { %v1332_v16 = vmul.f32 %v5966_v53, %v1331_v48  ;;  %v7594_v53 = vld [vmem:[%s10059_s1 + $0x438] sm:$0xff]  ;;  %v7819_v48 = vld [vmem:[%s10059_s1 + $0x408] sm:$0xff] }
 0x346   :  { %v7570_v5 = vadd.f32 %v1335_v25, %v1332_v16  ;;  %v10427_v16 = vld [vmem:[#allocation43_spill] sm:$0xff]  ;;  %v7826_v25 = vld [vmem:[%s10059_s1 + $0x3b8] sm:$0xff] }
 0x348   :  { %v7573_v56 = vrot.slane %v7570_v5, 4 }
 0x34a   :  { %5298 = vmatmul.mubr.f32.vlgmr.msra.gmra.mxu1 %v7573_v56  ;;  %1540 = vmatmul.mubr.f32.vlgmr.msra.gmra.mxu0 %v7573_v56 }
 0x34b   :  { %5301 = vmatpush3.msra.mxu1 %v7578_v10  ;;  %1678 = vmatpush1.msra.mxu0 %v6994_v51  ;;  %v7612_v51 = vld [vmem:[%s10059_s1 + $0x398] sm:$0xff] }
 0x34c   :  { %5302 = vmatprep.subr.mxu1 %v10272_v2  ;;  %1679 = vmatprep.subr.mxu0 %v6999_v54  ;;  %v7621_v54 = vld [vmem:[%s10059_s1 + $0x348] sm:$0xff] }
 0x34d   :  { %5303 = vmatpush3.msra.mxu1 %v7585_v52  ;;  %1680 = vmatpush1.msra.mxu0 %v7006_v19  ;;  %v7630_v19 = vld [vmem:[%s10059_s1 + $0x2f8] sm:$0xff] }
 0x34e   :  { %5304 = vmatprep.subr.mxu1 %v10272_v2  ;;  %1681 = vmatprep.subr.mxu0 %v7013_v57  ;;  %v7639_v57 = vld [vmem:[%s10059_s1 + $0x2a8] sm:$0xff] }
 0x34f   :  { %5305 = vmatpush3.msra.mxu1 %v7594_v53  ;;  %1682 = vmatpush1.msra.mxu0 %v7020_v58  ;;  %v7648_v58 = vld [vmem:[%s10059_s1 + $0x258] sm:$0xff] }
 0x350   :  { %5306 = vmatprep.subr.mxu1 %v10272_v2  ;;  %1683 = vmatprep.subr.mxu0 %v7027_v61  ;;  %v7657_v61 = vld [vmem:[%s10059_s1 + $0x208] sm:$0xff] }
 0x351   :  { %5307 = vmatpush3.msra.mxu1 %v7603_v1  ;;  %1684 = vmatpush1.msra.mxu0 %v7034_v12  ;;  %v7666_v12 = vld [vmem:[%s10059_s1 + $0x1b8] sm:$0xff] }
 0x352   :  { %5308 = vmatprep.subr.mxu1 %v10272_v2  ;;  %1685 = vmatprep.subr.mxu0 %v7041_v15  ;;  %v7675_v15 = vld [vmem:[%s10059_s1 + $0x168] sm:$0xff] }
 0x353   :  { %5309 = vmatpush3.msra.mxu1 %v7612_v51  ;;  %1686 = vmatpush1.msra.mxu0 %v7048_v17  ;;  %v7684_v17 = vld [vmem:[%s10059_s1 + $0x118] sm:$0xff] }
 0x354   :  { %5310 = vmatprep.subr.mxu1 %v10272_v2  ;;  %1687 = vmatprep.subr.mxu0 %v7055_v20  ;;  %v7693_v20 = vld [vmem:[%s10059_s1 + $0xc8] sm:$0xff] }
 0x355   :  { %5311 = vmatpush3.msra.mxu1 %v7621_v54  ;;  %1688 = vmatpush1.msra.mxu0 %v7062_v21  ;;  %v7702_v21 = vld [vmem:[%s10059_s1 + $0x78] sm:$0xff] }
 0x356   :  { %5312 = vmatprep.subr.mxu1 %v10272_v2  ;;  %1689 = vmatprep.subr.mxu0 %v7069_v23  ;;  %v7711_v23 = vld [vmem:[%s10059_s1 + $0x28] sm:$0xff] }
 0x357   :  { %5313 = vmatpush3.msra.mxu1 %v7630_v19  ;;  %1690 = vmatpush1.msra.mxu0 %v7076_v24  ;;  %v10398_v24 = vld [vmem:[#allocation7_spill] sm:$0xff] }
 0x358   :  { %5314 = vmatprep.subr.mxu1 %v10272_v2  ;;  %1691 = vmatprep.subr.mxu0 %v7083_v26  ;;  %v10399_v26 = vld [vmem:[#allocation3_spill] sm:$0xff] }
 0x359   :  { %5315 = vmatpush3.msra.mxu1 %v7639_v57  ;;  %1692 = vmatpush1.msra.mxu0 %v7090_v27  ;;  %v10400_v27 = vld [vmem:[#allocation4_spill] sm:$0xff] }
 0x35a   :  { %5316 = vmatprep.subr.mxu1 %v10272_v2  ;;  %1693 = vmatprep.subr.mxu0 %v7097_v30  ;;  %v10401_v30 = vld [vmem:[#allocation8_spill] sm:$0xff] }
 0x35b   :  { %5317 = vmatpush3.msra.mxu1 %v7648_v58  ;;  %1694 = vmatpush1.msra.mxu0 %v7104_v31  ;;  %v10402_v31 = vld [vmem:[#allocation5_spill] sm:$0xff] }
 0x35c   :  { %5318 = vmatprep.subr.mxu1 %v10272_v2  ;;  %1695 = vmatprep.subr.mxu0 %v7111_v33  ;;  %v10403_v33 = vld [vmem:[#allocation6_spill] sm:$0xff] }
 0x35d   :  { %5319 = vmatpush3.msra.mxu1 %v7657_v61  ;;  %1696 = vmatpush1.msra.mxu0 %v7118_v34  ;;  %v10404_v34 = vld [vmem:[#allocation9_spill] sm:$0xff] }
 0x35e   :  { %5320 = vmatprep.subr.mxu1 %v10272_v2  ;;  %1697 = vmatprep.subr.mxu0 %v7125_v36  ;;  %v10405_v36 = vld [vmem:[#allocation10_spill] sm:$0xff] }
 0x35f   :  { %5321 = vmatpush3.msra.mxu1 %v7666_v12  ;;  %1698 = vmatpush1.msra.mxu0 %v7132_v37  ;;  %v10406_v37 = vld [vmem:[#allocation11_spill] sm:$0xff] }
 0x360   :  { %5322 = vmatprep.subr.mxu1 %v10272_v2  ;;  %1699 = vmatprep.subr.mxu0 %v7139_v40  ;;  %v10407_v40 = vld [vmem:[#allocation13_spill] sm:$0xff] }
 0x361   :  { %5323 = vmatpush3.msra.mxu1 %v7675_v15  ;;  %1700 = vmatpush1.msra.mxu0 %v7146_v41  ;;  %v10408_v41 = vld [vmem:[#allocation14_spill] sm:$0xff] }
 0x362   :  { %5324 = vmatprep.subr.mxu1 %v10272_v2  ;;  %1701 = vmatprep.subr.mxu0 %v7153_v43  ;;  %v10409_v43 = vld [vmem:[#allocation16_spill] sm:$0xff] }
 0x363   :  { %5325 = vmatpush3.msra.mxu1 %v7684_v17  ;;  %1702 = vmatpush1.msra.mxu0 %v7160_v44  ;;  %v10410_v44 = vld [vmem:[#allocation17_spill] sm:$0xff] }
 0x364   :  { %5326 = vmatprep.subr.mxu1 %v10272_v2  ;;  %1703 = vmatprep.subr.mxu0 %v7167_v46  ;;  %v10411_v46 = vld [vmem:[#allocation19_spill] sm:$0xff] }
 0x365   :  { %5327 = vmatpush3.msra.mxu1 %v7693_v20  ;;  %1704 = vmatpush1.msra.mxu0 %v7174_v47  ;;  %v10412_v47 = vld [vmem:[#allocation20_spill] sm:$0xff] }
 0x366   :  { %5328 = vmatprep.subr.mxu1 %v10272_v2  ;;  %1705 = vmatprep.subr.mxu0 %v7181_v49  ;;  %v10413_v49 = vld [vmem:[#allocation22_spill] sm:$0xff] }
 0x367   :  { %5329 = vmatpush3.msra.mxu1 %v7702_v21  ;;  %1706 = vmatpush1.msra.mxu0 %v7188_v55  ;;  %v10414_v55 = vld [vmem:[#allocation23_spill] sm:$0xff] }
 0x368   :  { %5330 = vmatprep.subr.mxu1 %v10272_v2  ;;  %1707 = vmatprep.subr.mxu0 %v7195_v14  ;;  %v10415_v14 = vld [vmem:[#allocation25_spill] sm:$0xff] }
 0x369   :  { %5331 = vmatpush3.msra.mxu1 %v7711_v23  ;;  %5332 = vmatprep.mubr.msk.f32.mxu1 %vm6004_vm0, %v10272_v2 }
 0x36a   :  { %1708 = vmatpush1.msra.mxu0 %v7204_v22  ;;  %1741 = vmatprep.mubr.f32.mxu0 %v10272_v2  ;;  %v10416_v22 = vld [vmem:[#allocation26_spill] sm:$0xff] }
 0x36b   :  { %5333 = vmatmul.mubr.f32.vlgmr.msra.gmra.mxu1 %v7573_v56  ;;  %1742 = vmatmul.mubr.f32.vlgmr.msra.gmra.mxu0 %v7573_v56 }
 0x36c   :  { %5335 = vmatprep.subr.mxu1 %v10272_v2  ;;  %5367 = vmatprep.mubr.msk.f32.mxu1 %vm6004_vm0, %v10272_v2 }
 0x36d   :  { %5336 = vmatpush3.msra.mxu1 %v7216_v28  ;;  %5370 = vmatprep.subr.mxu0 %v10272_v2  ;;  %v10417_v28 = vld [vmem:[#allocation28_spill] sm:$0xff] }
 0x36e   :  { %5337 = vmatprep.subr.mxu1 %v10272_v2  ;;  %5402 = vmatprep.mubr.msk.f32.mxu0 %vm6004_vm0, %v10272_v2 }
 0x36f   :  { %5338 = vmatpush3.msra.mxu1 %v7224_v32  ;;  %v10418_v32 = vld [vmem:[#allocation29_spill] sm:$0xff]  ;;  %5371 = vmatpush3.msra.mxu0 %v7798_v38 }
 0x370   :  { %5339 = vmatprep.subr.mxu1 %v10272_v2  ;;  %5372 = vmatprep.subr.mxu0 %v10272_v2 }
 0x371   :  { %5340 = vmatpush3.msra.mxu1 %v7234_v35  ;;  %v10419_v35 = vld [vmem:[#allocation31_spill] sm:$0xff]  ;;  %5373 = vmatpush3.msra.mxu0 %v7803_v18 }
 0x372   :  { %5341 = vmatprep.subr.mxu1 %v10272_v2  ;;  %5374 = vmatprep.subr.mxu0 %v10272_v2 }
 0x373   :  { %5342 = vmatpush3.msra.mxu1 %v7243_v39  ;;  %v10420_v39 = vld [vmem:[#allocation32_spill] sm:$0xff]  ;;  %5375 = vmatpush3.msra.mxu0 %v7812_v13 }
 0x374   :  { %5343 = vmatprep.subr.mxu1 %v10272_v2  ;;  %5376 = vmatprep.subr.mxu0 %v10272_v2 }
 0x375   :  { %5344 = vmatpush3.msra.mxu1 %v7252_v59  ;;  %v10421_v59 = vld [vmem:[#allocation34_spill] sm:$0xff]  ;;  %5377 = vmatpush3.msra.mxu0 %v7819_v48 }
 0x376   :  { %5345 = vmatprep.subr.mxu1 %v10272_v2  ;;  %5378 = vmatprep.subr.mxu0 %v10272_v2 }
 0x377   :  { %5346 = vmatpush3.msra.mxu1 %v7261_v60  ;;  %v10422_v60 = vld [vmem:[#allocation35_spill] sm:$0xff]  ;;  %5379 = vmatpush3.msra.mxu0 %v7826_v25 }
 0x378   :  { %5347 = vmatprep.subr.mxu1 %v10272_v2  ;;  %5380 = vmatprep.subr.mxu0 %v10272_v2 }
 0x379   :  { %5348 = vmatpush3.msra.mxu1 %v7270_v63  ;;  %v10423_v63 = vld [vmem:[#allocation37_spill] sm:$0xff] }
 0x37a   :  { %5349 = vmatprep.subr.mxu1 %v10272_v2 }
 0x37b   :  { %5350 = vmatpush3.msra.mxu1 %v7279_v6  ;;  %v10424_v6 = vld [vmem:[#allocation38_spill] sm:$0xff] }
 0x37c   :  { %5351 = vmatprep.subr.mxu1 %v10272_v2 }
 0x37d   :  { %5352 = vmatpush3.msra.mxu1 %v7288_v8  ;;  %v10425_v8 = vld [vmem:[#allocation40_spill] sm:$0xff] }
 0x37e   :  { %5353 = vmatprep.subr.mxu1 %v10272_v2 }
 0x37f   :  { %5354 = vmatpush3.msra.mxu1 %v7297_v3  ;;  %v10426_v3 = vld [vmem:[#allocation41_spill] sm:$0xff] }
 0x380   :  { %5355 = vmatprep.subr.mxu1 %v10272_v2 }
 0x381   :  { %5356 = vmatpush3.msra.mxu1 %v10398_v24  ;;  %v7840_v24 = vld [vmem:[%s10059_s1 + $0x318] sm:$0xff] }
 0x382   :  { %5357 = vmatprep.subr.mxu1 %v10272_v2 }
 0x383   :  { %5358 = vmatpush3.msra.mxu1 %v10399_v26  ;;  %v7847_v26 = vld [vmem:[%s10059_s1 + $0x2c8] sm:$0xff] }
 0x384   :  { %5359 = vmatprep.subr.mxu1 %v10272_v2 }
 0x385   :  { %5360 = vmatpush3.msra.mxu1 %v10400_v27  ;;  %v7854_v27 = vld [vmem:[%s10059_s1 + $0x278] sm:$0xff] }
 0x386   :  { %5361 = vmatprep.subr.mxu1 %v10272_v2 }
 0x387   :  { %5362 = vmatpush3.msra.mxu1 %v10401_v30  ;;  %v7861_v30 = vld [vmem:[%s10059_s1 + $0x228] sm:$0xff] }
 0x388   :  { %5363 = vmatprep.subr.mxu1 %v10272_v2 }
 0x389   :  { %5364 = vmatpush3.msra.mxu1 %v10402_v31  ;;  %v7868_v31 = vld [vmem:[%s10059_s1 + $0x1d8] sm:$0xff] }
 0x38a   :  { %5365 = vmatprep.subr.mxu1 %v10272_v2 }
 0x38b   :  { %5366 = vmatpush3.msra.mxu1 %v10403_v33  ;;  %v7875_v33 = vld [vmem:[%s10059_s1 + $0x188] sm:$0xff] }
 0x38c   :  { %5368 = vmatmul.mubr.f32.vlgmr.msra.gmra.mxu1 %v7573_v56  ;;  %1991 = vmatprep.subr.mxu1 %v10404_v34  ;;  %v7833_v56 = vld [vmem:[%s10059_s1 + $0x368] sm:$0xff]  ;;  %v7882_v34 = vld [vmem:[%s10059_s1 + $0x138] sm:$0xff] }
 0x38d   :  { %1992 = vmatpush1.msra.mxu1 %v10405_v36  ;;  %2055 = vmatprep.mubr.f32.mxu1 %v10272_v2  ;;  %v7889_v36 = vld [vmem:[%s10059_s1 + $0xe8] sm:$0xff] }
 0x38e   :  { %1993 = vmatprep.subr.mxu1 %v10406_v37  ;;  %5381 = vmatpush3.msra.mxu0 %v7833_v56  ;;  %v7895_v37 = vld [vmem:[%s10059_s1 + $0x98] sm:$0xff] }
 0x38f   :  { %1994 = vmatpush1.msra.mxu1 %v10407_v40  ;;  %5382 = vmatprep.subr.mxu0 %v10272_v2  ;;  %v7900_v40 = vld [vmem:[%s10059_s1 + $0x4b8] sm:$0xff] }
 0x390   :  { %1995 = vmatprep.subr.mxu1 %v10408_v41  ;;  %5383 = vmatpush3.msra.mxu0 %v7840_v24  ;;  %v7906_v41 = vld [vmem:[%s10059_s1 + $0x48] sm:$0xff] }
 0x391   :  { %1996 = vmatpush1.msra.mxu1 %v10409_v43  ;;  %5384 = vmatprep.subr.mxu0 %v10272_v2 }
 0x392   :  { %1997 = vmatprep.subr.mxu1 %v10410_v44  ;;  %5385 = vmatpush3.msra.mxu0 %v7847_v26 }
 0x393   :  { %1998 = vmatpush1.msra.mxu1 %v10411_v46  ;;  %5386 = vmatprep.subr.mxu0 %v10272_v2 }
 0x394   :  { %1999 = vmatprep.subr.mxu1 %v10412_v47  ;;  %5387 = vmatpush3.msra.mxu0 %v7854_v27 }
 0x395   :  { %2000 = vmatpush1.msra.mxu1 %v10413_v49  ;;  %5388 = vmatprep.subr.mxu0 %v10272_v2 }
 0x396   :  { %2001 = vmatprep.subr.mxu1 %v10414_v55  ;;  %5389 = vmatpush3.msra.mxu0 %v7861_v30 }
 0x397   :  { %2002 = vmatpush1.msra.mxu1 %v10415_v14  ;;  %5390 = vmatprep.subr.mxu0 %v10272_v2 }
 0x398   :  { %2003 = vmatprep.subr.mxu1 %v10416_v22  ;;  %5391 = vmatpush3.msra.mxu0 %v7868_v31 }
 0x399   :  { %2004 = vmatpush1.msra.mxu1 %v10417_v28  ;;  %5392 = vmatprep.subr.mxu0 %v10272_v2 }
 0x39a   :  { %2005 = vmatprep.subr.mxu1 %v10418_v32  ;;  %5393 = vmatpush3.msra.mxu0 %v7875_v33  ;;  %v10436_v32 = vld [vmem:[#allocation62_spill] sm:$0xff] }
 0x39b   :  { %2006 = vmatpush1.msra.mxu1 %v10419_v35  ;;  %5394 = vmatprep.subr.mxu0 %v10272_v2 }
 0x39c   :  { %2007 = vmatprep.subr.mxu1 %v10420_v39  ;;  %5395 = vmatpush3.msra.mxu0 %v7882_v34 }
 0x39d   :  { %2008 = vmatpush1.msra.mxu1 %v10421_v59  ;;  %5396 = vmatprep.subr.mxu0 %v10272_v2 }
 0x39e   :  { %2009 = vmatprep.subr.mxu1 %v10422_v60  ;;  %5397 = vmatpush3.msra.mxu0 %v7889_v36 }
 0x39f   :  { %2010 = vmatpush1.msra.mxu1 %v10423_v63  ;;  %5398 = vmatprep.subr.mxu0 %v10272_v2 }
 0x3a0   :  { %2011 = vmatprep.subr.mxu1 %v10424_v6  ;;  %5399 = vmatpush3.msra.mxu0 %v7895_v37 }
 0x3a1   :  { %2012 = vmatpush1.msra.mxu1 %v10425_v8  ;;  %5400 = vmatprep.subr.mxu0 %v10272_v2  ;;  %v10437_v8 = vld [vmem:[#allocation64_spill] sm:$0xff] }
 0x3a2   :  { %2013 = vmatprep.subr.mxu1 %v10426_v3  ;;  %5401 = vmatpush3.msra.mxu0 %v7906_v41 }
 0x3a3   :  { %2014 = vmatpush1.msra.mxu1 %v10427_v16  ;;  %5405 = vmatprep.subr.mxu0 %v10272_v2 }
 0x3a4   :  { %2015 = vmatprep.subr.mxu1 %v10428_v0 }
 0x3a5   :  { %2016 = vmatpush1.msra.mxu1 %v10429_v29 }
 0x3a6   :  { %2017 = vmatprep.subr.mxu1 %v10430_v9 }
 0x3a7   :  { %2018 = vmatpush1.msra.mxu1 %v10431_v62 }
 0x3a8   :  { %2019 = vmatprep.subr.mxu1 %v10432_v45 }
 0x3a9   :  { %2020 = vmatpush1.msra.mxu1 %v10433_v7 }
 0x3aa   :  { %2021 = vmatprep.subr.mxu1 %v10434_v42 }
 0x3ab   :  { %2022 = vmatpush1.msra.mxu1 %v10435_v4 }
 0x3ac   :  { %2184 = vmatprep.subr.mxu1 %v7900_v40 }
 0x40a   :  { %v1422_v43 = vpop.f32.mrf.mxu1  ;;  %v1541_v46 = vpop.f32.mrf.mxu0 }
 0x40b   :  { %1426 = vst.msk [vmem:[#allocation2 + $0x2] sm:$0x3] %vm909_vm3, %v1422_v43  ;;  %v1668_v14 = vrot.slane %v1541_v46, 2 }
 0x40c   :  { %v5299_v44 = vpop.f32.mrf.mxu1  ;;  %v1543_v47 = vpop.f32.mrf.mxu0 }
 0x40d   :  { %v1674_v35 = vadd.f32 %v1668_v14, %v10436_v32  ;;  %v1669_v63 = vrot.slane %v1543_v47, 2  ;;  %v1849_v32 = vrot.slane %v7570_v5, 6  ;;  %v7936_v5 = vld [vmem:[%s10059_s1 + $0x460] sm:$0xff] }
 0x40f   :  { %v1675_v3 = vadd.f32 %v1669_v63, %v10437_v8  ;;  %v7943_v63 = vld [vmem:[%s10059_s1 + $0x418] sm:$0xff]  ;;  %v7964_v8 = vld [vmem:[%s10059_s1 + $0x3c0] sm:$0xff] }
 0x42b   :  { %v1612_v49 = vpop.f32.mrf.mxu1  ;;  %v1743_v55 = vpop.f32.mrf.mxu0 }
 0x42c   :  { %v1820_v28 = vrot.slane %v1743_v55, 2  ;;  %v1670_v45 = vrot.slane %v1612_v49, 2 }
 0x42d   :  { %v5334_v22 = vpop.f32.mrf.mxu1  ;;  %v1745_v60 = vpop.f32.mrf.mxu0 }
 0x42e   :  { %v1824_v39 = vadd.f32 %v1820_v28, %v1674_v35  ;;  %v1821_v6 = vrot.slane %v1745_v60, 2  ;;  %v1676_v44 = vadd.f32 %v1670_v45, %v6752_v11  ;;  %v7929_v11 = vld [vmem:[%s10059_s1 + $0x468] sm:$0xff]  ;;  %v8062_v45 = vld [vmem:[%s10059_s1 + $0x190] sm:$0xff] }
 0x430   :  { %v1826_v59 = vmul.f32 0.5, %v1824_v39  ;;  %v1825_v16 = vadd.f32 %v1821_v6, %v1675_v3  ;;  %v7950_v6 = vld [vmem:[%s10059_s1 + $0x410] sm:$0xff] }
 0x431   :  { %v7978_v3 = vld [vmem:[%s10059_s1 + $0x370] sm:$0xff] }
 0x432   :  { %5967 = vtanh.f32 %v1826_v59  ;;  %v1827_v0 = vmul.f32 0.5, %v1825_v16  ;;  %v7992_v16 = vld [vmem:[%s10059_s1 + $0x320] sm:$0xff] }
 0x434   :  { %5969 = vtanh.f32 %v1827_v0  ;;  %v8006_v0 = vld [vmem:[%s10059_s1 + $0x2d0] sm:$0xff] }
 0x43f   :  { %v5968_v29 = vpop.eup %5967 }
 0x440   :  { %v1830_v9 = vmul.f32 0.5, %v5968_v29  ;;  %v8020_v29 = vld [vmem:[%s10059_s1 + $0x280] sm:$0xff] }
 0x441   :  { %v5970_v55 = vpop.eup %5969 }
 0x442   :  { %v1832_v4 = vadd.f32 0.5, %v1830_v9  ;;  %v1831_v14 = vmul.f32 0.5, %v5970_v55  ;;  %v8034_v9 = vld [vmem:[%s10059_s1 + $0x230] sm:$0xff]  ;;  %v8327_v55 = vld [vmem:[%s10059_s1 + $0x428] sm:$0xff] }
 0x443   :  { %10447 = vst [vmem:[#allocation36_spill] sm:$0xff] %v8327_v55 }
 0x444   :  { %v1833_v22 = vadd.f32 0.5, %v1831_v14  ;;  %v8333_v14 = vld [vmem:[%s10059_s1 + $0x3e0] sm:$0xff] }
 0x445   :  { %10448 = vst [vmem:[#allocation39_spill] sm:$0xff] %v8333_v14 }
 0x446   :  { %v1847_v28 = vsub.f32 1.0, %v1833_v22  ;;  %v1851_v39 = vmul.f32 %v1849_v32, %v1833_v22  ;;  %v8339_v22 = vld [vmem:[%s10059_s1 + $0x3d8] sm:$0xff]  ;;  %v8353_v32 = vld [vmem:[%s10059_s1 + $0x388] sm:$0xff] }
 0x447   :  { %10449 = vst [vmem:[#allocation42_spill] sm:$0xff] %v8339_v22  ;;  %10451 = vst [vmem:[#allocation48_spill] sm:$0xff] %v8353_v32 }
 0x44c   :  { %v1814_v62 = vpop.f32.mrf.mxu1 }
 0x44d   :  { %v1840_v7 = vadd.f32 %v7565_v50, %v1814_v62  ;;  %v7924_v50 = vld [vmem:[%s10059_s1 + $0x4b0] sm:$0xff]  ;;  %v8048_v62 = vld [vmem:[%s10059_s1 + $0x1e0] sm:$0xff] }
 0x44e   :  { %v5369_v42 = vpop.f32.mrf.mxu1 }
 0x44f   :  { %v1842_v43 = vrot.slane %v1840_v7, 2  ;;  %v8076_v7 = vld [vmem:[%s10059_s1 + $0x140] sm:$0xff]  ;;  %v8090_v42 = vld [vmem:[%s10059_s1 + $0xf0] sm:$0xff] }
 0x451   :  { %v1844_v46 = vmul.f32 %v1842_v43, %v1832_v4  ;;  %v8104_v4 = vld [vmem:[%s10059_s1 + $0xa0] sm:$0xff]  ;;  %v8118_v43 = vld [vmem:[%s10059_s1 + $0x50] sm:$0xff] }
 0x453   :  { %v1845_v47 = vadd.f32 %v1844_v46, %v1676_v44  ;;  %v8134_v44 = vld [vmem:[%s10059_s1] sm:$0xff]  ;;  %v8173_v46 = vld [vmem:[%s10059_s1 + $0x3d0] sm:$0xff] }
 0x455   :  { %5971 = vtanh.f32 %v1845_v47  ;;  %v8321_v47 = vld [vmem:[%s10059_s1 + $0x430] sm:$0xff] }
 0x456   :  { %10446 = vst [vmem:[#allocation33_spill] sm:$0xff] %v8321_v47 }
 0x462   :  { %v5972_v35 = vpop.eup %5971 }
 0x463   :  { %v1848_v59 = vmul.f32 %v5972_v35, %v1847_v28  ;;  %v8347_v28 = vld [vmem:[%s10059_s1 + $0x390] sm:$0xff]  ;;  %v8359_v35 = vld [vmem:[%s10059_s1 + $0x340] sm:$0xff] }
 0x464   :  { %10450 = vst [vmem:[#allocation45_spill] sm:$0xff] %v8347_v28  ;;  %10452 = vst [vmem:[#allocation51_spill] sm:$0xff] %v8359_v35 }
 0x465   :  { %v1852_v49 = vadd.f32 %v1851_v39, %v1848_v59  ;;  %v8365_v39 = vld [vmem:[%s10059_s1 + $0x338] sm:$0xff]  ;;  %v8371_v59 = vld [vmem:[%s10059_s1 + $0x2f0] sm:$0xff] }
 0x466   :  { %10453 = vst [vmem:[#allocation54_spill] sm:$0xff] %v8365_v39  ;;  %10454 = vst [vmem:[#allocation57_spill] sm:$0xff] %v8371_v59 }
 0x467   :  { %v7919_v60 = vrot.slane %v1852_v49, 6  ;;  %v8377_v49 = vld [vmem:[%s10059_s1 + $0x2e8] sm:$0xff] }
 0x468   :  { %10455 = vst [vmem:[#allocation7_spill] sm:$0xff] %v8377_v49 }
 0x469   :  { %5403 = vmatmul.mubr.f32.vlgmr.msra.gmra.mxu0 %v7919_v60  ;;  %2056 = vmatmul.mubr.f32.vlgmr.msra.gmra.mxu1 %v7919_v60 }
 0x46a   :  { %5406 = vmatpush3.msra.mxu0 %v7578_v10  ;;  %2185 = vmatpush1.msra.mxu1 %v7924_v50  ;;  %v7957_v10 = vld [vmem:[%s10059_s1 + $0x3c8] sm:$0xff] }
 0x46b   :  { %5407 = vmatprep.subr.mxu0 %v10272_v2  ;;  %2186 = vmatprep.subr.mxu1 %v7929_v11 }
 0x46c   :  { %5408 = vmatpush3.msra.mxu0 %v7585_v52  ;;  %2187 = vmatpush1.msra.mxu1 %v7936_v5  ;;  %v7971_v52 = vld [vmem:[%s10059_s1 + $0x378] sm:$0xff] }
 0x46d   :  { %5409 = vmatprep.subr.mxu0 %v10272_v2  ;;  %2188 = vmatprep.subr.mxu1 %v7943_v63 }
 0x46e   :  { %5410 = vmatpush3.msra.mxu0 %v7594_v53  ;;  %2189 = vmatpush1.msra.mxu1 %v7950_v6  ;;  %v7985_v53 = vld [vmem:[%s10059_s1 + $0x328] sm:$0xff] }
 0x46f   :  { %5411 = vmatprep.subr.mxu0 %v10272_v2  ;;  %2190 = vmatprep.subr.mxu1 %v7957_v10 }
 0x470   :  { %5412 = vmatpush3.msra.mxu0 %v7603_v1  ;;  %2191 = vmatpush1.msra.mxu1 %v7964_v8  ;;  %v7999_v1 = vld [vmem:[%s10059_s1 + $0x2d8] sm:$0xff] }
 0x471   :  { %5413 = vmatprep.subr.mxu0 %v10272_v2  ;;  %2192 = vmatprep.subr.mxu1 %v7971_v52 }
 0x472   :  { %5414 = vmatpush3.msra.mxu0 %v7612_v51  ;;  %2193 = vmatpush1.msra.mxu1 %v7978_v3  ;;  %v8013_v51 = vld [vmem:[%s10059_s1 + $0x288] sm:$0xff] }
 0x473   :  { %5415 = vmatprep.subr.mxu0 %v10272_v2  ;;  %2194 = vmatprep.subr.mxu1 %v7985_v53 }
 0x474   :  { %5416 = vmatpush3.msra.mxu0 %v7621_v54  ;;  %2195 = vmatpush1.msra.mxu1 %v7992_v16  ;;  %v8027_v54 = vld [vmem:[%s10059_s1 + $0x238] sm:$0xff] }
 0x475   :  { %5417 = vmatprep.subr.mxu0 %v10272_v2  ;;  %2196 = vmatprep.subr.mxu1 %v7999_v1 }
 0x476   :  { %5418 = vmatpush3.msra.mxu0 %v7630_v19  ;;  %2197 = vmatpush1.msra.mxu1 %v8006_v0  ;;  %v8041_v19 = vld [vmem:[%s10059_s1 + $0x1e8] sm:$0xff] }
 0x477   :  { %5419 = vmatprep.subr.mxu0 %v10272_v2  ;;  %2198 = vmatprep.subr.mxu1 %v8013_v51 }
 0x478   :  { %5420 = vmatpush3.msra.mxu0 %v7639_v57  ;;  %2199 = vmatpush1.msra.mxu1 %v8020_v29  ;;  %v8055_v57 = vld [vmem:[%s10059_s1 + $0x198] sm:$0xff] }
 0x479   :  { %5421 = vmatprep.subr.mxu0 %v10272_v2  ;;  %2200 = vmatprep.subr.mxu1 %v8027_v54 }
 0x47a   :  { %5422 = vmatpush3.msra.mxu0 %v7648_v58  ;;  %2201 = vmatpush1.msra.mxu1 %v8034_v9  ;;  %v8069_v58 = vld [vmem:[%s10059_s1 + $0x148] sm:$0xff] }
 0x47b   :  { %5423 = vmatprep.subr.mxu0 %v10272_v2  ;;  %2202 = vmatprep.subr.mxu1 %v8041_v19 }
 0x47c   :  { %5424 = vmatpush3.msra.mxu0 %v7657_v61  ;;  %2203 = vmatpush1.msra.mxu1 %v8048_v62  ;;  %v8083_v61 = vld [vmem:[%s10059_s1 + $0xf8] sm:$0xff] }
 0x47d   :  { %5425 = vmatprep.subr.mxu0 %v10272_v2  ;;  %2204 = vmatprep.subr.mxu1 %v8055_v57 }
 0x47e   :  { %5426 = vmatpush3.msra.mxu0 %v7666_v12  ;;  %2205 = vmatpush1.msra.mxu1 %v8062_v45  ;;  %v8097_v12 = vld [vmem:[%s10059_s1 + $0xa8] sm:$0xff] }
 0x47f   :  { %5427 = vmatprep.subr.mxu0 %v10272_v2  ;;  %2206 = vmatprep.subr.mxu1 %v8069_v58 }
 0x480   :  { %5428 = vmatpush3.msra.mxu0 %v7675_v15  ;;  %2207 = vmatpush1.msra.mxu1 %v8076_v7  ;;  %v8111_v15 = vld [vmem:[%s10059_s1 + $0x58] sm:$0xff] }
 0x481   :  { %5429 = vmatprep.subr.mxu0 %v10272_v2  ;;  %2208 = vmatprep.subr.mxu1 %v8083_v61 }
 0x482   :  { %5430 = vmatpush3.msra.mxu0 %v7684_v17  ;;  %2209 = vmatpush1.msra.mxu1 %v8090_v42  ;;  %v8125_v17 = vld [vmem:[%s10059_s1 + $0x8] sm:$0xff] }
 0x483   :  { %5431 = vmatprep.subr.mxu0 %v10272_v2  ;;  %2210 = vmatprep.subr.mxu1 %v8097_v12 }
 0x484   :  { %5432 = vmatpush3.msra.mxu0 %v7693_v20  ;;  %2211 = vmatpush1.msra.mxu1 %v8104_v4  ;;  %v8146_v20 = vld [vmem:[%s10059_s1 + $0x4c0] sm:$0xff] }
 0x485   :  { %5433 = vmatprep.subr.mxu0 %v10272_v2  ;;  %2212 = vmatprep.subr.mxu1 %v8111_v15 }
 0x486   :  { %5434 = vmatpush3.msra.mxu0 %v7702_v21  ;;  %2213 = vmatpush1.msra.mxu1 %v8118_v43  ;;  %v8154_v21 = vld [vmem:[%s10059_s1 + $0x470] sm:$0xff] }
 0x487   :  { %5435 = vmatprep.subr.mxu0 %v10272_v2  ;;  %2214 = vmatprep.subr.mxu1 %v8125_v17 }
 0x488   :  { %5436 = vmatpush3.msra.mxu0 %v7711_v23  ;;  %5437 = vmatprep.mubr.msk.f32.mxu0 %vm6004_vm0, %v10272_v2  ;;  %v8164_v23 = vld [vmem:[%s10059_s1 + $0x420] sm:$0xff] }
 0x489   :  { %2215 = vmatpush1.msra.mxu1 %v8134_v44  ;;  %2248 = vmatprep.mubr.f32.mxu1 %v10272_v2 }
 0x48a   :  { %5438 = vmatmul.mubr.f32.vlgmr.msra.gmra.mxu0 %v7919_v60  ;;  %2249 = vmatmul.mubr.f32.vlgmr.msra.gmra.mxu1 %v7919_v60 }
 0x48b   :  { %5440 = vmatprep.subr.mxu0 %v10272_v2  ;;  %5472 = vmatprep.mubr.msk.f32.mxu0 %vm6004_vm0, %v10272_v2 }
 0x48c   :  { %5441 = vmatpush3.msra.mxu0 %v8146_v20  ;;  %5475 = vmatprep.subr.mxu1 %v10272_v2 }
 0x48d   :  { %5442 = vmatprep.subr.mxu0 %v10272_v2  ;;  %5476 = vmatpush3.msra.mxu1 %v7798_v38  ;;  %v8182_v38 = vld [vmem:[%s10059_s1 + $0x380] sm:$0xff] }
 0x48e   :  { %5443 = vmatpush3.msra.mxu0 %v8154_v21  ;;  %5477 = vmatprep.subr.mxu1 %v10272_v2 }
 0x48f   :  { %5444 = vmatprep.subr.mxu0 %v10272_v2  ;;  %5478 = vmatpush3.msra.mxu1 %v7803_v18  ;;  %v8191_v18 = vld [vmem:[%s10059_s1 + $0x330] sm:$0xff] }
 0x490   :  { %5445 = vmatpush3.msra.mxu0 %v8164_v23  ;;  %5479 = vmatprep.subr.mxu1 %v10272_v2 }
 0x491   :  { %5446 = vmatprep.subr.mxu0 %v10272_v2  ;;  %5480 = vmatpush3.msra.mxu1 %v7812_v13  ;;  %v8200_v13 = vld [vmem:[%s10059_s1 + $0x2e0] sm:$0xff] }
 0x492   :  { %5447 = vmatpush3.msra.mxu0 %v8173_v46  ;;  %5481 = vmatprep.subr.mxu1 %v10272_v2 }
 0x493   :  { %5448 = vmatprep.subr.mxu0 %v10272_v2  ;;  %5482 = vmatpush3.msra.mxu1 %v7819_v48  ;;  %v8209_v48 = vld [vmem:[%s10059_s1 + $0x290] sm:$0xff] }
 0x494   :  { %5449 = vmatpush3.msra.mxu0 %v8182_v38  ;;  %5483 = vmatprep.subr.mxu1 %v10272_v2 }
 0x495   :  { %5450 = vmatprep.subr.mxu0 %v10272_v2  ;;  %5484 = vmatpush3.msra.mxu1 %v7826_v25  ;;  %v8218_v25 = vld [vmem:[%s10059_s1 + $0x240] sm:$0xff] }
 0x496   :  { %5451 = vmatpush3.msra.mxu0 %v8191_v18  ;;  %5485 = vmatprep.subr.mxu1 %v10272_v2 }
 0x497   :  { %5452 = vmatprep.subr.mxu0 %v10272_v2  ;;  %5486 = vmatpush3.msra.mxu1 %v7833_v56  ;;  %v8227_v56 = vld [vmem:[%s10059_s1 + $0x1f0] sm:$0xff] }
 0x498   :  { %5453 = vmatpush3.msra.mxu0 %v8200_v13  ;;  %5487 = vmatprep.subr.mxu1 %v10272_v2 }
 0x499   :  { %5454 = vmatprep.subr.mxu0 %v10272_v2  ;;  %5488 = vmatpush3.msra.mxu1 %v7840_v24  ;;  %v8236_v24 = vld [vmem:[%s10059_s1 + $0x1a0] sm:$0xff] }
 0x49a   :  { %5455 = vmatpush3.msra.mxu0 %v8209_v48  ;;  %5489 = vmatprep.subr.mxu1 %v10272_v2 }
 0x49b   :  { %5456 = vmatprep.subr.mxu0 %v10272_v2  ;;  %5490 = vmatpush3.msra.mxu1 %v7847_v26  ;;  %v8245_v26 = vld [vmem:[%s10059_s1 + $0x150] sm:$0xff] }
 0x49c   :  { %5457 = vmatpush3.msra.mxu0 %v8218_v25  ;;  %5491 = vmatprep.subr.mxu1 %v10272_v2 }
 0x49d   :  { %5458 = vmatprep.subr.mxu0 %v10272_v2  ;;  %5492 = vmatpush3.msra.mxu1 %v7854_v27  ;;  %v8254_v27 = vld [vmem:[%s10059_s1 + $0x100] sm:$0xff] }
 0x49e   :  { %5459 = vmatpush3.msra.mxu0 %v8227_v56  ;;  %5493 = vmatprep.subr.mxu1 %v10272_v2  ;;  %10438 = vst [vmem:[#allocation56_spill] sm:$0xff] %v8254_v27 }
 0x49f   :  { %5460 = vmatprep.subr.mxu0 %v10272_v2  ;;  %5494 = vmatpush3.msra.mxu1 %v7861_v30  ;;  %v8263_v30 = vld [vmem:[%s10059_s1 + $0xb0] sm:$0xff] }
 0x4a0   :  { %5461 = vmatpush3.msra.mxu0 %v8236_v24  ;;  %5495 = vmatprep.subr.mxu1 %v10272_v2  ;;  %10439 = vst [vmem:[#allocation12_spill] sm:$0xff] %v8263_v30 }
 0x4a1   :  { %5462 = vmatprep.subr.mxu0 %v10272_v2  ;;  %5496 = vmatpush3.msra.mxu1 %v7868_v31  ;;  %v8272_v31 = vld [vmem:[%s10059_s1 + $0x60] sm:$0xff] }
 0x4a2   :  { %5463 = vmatpush3.msra.mxu0 %v8245_v26  ;;  %5497 = vmatprep.subr.mxu1 %v10272_v2  ;;  %10440 = vst [vmem:[#allocation15_spill] sm:$0xff] %v8272_v31 }
 0x4a3   :  { %5464 = vmatprep.subr.mxu0 %v10272_v2  ;;  %5498 = vmatpush3.msra.mxu1 %v7875_v33  ;;  %v8281_v33 = vld [vmem:[%s10059_s1 + $0x10] sm:$0xff] }
 0x4a4   :  { %5465 = vmatpush3.msra.mxu0 %v8254_v27  ;;  %5499 = vmatprep.subr.mxu1 %v10272_v2  ;;  %10441 = vst [vmem:[#allocation18_spill] sm:$0xff] %v8281_v33 }
 0x4a5   :  { %5466 = vmatprep.subr.mxu0 %v10272_v2  ;;  %5500 = vmatpush3.msra.mxu1 %v7882_v34  ;;  %v8299_v34 = vld [vmem:[%s10059_s1 + $0x4d0] sm:$0xff] }
 0x4a6   :  { %5467 = vmatpush3.msra.mxu0 %v8263_v30  ;;  %5501 = vmatprep.subr.mxu1 %v10272_v2  ;;  %10442 = vst [vmem:[#allocation21_spill] sm:$0xff] %v8299_v34 }
 0x4a7   :  { %5468 = vmatprep.subr.mxu0 %v10272_v2  ;;  %5502 = vmatpush3.msra.mxu1 %v7889_v36  ;;  %v8305_v36 = vld [vmem:[%s10059_s1 + $0x4c8] sm:$0xff] }
 0x4a8   :  { %5469 = vmatpush3.msra.mxu0 %v8272_v31  ;;  %5503 = vmatprep.subr.mxu1 %v10272_v2  ;;  %10443 = vst [vmem:[#allocation24_spill] sm:$0xff] %v8305_v36 }
 0x4a9   :  { %5470 = vmatprep.subr.mxu0 %v10272_v2  ;;  %5504 = vmatpush3.msra.mxu1 %v7895_v37  ;;  %v8310_v37 = vld [vmem:[%s10059_s1 + $0x480] sm:$0xff] }
 0x4aa   :  { %5471 = vmatpush3.msra.mxu0 %v8281_v33  ;;  %5505 = vmatprep.subr.mxu1 %v10272_v2  ;;  %10444 = vst [vmem:[#allocation27_spill] sm:$0xff] %v8310_v37 }
 0x4ab   :  { %5473 = vmatmul.mubr.f32.vlgmr.msra.gmra.mxu0 %v7919_v60  ;;  %5506 = vmatpush3.msra.mxu1 %v7906_v41  ;;  %v8315_v41 = vld [vmem:[%s10059_s1 + $0x478] sm:$0xff] }
 0x4ac   :  { %5507 = vmatprep.mubr.msk.f32.mxu1 %vm6004_vm0, %v10272_v2  ;;  %2548 = vmatprep.mubr.f32.mxu0 %v10272_v2  ;;  %10445 = vst [vmem:[#allocation30_spill] sm:$0xff] %v8315_v41 }
 0x4ad   :  { %5510 = vmatprep.subr.mxu1 %v10272_v2  ;;  %2484 = vmatprep.subr.mxu0 %v8299_v34 }
 0x4ae   :  { %2485 = vmatpush1.msra.mxu0 %v8305_v36 }
 0x4af   :  { %2486 = vmatprep.subr.mxu0 %v8310_v37 }
 0x4b0   :  { %2487 = vmatpush1.msra.mxu0 %v8315_v41 }
 0x4b1   :  { %2488 = vmatprep.subr.mxu0 %v8321_v47  ;;  %v10474_v47 = vld [vmem:[#allocation58_spill] sm:$0xff] }
 0x4b2   :  { %2489 = vmatpush1.msra.mxu0 %v8327_v55 }
 0x4b3   :  { %2490 = vmatprep.subr.mxu0 %v8333_v14 }
 0x4b4   :  { %2491 = vmatpush1.msra.mxu0 %v8339_v22 }
 0x4b5   :  { %2492 = vmatprep.subr.mxu0 %v8347_v28 }
 0x4b6   :  { %2493 = vmatpush1.msra.mxu0 %v8353_v32 }
 0x4b7   :  { %2494 = vmatprep.subr.mxu0 %v8359_v35  ;;  %v8383_v35 = vld [vmem:[%s10059_s1 + $0x2a0] sm:$0xff] }
 0x4b8   :  { %2495 = vmatpush1.msra.mxu0 %v8365_v39  ;;  %10456 = vst [vmem:[#allocation3_spill] sm:$0xff] %v8383_v35  ;;  %v8389_v39 = vld [vmem:[%s10059_s1 + $0x298] sm:$0xff] }
 0x4b9   :  { %2496 = vmatprep.subr.mxu0 %v8371_v59  ;;  %10457 = vst [vmem:[#allocation4_spill] sm:$0xff] %v8389_v39  ;;  %v8395_v59 = vld [vmem:[%s10059_s1 + $0x250] sm:$0xff] }
 0x4ba   :  { %2497 = vmatpush1.msra.mxu0 %v8377_v49  ;;  %10458 = vst [vmem:[#allocation8_spill] sm:$0xff] %v8395_v59  ;;  %v8401_v49 = vld [vmem:[%s10059_s1 + $0x248] sm:$0xff] }
 0x4bb   :  { %2498 = vmatprep.subr.mxu0 %v8383_v35  ;;  %10459 = vst [vmem:[#allocation5_spill] sm:$0xff] %v8401_v49  ;;  %v8407_v35 = vld [vmem:[%s10059_s1 + $0x200] sm:$0xff] }
 0x4bc   :  { %2499 = vmatpush1.msra.mxu0 %v8389_v39  ;;  %10460 = vst [vmem:[#allocation6_spill] sm:$0xff] %v8407_v35  ;;  %v8413_v39 = vld [vmem:[%s10059_s1 + $0x1f8] sm:$0xff] }
 0x4bd   :  { %2500 = vmatprep.subr.mxu0 %v8395_v59  ;;  %10461 = vst [vmem:[#allocation9_spill] sm:$0xff] %v8413_v39  ;;  %v8419_v59 = vld [vmem:[%s10059_s1 + $0x1b0] sm:$0xff] }
 0x4be   :  { %2501 = vmatpush1.msra.mxu0 %v8401_v49  ;;  %10462 = vst [vmem:[#allocation10_spill] sm:$0xff] %v8419_v59  ;;  %v8425_v49 = vld [vmem:[%s10059_s1 + $0x1a8] sm:$0xff] }
 0x4bf   :  { %2502 = vmatprep.subr.mxu0 %v8407_v35  ;;  %10463 = vst [vmem:[#allocation11_spill] sm:$0xff] %v8425_v49  ;;  %v8431_v35 = vld [vmem:[%s10059_s1 + $0x160] sm:$0xff] }
 0x4c0   :  { %2503 = vmatpush1.msra.mxu0 %v8413_v39  ;;  %10464 = vst [vmem:[#allocation13_spill] sm:$0xff] %v8431_v35  ;;  %v8437_v39 = vld [vmem:[%s10059_s1 + $0x158] sm:$0xff] }
 0x4c1   :  { %2504 = vmatprep.subr.mxu0 %v8419_v59  ;;  %10465 = vst [vmem:[#allocation14_spill] sm:$0xff] %v8437_v39  ;;  %v8443_v59 = vld [vmem:[%s10059_s1 + $0x110] sm:$0xff] }
 0x4c2   :  { %2505 = vmatpush1.msra.mxu0 %v8425_v49  ;;  %10466 = vst [vmem:[#allocation16_spill] sm:$0xff] %v8443_v59  ;;  %v8449_v49 = vld [vmem:[%s10059_s1 + $0x108] sm:$0xff] }
 0x4c3   :  { %2506 = vmatprep.subr.mxu0 %v8431_v35  ;;  %10467 = vst [vmem:[#allocation17_spill] sm:$0xff] %v8449_v49  ;;  %v8455_v35 = vld [vmem:[%s10059_s1 + $0xc0] sm:$0xff] }
 0x4c4   :  { %2507 = vmatpush1.msra.mxu0 %v8437_v39  ;;  %10468 = vst [vmem:[#allocation19_spill] sm:$0xff] %v8455_v35  ;;  %v8461_v39 = vld [vmem:[%s10059_s1 + $0xb8] sm:$0xff] }
 0x4c5   :  { %2508 = vmatprep.subr.mxu0 %v8443_v59  ;;  %10469 = vst [vmem:[#allocation20_spill] sm:$0xff] %v8461_v39  ;;  %v8467_v59 = vld [vmem:[%s10059_s1 + $0x70] sm:$0xff] }
 0x4c6   :  { %2509 = vmatpush1.msra.mxu0 %v8449_v49  ;;  %10470 = vst [vmem:[#allocation22_spill] sm:$0xff] %v8467_v59  ;;  %v8473_v49 = vld [vmem:[%s10059_s1 + $0x68] sm:$0xff] }
 0x4c7   :  { %2510 = vmatprep.subr.mxu0 %v8455_v35  ;;  %10471 = vst [vmem:[#allocation23_spill] sm:$0xff] %v8473_v49  ;;  %v8479_v35 = vld [vmem:[%s10059_s1 + $0x20] sm:$0xff] }
 0x4c8   :  { %2511 = vmatpush1.msra.mxu0 %v8461_v39  ;;  %10472 = vst [vmem:[#allocation25_spill] sm:$0xff] %v8479_v35  ;;  %v8484_v39 = vld [vmem:[%s10059_s1 + $0x18] sm:$0xff] }
 0x4c9   :  { %2512 = vmatprep.subr.mxu0 %v8467_v59  ;;  %10473 = vst [vmem:[#allocation26_spill] sm:$0xff] %v8484_v39 }
 0x4ca   :  { %2513 = vmatpush1.msra.mxu0 %v8473_v49 }
 0x4cb   :  { %2514 = vmatprep.subr.mxu0 %v8479_v35  ;;  %v10475_v35 = vld [vmem:[#allocation59_spill] sm:$0xff] }
 0x4cc   :  { %2515 = vmatpush1.msra.mxu0 %v8484_v39 }
 0x4cd   :  { %2686 = vmatprep.subr.mxu0 %v7900_v40 }
 0x529   :  { %v1938_v59 = vpop.f32.mrf.mxu0  ;;  %v2057_v32 = vpop.f32.mrf.mxu1 }
 0x52a   :  { %1942 = vst.msk [vmem:[#allocation2 + $0x4] sm:$0x3] %vm909_vm3, %v1938_v59  ;;  %v2181_v41 = vadd.f32 %v2057_v32, %v10474_v47  ;;  %v8495_v59 = vld [vmem:[%s10061_s2 + $0x3] ss:$0 sm:$0xff] }
 0x52b   :  { %v5404_v49 = vpop.f32.mrf.mxu0  ;;  %v2059_v22 = vpop.f32.mrf.mxu1 }
 0x52c   :  { %v2182_v33 = vadd.f32 %v2059_v22, %v10475_v35 }
 0x54a   :  { %v2128_v28 = vpop.f32.mrf.mxu0  ;;  %v2250_v55 = vpop.f32.mrf.mxu1 }
 0x54b   :  { %v2325_v37 = vadd.f32 %v2250_v55, %v2181_v41 }
 0x54c   :  { %v5439_v14 = vpop.f32.mrf.mxu0  ;;  %v2252_v34 = vpop.f32.mrf.mxu1 }
 0x54d   :  { %v2327_v36 = vmul.f32 0.5, %v2325_v37  ;;  %v2326_v39 = vadd.f32 %v2252_v34, %v2182_v33  ;;  %v10476_v37 = vld [vmem:[#allocation63_spill] sm:$0xff] }
 0x54f   :  { %5973 = vtanh.f32 %v2327_v36  ;;  %v2328_v31 = vmul.f32 0.5, %v2326_v39  ;;  %v2183_v36 = vadd.f32 %v2128_v28, %v10476_v37  ;;  %v10507_v28 = vld [vmem:[#allocation19_spill] sm:$0xff] }
 0x551   :  { %5975 = vtanh.f32 %v2328_v31 }
 0x55c   :  { %v5974_v40 = vpop.eup %5973 }
 0x55d   :  { %v2331_v30 = vmul.f32 0.5, %v5974_v40 }
 0x55e   :  { %v5976_v33 = vpop.eup %5975 }
 0x55f   :  { %v2333_v49 = vadd.f32 0.5, %v2331_v30  ;;  %v2332_v34 = vmul.f32 0.5, %v5976_v33  ;;  %v8505_v30 = vld [vmem:[%s10059_s1 + $0x4d8] sm:$0xff] }
 0x560   :  { %v8739_v33 = vld [vmem:[%s10059_s1 + $0x458] sm:$0xff] }
 0x561   :  { %v2334_v22 = vadd.f32 0.5, %v2332_v34  ;;  %v8746_v34 = vld [vmem:[%s10059_s1 + $0x408] sm:$0xff] }
 0x563   :  { %v2345_v31 = vsub.f32 1.0, %v2334_v22  ;;  %v2347_v40 = vmul.f32 %v2334_v22, %v7919_v60  ;;  %v8521_v60 = vld [vmem:[%s10059_s1 + $0x438] sm:$0xff] }
 0x564   :  { %v8753_v22 = vld [vmem:[%s10059_s1 + $0x3b8] sm:$0xff] }
 0x56b   :  { %v2321_v14 = vpop.f32.mrf.mxu0 }
 0x56c   :  { %v2341_v32 = vadd.f32 %v8495_v59, %v2321_v14  ;;  %v10509_v14 = vld [vmem:[#allocation22_spill] sm:$0xff] }
 0x56d   :  { %v5474_v41 = vpop.f32.mrf.mxu0 }
 0x56e   :  { %v2342_v55 = vmul.f32 %v2341_v32, %v2333_v49  ;;  %v10510_v49 = vld [vmem:[#allocation23_spill] sm:$0xff]  ;;  %v10511_v32 = vld [vmem:[#allocation25_spill] sm:$0xff]  ;;  %v10512_v41 = vld [vmem:[#allocation26_spill] sm:$0xff] }
 0x570   :  { %v2343_v47 = vadd.f32 %v2342_v55, %v2183_v36  ;;  %v8725_v36 = vld [vmem:[%s10059_s1 + $0x4f8] sm:$0xff]  ;;  %v8730_v55 = vld [vmem:[%s10059_s1 + $0x4a8] sm:$0xff] }
 0x572   :  { %5977 = vtanh.f32 %v2343_v47  ;;  %v8512_v47 = vld [vmem:[%s10059_s1 + $0x488] sm:$0xff] }
 0x57f   :  { %v5978_v39 = vpop.eup %5977 }
 0x580   :  { %v2346_v35 = vmul.f32 %v5978_v39, %v2345_v31  ;;  %v8760_v31 = vld [vmem:[%s10059_s1 + $0x368] sm:$0xff]  ;;  %v8767_v39 = vld [vmem:[%s10059_s1 + $0x318] sm:$0xff] }
 0x582   :  { %v8500_v27 = vadd.f32 %v2347_v40, %v2346_v35  ;;  %v10508_v35 = vld [vmem:[#allocation20_spill] sm:$0xff]  ;;  %v8773_v40 = vld [vmem:[%s10059_s1 + $0x2c8] sm:$0xff] }
 0x584   :  { %5508 = vmatmul.mubr.f32.vlgmr.msra.gmra.mxu1 %v8500_v27  ;;  %2549 = vmatmul.mubr.f32.vlgmr.msra.gmra.mxu0 %v8500_v27 }
 0x585   :  { %5511 = vmatpush3.msra.mxu1 %v8505_v30  ;;  %2687 = vmatpush1.msra.mxu0 %v7924_v50  ;;  %v8530_v50 = vld [vmem:[%s10059_s1 + $0x3e8] sm:$0xff] }
 0x586   :  { %5512 = vmatprep.subr.mxu1 %v10272_v2  ;;  %2688 = vmatprep.subr.mxu0 %v7929_v11  ;;  %v8539_v11 = vld [vmem:[%s10059_s1 + $0x398] sm:$0xff] }
 0x587   :  { %5513 = vmatpush3.msra.mxu1 %v8512_v47  ;;  %2689 = vmatpush1.msra.mxu0 %v7936_v5  ;;  %v8548_v5 = vld [vmem:[%s10059_s1 + $0x348] sm:$0xff] }
 0x588   :  { %5514 = vmatprep.subr.mxu1 %v10272_v2  ;;  %2690 = vmatprep.subr.mxu0 %v7943_v63  ;;  %v8557_v63 = vld [vmem:[%s10059_s1 + $0x2f8] sm:$0xff] }
 0x589   :  { %5515 = vmatpush3.msra.mxu1 %v8521_v60  ;;  %2691 = vmatpush1.msra.mxu0 %v7950_v6  ;;  %v8566_v6 = vld [vmem:[%s10059_s1 + $0x2a8] sm:$0xff] }
 0x58a   :  { %5516 = vmatprep.subr.mxu1 %v10272_v2  ;;  %2692 = vmatprep.subr.mxu0 %v7957_v10  ;;  %v8575_v10 = vld [vmem:[%s10059_s1 + $0x258] sm:$0xff] }
 0x58b   :  { %5517 = vmatpush3.msra.mxu1 %v8530_v50  ;;  %2693 = vmatpush1.msra.mxu0 %v7964_v8  ;;  %v8584_v8 = vld [vmem:[%s10059_s1 + $0x208] sm:$0xff] }
 0x58c   :  { %5518 = vmatprep.subr.mxu1 %v10272_v2  ;;  %2694 = vmatprep.subr.mxu0 %v7971_v52  ;;  %v8593_v52 = vld [vmem:[%s10059_s1 + $0x1b8] sm:$0xff] }
 0x58d   :  { %5519 = vmatpush3.msra.mxu1 %v8539_v11  ;;  %2695 = vmatpush1.msra.mxu0 %v7978_v3  ;;  %v8602_v3 = vld [vmem:[%s10059_s1 + $0x168] sm:$0xff] }
 0x58e   :  { %5520 = vmatprep.subr.mxu1 %v10272_v2  ;;  %2696 = vmatprep.subr.mxu0 %v7985_v53  ;;  %v8611_v53 = vld [vmem:[%s10059_s1 + $0x118] sm:$0xff] }
 0x58f   :  { %5521 = vmatpush3.msra.mxu1 %v8548_v5  ;;  %2697 = vmatpush1.msra.mxu0 %v7992_v16  ;;  %v8620_v16 = vld [vmem:[%s10059_s1 + $0xc8] sm:$0xff] }
 0x590   :  { %5522 = vmatprep.subr.mxu1 %v10272_v2  ;;  %2698 = vmatprep.subr.mxu0 %v7999_v1  ;;  %v8629_v1 = vld [vmem:[%s10059_s1 + $0x78] sm:$0xff] }
 0x591   :  { %5523 = vmatpush3.msra.mxu1 %v8557_v63  ;;  %2699 = vmatpush1.msra.mxu0 %v8006_v0  ;;  %v8638_v0 = vld [vmem:[%s10059_s1 + $0x28] sm:$0xff] }
 0x592   :  { %5524 = vmatprep.subr.mxu1 %v10272_v2  ;;  %2700 = vmatprep.subr.mxu0 %v8013_v51  ;;  %v10477_v51 = vld [vmem:[#allocation56_spill] sm:$0xff] }
 0x593   :  { %5525 = vmatpush3.msra.mxu1 %v8566_v6  ;;  %2701 = vmatpush1.msra.mxu0 %v8020_v29  ;;  %v10478_v29 = vld [vmem:[#allocation12_spill] sm:$0xff] }
 0x594   :  { %5526 = vmatprep.subr.mxu1 %v10272_v2  ;;  %2702 = vmatprep.subr.mxu0 %v8027_v54  ;;  %v10479_v54 = vld [vmem:[#allocation15_spill] sm:$0xff] }
 0x595   :  { %5527 = vmatpush3.msra.mxu1 %v8575_v10  ;;  %2703 = vmatpush1.msra.mxu0 %v8034_v9  ;;  %v10480_v9 = vld [vmem:[#allocation18_spill] sm:$0xff] }
 0x596   :  { %5528 = vmatprep.subr.mxu1 %v10272_v2  ;;  %2704 = vmatprep.subr.mxu0 %v8041_v19  ;;  %v10481_v19 = vld [vmem:[#allocation21_spill] sm:$0xff] }
 0x597   :  { %5529 = vmatpush3.msra.mxu1 %v8584_v8  ;;  %2705 = vmatpush1.msra.mxu0 %v8048_v62  ;;  %v10482_v62 = vld [vmem:[#allocation24_spill] sm:$0xff] }
 0x598   :  { %5530 = vmatprep.subr.mxu1 %v10272_v2  ;;  %2706 = vmatprep.subr.mxu0 %v8055_v57  ;;  %v10483_v57 = vld [vmem:[#allocation27_spill] sm:$0xff] }
 0x599   :  { %5531 = vmatpush3.msra.mxu1 %v8593_v52  ;;  %2707 = vmatpush1.msra.mxu0 %v8062_v45  ;;  %v10484_v45 = vld [vmem:[#allocation30_spill] sm:$0xff] }
 0x59a   :  { %5532 = vmatprep.subr.mxu1 %v10272_v2  ;;  %2708 = vmatprep.subr.mxu0 %v8069_v58  ;;  %v10485_v58 = vld [vmem:[#allocation33_spill] sm:$0xff] }
 0x59b   :  { %5533 = vmatpush3.msra.mxu1 %v8602_v3  ;;  %2709 = vmatpush1.msra.mxu0 %v8076_v7  ;;  %v10486_v7 = vld [vmem:[#allocation36_spill] sm:$0xff] }
 0x59c   :  { %5534 = vmatprep.subr.mxu1 %v10272_v2  ;;  %2710 = vmatprep.subr.mxu0 %v8083_v61  ;;  %v10487_v61 = vld [vmem:[#allocation39_spill] sm:$0xff] }
 0x59d   :  { %5535 = vmatpush3.msra.mxu1 %v8611_v53  ;;  %2711 = vmatpush1.msra.mxu0 %v8090_v42  ;;  %v10488_v42 = vld [vmem:[#allocation42_spill] sm:$0xff] }
 0x59e   :  { %5536 = vmatprep.subr.mxu1 %v10272_v2  ;;  %2712 = vmatprep.subr.mxu0 %v8097_v12  ;;  %v10489_v12 = vld [vmem:[#allocation45_spill] sm:$0xff] }
 0x59f   :  { %5537 = vmatpush3.msra.mxu1 %v8620_v16  ;;  %2713 = vmatpush1.msra.mxu0 %v8104_v4  ;;  %v10490_v4 = vld [vmem:[#allocation48_spill] sm:$0xff] }
 0x5a0   :  { %5538 = vmatprep.subr.mxu1 %v10272_v2  ;;  %2714 = vmatprep.subr.mxu0 %v8111_v15  ;;  %v10491_v15 = vld [vmem:[#allocation51_spill] sm:$0xff] }
 0x5a1   :  { %5539 = vmatpush3.msra.mxu1 %v8629_v1  ;;  %2715 = vmatpush1.msra.mxu0 %v8118_v43  ;;  %v10492_v43 = vld [vmem:[#allocation54_spill] sm:$0xff] }
 0x5a2   :  { %5540 = vmatprep.subr.mxu1 %v10272_v2  ;;  %2716 = vmatprep.subr.mxu0 %v8125_v17  ;;  %v10493_v17 = vld [vmem:[#allocation57_spill] sm:$0xff] }
 0x5a3   :  { %5541 = vmatpush3.msra.mxu1 %v8638_v0  ;;  %5542 = vmatprep.mubr.msk.f32.mxu1 %vm6004_vm0, %v10272_v2 }
 0x5a4   :  { %2717 = vmatpush1.msra.mxu0 %v8134_v44  ;;  %2750 = vmatprep.mubr.f32.mxu0 %v10272_v2  ;;  %v10494_v44 = vld [vmem:[#allocation7_spill] sm:$0xff] }
 0x5a5   :  { %5543 = vmatmul.mubr.f32.vlgmr.msra.gmra.mxu1 %v8500_v27  ;;  %2751 = vmatmul.mubr.f32.vlgmr.msra.gmra.mxu0 %v8500_v27 }
 0x5a6   :  { %5545 = vmatprep.subr.mxu1 %v10272_v2  ;;  %5577 = vmatprep.mubr.msk.f32.mxu1 %vm6004_vm0, %v10272_v2 }
 0x5a7   :  { %5546 = vmatpush3.msra.mxu1 %v8146_v20  ;;  %5580 = vmatprep.subr.mxu0 %v10272_v2  ;;  %v10495_v20 = vld [vmem:[#allocation3_spill] sm:$0xff] }
 0x5a8   :  { %5547 = vmatprep.subr.mxu1 %v10272_v2  ;;  %5612 = vmatprep.mubr.msk.f32.mxu0 %vm6004_vm0, %v10272_v2 }
 0x5a9   :  { %5548 = vmatpush3.msra.mxu1 %v8154_v21  ;;  %v10496_v21 = vld [vmem:[#allocation4_spill] sm:$0xff]  ;;  %5581 = vmatpush3.msra.mxu0 %v8725_v36 }
 0x5aa   :  { %5549 = vmatprep.subr.mxu1 %v10272_v2  ;;  %5582 = vmatprep.subr.mxu0 %v10272_v2 }
 0x5ab   :  { %5550 = vmatpush3.msra.mxu1 %v8164_v23  ;;  %v10497_v23 = vld [vmem:[#allocation8_spill] sm:$0xff]  ;;  %5583 = vmatpush3.msra.mxu0 %v8730_v55 }
 0x5ac   :  { %5551 = vmatprep.subr.mxu1 %v10272_v2  ;;  %5584 = vmatprep.subr.mxu0 %v10272_v2 }
 0x5ad   :  { %5552 = vmatpush3.msra.mxu1 %v8173_v46  ;;  %v10498_v46 = vld [vmem:[#allocation5_spill] sm:$0xff]  ;;  %5585 = vmatpush3.msra.mxu0 %v8739_v33 }
 0x5ae   :  { %5553 = vmatprep.subr.mxu1 %v10272_v2  ;;  %5586 = vmatprep.subr.mxu0 %v10272_v2 }
 0x5af   :  { %5554 = vmatpush3.msra.mxu1 %v8182_v38  ;;  %v10499_v38 = vld [vmem:[#allocation6_spill] sm:$0xff]  ;;  %5587 = vmatpush3.msra.mxu0 %v8746_v34 }
 0x5b0   :  { %5555 = vmatprep.subr.mxu1 %v10272_v2  ;;  %5588 = vmatprep.subr.mxu0 %v10272_v2 }
 0x5b1   :  { %5556 = vmatpush3.msra.mxu1 %v8191_v18  ;;  %v10500_v18 = vld [vmem:[#allocation9_spill] sm:$0xff]  ;;  %5589 = vmatpush3.msra.mxu0 %v8753_v22 }
 0x5b2   :  { %5557 = vmatprep.subr.mxu1 %v10272_v2  ;;  %5590 = vmatprep.subr.mxu0 %v10272_v2 }
 0x5b3   :  { %5558 = vmatpush3.msra.mxu1 %v8200_v13  ;;  %v10501_v13 = vld [vmem:[#allocation10_spill] sm:$0xff]  ;;  %5591 = vmatpush3.msra.mxu0 %v8760_v31 }
 0x5b4   :  { %5559 = vmatprep.subr.mxu1 %v10272_v2  ;;  %5592 = vmatprep.subr.mxu0 %v10272_v2 }
 0x5b5   :  { %5560 = vmatpush3.msra.mxu1 %v8209_v48  ;;  %v10502_v48 = vld [vmem:[#allocation11_spill] sm:$0xff]  ;;  %5593 = vmatpush3.msra.mxu0 %v8767_v39 }
 0x5b6   :  { %5561 = vmatprep.subr.mxu1 %v10272_v2  ;;  %5594 = vmatprep.subr.mxu0 %v10272_v2 }
 0x5b7   :  { %5562 = vmatpush3.msra.mxu1 %v8218_v25  ;;  %v10503_v25 = vld [vmem:[#allocation13_spill] sm:$0xff]  ;;  %5595 = vmatpush3.msra.mxu0 %v8773_v40 }
 0x5b8   :  { %5563 = vmatprep.subr.mxu1 %v10272_v2  ;;  %5596 = vmatprep.subr.mxu0 %v10272_v2 }
 0x5b9   :  { %5564 = vmatpush3.msra.mxu1 %v8227_v56  ;;  %v10504_v56 = vld [vmem:[#allocation14_spill] sm:$0xff] }
 0x5ba   :  { %5565 = vmatprep.subr.mxu1 %v10272_v2 }
 0x5bb   :  { %5566 = vmatpush3.msra.mxu1 %v8236_v24  ;;  %v10505_v24 = vld [vmem:[#allocation16_spill] sm:$0xff] }
 0x5bc   :  { %5567 = vmatprep.subr.mxu1 %v10272_v2 }
 0x5bd   :  { %5568 = vmatpush3.msra.mxu1 %v8245_v26  ;;  %v10506_v26 = vld [vmem:[#allocation17_spill] sm:$0xff] }
 0x5be   :  { %5569 = vmatprep.subr.mxu1 %v10272_v2 }
 0x5bf   :  { %5570 = vmatpush3.msra.mxu1 %v10477_v51  ;;  %v8779_v51 = vld [vmem:[%s10059_s1 + $0x278] sm:$0xff] }
 0x5c0   :  { %5571 = vmatprep.subr.mxu1 %v10272_v2  ;;  %5597 = vmatpush3.msra.mxu0 %v8779_v51 }
 0x5c1   :  { %5572 = vmatpush3.msra.mxu1 %v10478_v29  ;;  %v8786_v29 = vld [vmem:[%s10059_s1 + $0x228] sm:$0xff]  ;;  %5598 = vmatprep.subr.mxu0 %v10272_v2 }
 0x5c2   :  { %5573 = vmatprep.subr.mxu1 %v10272_v2  ;;  %5599 = vmatpush3.msra.mxu0 %v8786_v29 }
 0x5c3   :  { %5574 = vmatpush3.msra.mxu1 %v10479_v54  ;;  %v8791_v54 = vld [vmem:[%s10059_s1 + $0x4b8] sm:$0xff]  ;;  %5600 = vmatprep.subr.mxu0 %v10272_v2 }
 0x5c4   :  { %5575 = vmatprep.subr.mxu1 %v10272_v2 }
 0x5c5   :  { %5576 = vmatpush3.msra.mxu1 %v10480_v9  ;;  %v8799_v9 = vld [vmem:[%s10059_s1 + $0x1d8] sm:$0xff] }
 0x5c6   :  { %5578 = vmatmul.mubr.f32.vlgmr.msra.gmra.mxu1 %v8500_v27  ;;  %3001 = vmatprep.subr.mxu1 %v10481_v19  ;;  %v8806_v19 = vld [vmem:[%s10059_s1 + $0x188] sm:$0xff] }
 0x5c7   :  { %3002 = vmatpush1.msra.mxu1 %v10482_v62  ;;  %3065 = vmatprep.mubr.f32.mxu1 %v10272_v2  ;;  %v8813_v62 = vld [vmem:[%s10059_s1 + $0x138] sm:$0xff] }
 0x5c8   :  { %3003 = vmatprep.subr.mxu1 %v10483_v57  ;;  %5601 = vmatpush3.msra.mxu0 %v8799_v9  ;;  %v8820_v57 = vld [vmem:[%s10059_s1 + $0xe8] sm:$0xff] }
 0x5c9   :  { %3004 = vmatpush1.msra.mxu1 %v10484_v45  ;;  %5602 = vmatprep.subr.mxu0 %v10272_v2  ;;  %v8827_v45 = vld [vmem:[%s10059_s1 + $0x98] sm:$0xff] }
 0x5ca   :  { %3005 = vmatprep.subr.mxu1 %v10485_v58  ;;  %5603 = vmatpush3.msra.mxu0 %v8806_v19  ;;  %v8834_v58 = vld [vmem:[%s10059_s1 + $0x48] sm:$0xff] }
 0x5cb   :  { %3006 = vmatpush1.msra.mxu1 %v10486_v7  ;;  %5604 = vmatprep.subr.mxu0 %v10272_v2 }
 0x5cc   :  { %3007 = vmatprep.subr.mxu1 %v10487_v61  ;;  %5605 = vmatpush3.msra.mxu0 %v8813_v62 }
 0x5cd   :  { %3008 = vmatpush1.msra.mxu1 %v10488_v42  ;;  %5606 = vmatprep.subr.mxu0 %v10272_v2 }
 0x5ce   :  { %3009 = vmatprep.subr.mxu1 %v10489_v12  ;;  %5607 = vmatpush3.msra.mxu0 %v8820_v57 }
 0x5cf   :  { %3010 = vmatpush1.msra.mxu1 %v10490_v4  ;;  %5608 = vmatprep.subr.mxu0 %v10272_v2 }
 0x5d0   :  { %3011 = vmatprep.subr.mxu1 %v10491_v15  ;;  %5609 = vmatpush3.msra.mxu0 %v8827_v45 }
 0x5d1   :  { %3012 = vmatpush1.msra.mxu1 %v10492_v43  ;;  %5610 = vmatprep.subr.mxu0 %v10272_v2 }
 0x5d2   :  { %3013 = vmatprep.subr.mxu1 %v10493_v17  ;;  %5611 = vmatpush3.msra.mxu0 %v8834_v58 }
 0x5d3   :  { %3014 = vmatpush1.msra.mxu1 %v10494_v44  ;;  %5615 = vmatprep.subr.mxu0 %v10272_v2 }
 0x5d4   :  { %3015 = vmatprep.subr.mxu1 %v10495_v20  ;;  %v10513_v20 = vld [vmem:[#allocation58_spill] sm:$0xff] }
 0x5d5   :  { %3016 = vmatpush1.msra.mxu1 %v10496_v21 }
 0x5d6   :  { %3017 = vmatprep.subr.mxu1 %v10497_v23 }
 0x5d7   :  { %3018 = vmatpush1.msra.mxu1 %v10498_v46 }
 0x5d8   :  { %3019 = vmatprep.subr.mxu1 %v10499_v38 }
 0x5d9   :  { %3020 = vmatpush1.msra.mxu1 %v10500_v18 }
 0x5da   :  { %3021 = vmatprep.subr.mxu1 %v10501_v13 }
 0x5db   :  { %3022 = vmatpush1.msra.mxu1 %v10502_v48  ;;  %v10514_v48 = vld [vmem:[#allocation59_spill] sm:$0xff] }
 0x5dc   :  { %3023 = vmatprep.subr.mxu1 %v10503_v25 }
 0x5dd   :  { %3024 = vmatpush1.msra.mxu1 %v10504_v56 }
 0x5de   :  { %3025 = vmatprep.subr.mxu1 %v10505_v24 }
 0x5df   :  { %3026 = vmatpush1.msra.mxu1 %v10506_v26 }
 0x5e0   :  { %3027 = vmatprep.subr.mxu1 %v10507_v28 }
 0x5e1   :  { %3028 = vmatpush1.msra.mxu1 %v10508_v35 }
 0x5e2   :  { %3029 = vmatprep.subr.mxu1 %v10509_v14 }
 0x5e3   :  { %3030 = vmatpush1.msra.mxu1 %v10510_v49 }
 0x5e4   :  { %3031 = vmatprep.subr.mxu1 %v10511_v32 }
 0x5e5   :  { %3032 = vmatpush1.msra.mxu1 %v10512_v41 }
 0x5e6   :  { %3203 = vmatprep.subr.mxu1 %v8791_v54 }
 0x644   :  { %v2431_v7 = vpop.f32.mrf.mxu1  ;;  %v2550_v42 = vpop.f32.mrf.mxu0 }
 0x645   :  { %2435 = vst.msk [vmem:[#allocation2 + $0x6] sm:$0x3] %vm909_vm3, %v2431_v7  ;;  %v2677_v43 = vrot.slane %v2550_v42, 6 }
 0x646   :  { %v5509_v61 = vpop.f32.mrf.mxu1  ;;  %v2552_v12 = vpop.f32.mrf.mxu0 }
 0x647   :  { %v2683_v21 = vadd.f32 %v2677_v43, %v10513_v20  ;;  %v2678_v18 = vrot.slane %v2552_v12, 6 }
 0x649   :  { %v2684_v25 = vadd.f32 %v2678_v18, %v10514_v48  ;;  %v8854_v18 = vld [vmem:[%s10059_s1 + $0x4b0] sm:$0xff] }
 0x665   :  { %v2621_v4 = vpop.f32.mrf.mxu1  ;;  %v2752_v15 = vpop.f32.mrf.mxu0 }
 0x666   :  { %v2829_v44 = vrot.slane %v2752_v15, 6  ;;  %v2679_v14 = vrot.slane %v2621_v4, 6 }
 0x667   :  { %v5544_v17 = vpop.f32.mrf.mxu1  ;;  %v2754_v38 = vpop.f32.mrf.mxu0 }
 0x668   :  { %v2833_v23 = vadd.f32 %v2829_v44, %v2683_v21  ;;  %v2830_v13 = vrot.slane %v2754_v38, 6  ;;  %v2685_v61 = vadd.f32 %v2679_v14, %v10476_v37  ;;  %v2859_v21 = vrot.slane %v8500_v27, 6  ;;  %v8866_v27 = vld [vmem:[%s10059_s1 + $0x460] sm:$0xff] }
 0x669   :  { %v8950_v14 = vld [vmem:[%s10059_s1 + $0x280] sm:$0xff] }
 0x66a   :  { %v2835_v46 = vmul.f32 0.5, %v2833_v23  ;;  %v2834_v56 = vadd.f32 %v2830_v13, %v2684_v25  ;;  %v8859_v13 = vld [vmem:[%s10059_s1 + $0x468] sm:$0xff]  ;;  %v8873_v25 = vld [vmem:[%s10059_s1 + $0x418] sm:$0xff] }
 0x66c   :  { %5979 = vtanh.f32 %v2835_v46  ;;  %v2836_v24 = vmul.f32 0.5, %v2834_v56  ;;  %v8880_v56 = vld [vmem:[%s10059_s1 + $0x410] sm:$0xff] }
 0x66e   :  { %5981 = vtanh.f32 %v2836_v24  ;;  %v8894_v24 = vld [vmem:[%s10059_s1 + $0x3c0] sm:$0xff] }
 0x679   :  { %v5980_v26 = vpop.eup %5979 }
 0x67a   :  { %v2839_v28 = vmul.f32 0.5, %v5980_v26  ;;  %v8908_v26 = vld [vmem:[%s10059_s1 + $0x370] sm:$0xff] }
 0x67b   :  { %v5982_v15 = vpop.eup %5981 }
 0x67c   :  { %v2841_v41 = vadd.f32 0.5, %v2839_v28  ;;  %v2840_v43 = vmul.f32 0.5, %v5982_v15  ;;  %v8922_v28 = vld [vmem:[%s10059_s1 + $0x320] sm:$0xff] }
 0x67d   :  { %v9064_v15 = vld [vmem:[%s10059_s1] sm:$0xff] }
 0x67e   :  { %v2842_v17 = vadd.f32 0.5, %v2840_v43  ;;  %v9103_v43 = vld [vmem:[%s10059_s1 + $0x3d0] sm:$0xff] }
 0x680   :  { %v2856_v44 = vsub.f32 1.0, %v2842_v17  ;;  %v2861_v46 = vmul.f32 %v2859_v21, %v2842_v17  ;;  %v9253_v17 = vld [vmem:[%s10059_s1 + $0x430] sm:$0xff]  ;;  %v9265_v21 = vld [vmem:[%s10059_s1 + $0x3e0] sm:$0xff] }
 0x681   :  { %10525 = vst [vmem:[#allocation43_spill] sm:$0xff] %v9253_v17  ;;  %10527 = vst [vmem:[#allocation46_spill] sm:$0xff] %v9265_v21 }
 0x686   :  { %v2823_v35 = vpop.f32.mrf.mxu1 }
 0x687   :  { %v2849_v49 = vadd.f32 %v8495_v59, %v2823_v35  ;;  %v8936_v35 = vld [vmem:[%s10059_s1 + $0x2d0] sm:$0xff] }
 0x688   :  { %v5579_v32 = vpop.f32.mrf.mxu1 }
 0x689   :  { %v2851_v7 = vrot.slane %v2849_v49, 6  ;;  %v8964_v49 = vld [vmem:[%s10059_s1 + $0x230] sm:$0xff]  ;;  %v8978_v32 = vld [vmem:[%s10059_s1 + $0x1e0] sm:$0xff] }
 0x68b   :  { %v2853_v42 = vmul.f32 %v2851_v7, %v2841_v41  ;;  %v8992_v41 = vld [vmem:[%s10059_s1 + $0x190] sm:$0xff]  ;;  %v9006_v7 = vld [vmem:[%s10059_s1 + $0x140] sm:$0xff] }
 0x68d   :  { %v2854_v12 = vadd.f32 %v2853_v42, %v2685_v61  ;;  %v9020_v61 = vld [vmem:[%s10059_s1 + $0xf0] sm:$0xff]  ;;  %v9034_v42 = vld [vmem:[%s10059_s1 + $0xa0] sm:$0xff] }
 0x68f   :  { %5983 = vtanh.f32 %v2854_v12  ;;  %v9048_v12 = vld [vmem:[%s10059_s1 + $0x50] sm:$0xff] }
 0x69c   :  { %v5984_v23 = vpop.eup %5983 }
 0x69d   :  { %v2857_v38 = vmul.f32 %v5984_v23, %v2856_v44  ;;  %v9259_v44 = vld [vmem:[%s10059_s1 + $0x428] sm:$0xff]  ;;  %v9271_v23 = vld [vmem:[%s10059_s1 + $0x3d8] sm:$0xff] }
 0x69e   :  { %10526 = vst [vmem:[#allocation44_spill] sm:$0xff] %v9259_v44  ;;  %10528 = vst [vmem:[#allocation47_spill] sm:$0xff] %v9271_v23 }
 0x69f   :  { %v8846_v4 = vadd.f32 %v2861_v46, %v2857_v38  ;;  %v9277_v46 = vld [vmem:[%s10059_s1 + $0x390] sm:$0xff]  ;;  %v9283_v38 = vld [vmem:[%s10059_s1 + $0x388] sm:$0xff] }
 0x6a0   :  { %10529 = vst [vmem:[#allocation49_spill] sm:$0xff] %v9277_v46  ;;  %10530 = vst [vmem:[#allocation50_spill] sm:$0xff] %v9283_v38 }
 0x6a1   :  { %v8849_v59 = vrot.slane %v8846_v4, 2 }
 0x6a3   :  { %5613 = vmatmul.mubr.f32.vlgmr.msra.gmra.mxu0 %v8849_v59  ;;  %3066 = vmatmul.mubr.f32.vlgmr.msra.gmra.mxu1 %v8849_v59 }
 0x6a4   :  { %5616 = vmatpush3.msra.mxu0 %v8505_v30  ;;  %3204 = vmatpush1.msra.mxu1 %v8854_v18  ;;  %v8887_v30 = vld [vmem:[%s10059_s1 + $0x3c8] sm:$0xff] }
 0x6a5   :  { %5617 = vmatprep.subr.mxu0 %v10272_v2  ;;  %3205 = vmatprep.subr.mxu1 %v8859_v13 }
 0x6a6   :  { %5618 = vmatpush3.msra.mxu0 %v8512_v47  ;;  %3206 = vmatpush1.msra.mxu1 %v8866_v27  ;;  %v8901_v47 = vld [vmem:[%s10059_s1 + $0x378] sm:$0xff] }
 0x6a7   :  { %5619 = vmatprep.subr.mxu0 %v10272_v2  ;;  %3207 = vmatprep.subr.mxu1 %v8873_v25 }
 0x6a8   :  { %5620 = vmatpush3.msra.mxu0 %v8521_v60  ;;  %3208 = vmatpush1.msra.mxu1 %v8880_v56  ;;  %v8915_v60 = vld [vmem:[%s10059_s1 + $0x328] sm:$0xff] }
 0x6a9   :  { %5621 = vmatprep.subr.mxu0 %v10272_v2  ;;  %3209 = vmatprep.subr.mxu1 %v8887_v30 }
 0x6aa   :  { %5622 = vmatpush3.msra.mxu0 %v8530_v50  ;;  %3210 = vmatpush1.msra.mxu1 %v8894_v24  ;;  %v8929_v50 = vld [vmem:[%s10059_s1 + $0x2d8] sm:$0xff] }
 0x6ab   :  { %5623 = vmatprep.subr.mxu0 %v10272_v2  ;;  %3211 = vmatprep.subr.mxu1 %v8901_v47 }
 0x6ac   :  { %5624 = vmatpush3.msra.mxu0 %v8539_v11  ;;  %3212 = vmatpush1.msra.mxu1 %v8908_v26  ;;  %v8943_v11 = vld [vmem:[%s10059_s1 + $0x288] sm:$0xff] }
 0x6ad   :  { %5625 = vmatprep.subr.mxu0 %v10272_v2  ;;  %3213 = vmatprep.subr.mxu1 %v8915_v60 }
 0x6ae   :  { %5626 = vmatpush3.msra.mxu0 %v8548_v5  ;;  %3214 = vmatpush1.msra.mxu1 %v8922_v28  ;;  %v8957_v5 = vld [vmem:[%s10059_s1 + $0x238] sm:$0xff] }
 0x6af   :  { %5627 = vmatprep.subr.mxu0 %v10272_v2  ;;  %3215 = vmatprep.subr.mxu1 %v8929_v50 }
 0x6b0   :  { %5628 = vmatpush3.msra.mxu0 %v8557_v63  ;;  %3216 = vmatpush1.msra.mxu1 %v8936_v35  ;;  %v8971_v63 = vld [vmem:[%s10059_s1 + $0x1e8] sm:$0xff] }
 0x6b1   :  { %5629 = vmatprep.subr.mxu0 %v10272_v2  ;;  %3217 = vmatprep.subr.mxu1 %v8943_v11 }
 0x6b2   :  { %5630 = vmatpush3.msra.mxu0 %v8566_v6  ;;  %3218 = vmatpush1.msra.mxu1 %v8950_v14  ;;  %v8985_v6 = vld [vmem:[%s10059_s1 + $0x198] sm:$0xff] }
 0x6b3   :  { %5631 = vmatprep.subr.mxu0 %v10272_v2  ;;  %3219 = vmatprep.subr.mxu1 %v8957_v5 }
 0x6b4   :  { %5632 = vmatpush3.msra.mxu0 %v8575_v10  ;;  %3220 = vmatpush1.msra.mxu1 %v8964_v49  ;;  %v8999_v10 = vld [vmem:[%s10059_s1 + $0x148] sm:$0xff] }
 0x6b5   :  { %5633 = vmatprep.subr.mxu0 %v10272_v2  ;;  %3221 = vmatprep.subr.mxu1 %v8971_v63 }
 0x6b6   :  { %5634 = vmatpush3.msra.mxu0 %v8584_v8  ;;  %3222 = vmatpush1.msra.mxu1 %v8978_v32  ;;  %v9013_v8 = vld [vmem:[%s10059_s1 + $0xf8] sm:$0xff] }
 0x6b7   :  { %5635 = vmatprep.subr.mxu0 %v10272_v2  ;;  %3223 = vmatprep.subr.mxu1 %v8985_v6 }
 0x6b8   :  { %5636 = vmatpush3.msra.mxu0 %v8593_v52  ;;  %3224 = vmatpush1.msra.mxu1 %v8992_v41  ;;  %v9027_v52 = vld [vmem:[%s10059_s1 + $0xa8] sm:$0xff] }
 0x6b9   :  { %5637 = vmatprep.subr.mxu0 %v10272_v2  ;;  %3225 = vmatprep.subr.mxu1 %v8999_v10 }
 0x6ba   :  { %5638 = vmatpush3.msra.mxu0 %v8602_v3  ;;  %3226 = vmatpush1.msra.mxu1 %v9006_v7  ;;  %v9041_v3 = vld [vmem:[%s10059_s1 + $0x58] sm:$0xff] }
 0x6bb   :  { %5639 = vmatprep.subr.mxu0 %v10272_v2  ;;  %3227 = vmatprep.subr.mxu1 %v9013_v8 }
 0x6bc   :  { %5640 = vmatpush3.msra.mxu0 %v8611_v53  ;;  %3228 = vmatpush1.msra.mxu1 %v9020_v61  ;;  %v9055_v53 = vld [vmem:[%s10059_s1 + $0x8] sm:$0xff] }
 0x6bd   :  { %5641 = vmatprep.subr.mxu0 %v10272_v2  ;;  %3229 = vmatprep.subr.mxu1 %v9027_v52 }
 0x6be   :  { %5642 = vmatpush3.msra.mxu0 %v8620_v16  ;;  %3230 = vmatpush1.msra.mxu1 %v9034_v42  ;;  %v9076_v16 = vld [vmem:[%s10059_s1 + $0x4c0] sm:$0xff] }
 0x6bf   :  { %5643 = vmatprep.subr.mxu0 %v10272_v2  ;;  %3231 = vmatprep.subr.mxu1 %v9041_v3 }
 0x6c0   :  { %5644 = vmatpush3.msra.mxu0 %v8629_v1  ;;  %3232 = vmatpush1.msra.mxu1 %v9048_v12  ;;  %v9084_v1 = vld [vmem:[%s10059_s1 + $0x470] sm:$0xff] }
 0x6c1   :  { %5645 = vmatprep.subr.mxu0 %v10272_v2  ;;  %3233 = vmatprep.subr.mxu1 %v9055_v53 }
 0x6c2   :  { %5646 = vmatpush3.msra.mxu0 %v8638_v0  ;;  %5647 = vmatprep.mubr.msk.f32.mxu0 %vm6004_vm0, %v10272_v2  ;;  %v9094_v0 = vld [vmem:[%s10059_s1 + $0x420] sm:$0xff] }
 0x6c3   :  { %3234 = vmatpush1.msra.mxu1 %v9064_v15  ;;  %3267 = vmatprep.mubr.f32.mxu1 %v10272_v2 }
 0x6c4   :  { %5648 = vmatmul.mubr.f32.vlgmr.msra.gmra.mxu0 %v8849_v59  ;;  %3268 = vmatmul.mubr.f32.vlgmr.msra.gmra.mxu1 %v8849_v59 }
 0x6c5   :  { %5650 = vmatprep.subr.mxu0 %v10272_v2  ;;  %5682 = vmatprep.mubr.msk.f32.mxu0 %vm6004_vm0, %v10272_v2 }
 0x6c6   :  { %5651 = vmatpush3.msra.mxu0 %v9076_v16  ;;  %5685 = vmatprep.subr.mxu1 %v10272_v2 }
 0x6c7   :  { %5652 = vmatprep.subr.mxu0 %v10272_v2  ;;  %5686 = vmatpush3.msra.mxu1 %v8725_v36  ;;  %v9112_v36 = vld [vmem:[%s10059_s1 + $0x380] sm:$0xff] }
 0x6c8   :  { %5653 = vmatpush3.msra.mxu0 %v9084_v1  ;;  %5687 = vmatprep.subr.mxu1 %v10272_v2 }
 0x6c9   :  { %5654 = vmatprep.subr.mxu0 %v10272_v2  ;;  %5688 = vmatpush3.msra.mxu1 %v8730_v55  ;;  %v9121_v55 = vld [vmem:[%s10059_s1 + $0x330] sm:$0xff] }
 0x6ca   :  { %5655 = vmatpush3.msra.mxu0 %v9094_v0  ;;  %5689 = vmatprep.subr.mxu1 %v10272_v2 }
 0x6cb   :  { %5656 = vmatprep.subr.mxu0 %v10272_v2  ;;  %5690 = vmatpush3.msra.mxu1 %v8739_v33  ;;  %v9130_v33 = vld [vmem:[%s10059_s1 + $0x2e0] sm:$0xff] }
 0x6cc   :  { %5657 = vmatpush3.msra.mxu0 %v9103_v43  ;;  %5691 = vmatprep.subr.mxu1 %v10272_v2 }
 0x6cd   :  { %5658 = vmatprep.subr.mxu0 %v10272_v2  ;;  %5692 = vmatpush3.msra.mxu1 %v8746_v34  ;;  %v9139_v34 = vld [vmem:[%s10059_s1 + $0x290] sm:$0xff] }
 0x6ce   :  { %5659 = vmatpush3.msra.mxu0 %v9112_v36  ;;  %5693 = vmatprep.subr.mxu1 %v10272_v2 }
 0x6cf   :  { %5660 = vmatprep.subr.mxu0 %v10272_v2  ;;  %5694 = vmatpush3.msra.mxu1 %v8753_v22  ;;  %v9148_v22 = vld [vmem:[%s10059_s1 + $0x240] sm:$0xff] }
 0x6d0   :  { %5661 = vmatpush3.msra.mxu0 %v9121_v55  ;;  %5695 = vmatprep.subr.mxu1 %v10272_v2 }
 0x6d1   :  { %5662 = vmatprep.subr.mxu0 %v10272_v2  ;;  %5696 = vmatpush3.msra.mxu1 %v8760_v31  ;;  %v9157_v31 = vld [vmem:[%s10059_s1 + $0x1f0] sm:$0xff] }
 0x6d2   :  { %5663 = vmatpush3.msra.mxu0 %v9130_v33  ;;  %5697 = vmatprep.subr.mxu1 %v10272_v2 }
 0x6d3   :  { %5664 = vmatprep.subr.mxu0 %v10272_v2  ;;  %5698 = vmatpush3.msra.mxu1 %v8767_v39  ;;  %v9166_v39 = vld [vmem:[%s10059_s1 + $0x1a0] sm:$0xff] }
 0x6d4   :  { %5665 = vmatpush3.msra.mxu0 %v9139_v34  ;;  %5699 = vmatprep.subr.mxu1 %v10272_v2  ;;  %10515 = vst [vmem:[#allocation28_spill] sm:$0xff] %v9166_v39 }
 0x6d5   :  { %5666 = vmatprep.subr.mxu0 %v10272_v2  ;;  %5700 = vmatpush3.msra.mxu1 %v8773_v40  ;;  %v9175_v40 = vld [vmem:[%s10059_s1 + $0x150] sm:$0xff] }
 0x6d6   :  { %5667 = vmatpush3.msra.mxu0 %v9148_v22  ;;  %5701 = vmatprep.subr.mxu1 %v10272_v2  ;;  %10516 = vst [vmem:[#allocation29_spill] sm:$0xff] %v9175_v40 }
 0x6d7   :  { %5668 = vmatprep.subr.mxu0 %v10272_v2  ;;  %5702 = vmatpush3.msra.mxu1 %v8779_v51  ;;  %v9184_v51 = vld [vmem:[%s10059_s1 + $0x100] sm:$0xff] }
 0x6d8   :  { %5669 = vmatpush3.msra.mxu0 %v9157_v31  ;;  %5703 = vmatprep.subr.mxu1 %v10272_v2  ;;  %10517 = vst [vmem:[#allocation31_spill] sm:$0xff] %v9184_v51 }
 0x6d9   :  { %5670 = vmatprep.subr.mxu0 %v10272_v2  ;;  %5704 = vmatpush3.msra.mxu1 %v8786_v29  ;;  %v9193_v29 = vld [vmem:[%s10059_s1 + $0xb0] sm:$0xff] }
 0x6da   :  { %5671 = vmatpush3.msra.mxu0 %v9166_v39  ;;  %5705 = vmatprep.subr.mxu1 %v10272_v2  ;;  %10518 = vst [vmem:[#allocation32_spill] sm:$0xff] %v9193_v29 }
 0x6db   :  { %5672 = vmatprep.subr.mxu0 %v10272_v2  ;;  %5706 = vmatpush3.msra.mxu1 %v8799_v9  ;;  %v9202_v9 = vld [vmem:[%s10059_s1 + $0x60] sm:$0xff] }
 0x6dc   :  { %5673 = vmatpush3.msra.mxu0 %v9175_v40  ;;  %5707 = vmatprep.subr.mxu1 %v10272_v2  ;;  %10519 = vst [vmem:[#allocation34_spill] sm:$0xff] %v9202_v9 }
 0x6dd   :  { %5674 = vmatprep.subr.mxu0 %v10272_v2  ;;  %5708 = vmatpush3.msra.mxu1 %v8806_v19  ;;  %v9211_v19 = vld [vmem:[%s10059_s1 + $0x10] sm:$0xff] }
 0x6de   :  { %5675 = vmatpush3.msra.mxu0 %v9184_v51  ;;  %5709 = vmatprep.subr.mxu1 %v10272_v2  ;;  %10520 = vst [vmem:[#allocation35_spill] sm:$0xff] %v9211_v19 }
 0x6df   :  { %5676 = vmatprep.subr.mxu0 %v10272_v2  ;;  %5710 = vmatpush3.msra.mxu1 %v8813_v62  ;;  %v9229_v62 = vld [vmem:[%s10059_s1 + $0x4d0] sm:$0xff] }
 0x6e0   :  { %5677 = vmatpush3.msra.mxu0 %v9193_v29  ;;  %5711 = vmatprep.subr.mxu1 %v10272_v2  ;;  %10521 = vst [vmem:[#allocation37_spill] sm:$0xff] %v9229_v62 }
 0x6e1   :  { %5678 = vmatprep.subr.mxu0 %v10272_v2  ;;  %5712 = vmatpush3.msra.mxu1 %v8820_v57  ;;  %v9234_v57 = vld [vmem:[%s10059_s1 + $0x4c8] sm:$0xff] }
 0x6e2   :  { %5679 = vmatpush3.msra.mxu0 %v9202_v9  ;;  %5713 = vmatprep.subr.mxu1 %v10272_v2  ;;  %10522 = vst [vmem:[#allocation38_spill] sm:$0xff] %v9234_v57 }
 0x6e3   :  { %5680 = vmatprep.subr.mxu0 %v10272_v2  ;;  %5714 = vmatpush3.msra.mxu1 %v8827_v45  ;;  %v9239_v45 = vld [vmem:[%s10059_s1 + $0x480] sm:$0xff] }
 0x6e4   :  { %5681 = vmatpush3.msra.mxu0 %v9211_v19  ;;  %5715 = vmatprep.subr.mxu1 %v10272_v2  ;;  %10523 = vst [vmem:[#allocation40_spill] sm:$0xff] %v9239_v45 }
 0x6e5   :  { %5683 = vmatmul.mubr.f32.vlgmr.msra.gmra.mxu0 %v8849_v59  ;;  %5716 = vmatpush3.msra.mxu1 %v8834_v58  ;;  %v9245_v58 = vld [vmem:[%s10059_s1 + $0x478] sm:$0xff]  ;;  %v9289_v59 = vld [vmem:[%s10059_s1 + $0x340] sm:$0xff] }
 0x6e6   :  { %5717 = vmatprep.mubr.msk.f32.mxu1 %vm6004_vm0, %v10272_v2  ;;  %3581 = vmatprep.mubr.f32.mxu0 %v10272_v2  ;;  %10524 = vst [vmem:[#allocation41_spill] sm:$0xff] %v9245_v58  ;;  %10531 = vst [vmem:[#allocation52_spill] sm:$0xff] %v9289_v59 }
 0x6e7   :  { %5720 = vmatprep.subr.mxu1 %v10272_v2  ;;  %3517 = vmatprep.subr.mxu0 %v9229_v62 }
 0x6e8   :  { %3518 = vmatpush1.msra.mxu0 %v9234_v57 }
 0x6e9   :  { %3519 = vmatprep.subr.mxu0 %v9239_v45 }
 0x6ea   :  { %3520 = vmatpush1.msra.mxu0 %v9245_v58 }
 0x6eb   :  { %3521 = vmatprep.subr.mxu0 %v9253_v17 }
 0x6ec   :  { %3522 = vmatpush1.msra.mxu0 %v9259_v44  ;;  %v9341_v44 = vld [vmem:[%s10059_s1 + $0x1f8] sm:$0xff] }
 0x6ed   :  { %3523 = vmatprep.subr.mxu0 %v9265_v21  ;;  %v9335_v21 = vld [vmem:[%s10059_s1 + $0x200] sm:$0xff]  ;;  %10540 = vst [vmem:[#allocation18_spill] sm:$0xff] %v9341_v44 }
 0x6ee   :  { %3524 = vmatpush1.msra.mxu0 %v9271_v23  ;;  %v9295_v23 = vld [vmem:[%s10059_s1 + $0x338] sm:$0xff]  ;;  %10539 = vst [vmem:[#allocation15_spill] sm:$0xff] %v9335_v21 }
 0x6ef   :  { %3525 = vmatprep.subr.mxu0 %v9277_v46  ;;  %10532 = vst [vmem:[#allocation53_spill] sm:$0xff] %v9295_v23  ;;  %v9301_v46 = vld [vmem:[%s10059_s1 + $0x2f0] sm:$0xff] }
 0x6f0   :  { %3526 = vmatpush1.msra.mxu0 %v9283_v38  ;;  %10533 = vst [vmem:[#allocation55_spill] sm:$0xff] %v9301_v46  ;;  %v9307_v38 = vld [vmem:[%s10059_s1 + $0x2e8] sm:$0xff] }
 0x6f1   :  { %3527 = vmatprep.subr.mxu0 %v9289_v59  ;;  %10534 = vst [vmem:[#allocation62_spill] sm:$0xff] %v9307_v38  ;;  %v9313_v59 = vld [vmem:[%s10059_s1 + $0x2a0] sm:$0xff] }
 0x6f2   :  { %3528 = vmatpush1.msra.mxu0 %v9295_v23  ;;  %10535 = vst [vmem:[#allocation64_spill] sm:$0xff] %v9313_v59  ;;  %v9318_v23 = vld [vmem:[%s10059_s1 + $0x298] sm:$0xff] }
 0x6f3   :  { %3529 = vmatprep.subr.mxu0 %v9301_v46  ;;  %10536 = vst [vmem:[#allocation63_spill] sm:$0xff] %v9318_v23  ;;  %v9323_v46 = vld [vmem:[%s10059_s1 + $0x250] sm:$0xff] }
 0x6f4   :  { %3530 = vmatpush1.msra.mxu0 %v9307_v38  ;;  %10537 = vst [vmem:[#allocation56_spill] sm:$0xff] %v9323_v46  ;;  %v9329_v38 = vld [vmem:[%s10059_s1 + $0x248] sm:$0xff] }
 0x6f5   :  { %3531 = vmatprep.subr.mxu0 %v9313_v59  ;;  %10538 = vst [vmem:[#allocation12_spill] sm:$0xff] %v9329_v38  ;;  %v9347_v59 = vld [vmem:[%s10059_s1 + $0x1b0] sm:$0xff] }
 0x6f6   :  { %3532 = vmatpush1.msra.mxu0 %v9318_v23  ;;  %10541 = vst [vmem:[#allocation21_spill] sm:$0xff] %v9347_v59  ;;  %v9353_v23 = vld [vmem:[%s10059_s1 + $0x1a8] sm:$0xff] }
 0x6f7   :  { %3533 = vmatprep.subr.mxu0 %v9323_v46  ;;  %10542 = vst [vmem:[#allocation24_spill] sm:$0xff] %v9353_v23  ;;  %v9359_v46 = vld [vmem:[%s10059_s1 + $0x160] sm:$0xff] }
 0x6f8   :  { %3534 = vmatpush1.msra.mxu0 %v9329_v38  ;;  %10543 = vst [vmem:[#allocation27_spill] sm:$0xff] %v9359_v46  ;;  %v9365_v38 = vld [vmem:[%s10059_s1 + $0x158] sm:$0xff] }
 0x6f9   :  { %3535 = vmatprep.subr.mxu0 %v9335_v21  ;;  %10544 = vst [vmem:[#allocation30_spill] sm:$0xff] %v9365_v38  ;;  %v9371_v21 = vld [vmem:[%s10059_s1 + $0x110] sm:$0xff] }
 0x6fa   :  { %3536 = vmatpush1.msra.mxu0 %v9341_v44  ;;  %10545 = vst [vmem:[#allocation33_spill] sm:$0xff] %v9371_v21  ;;  %v9377_v44 = vld [vmem:[%s10059_s1 + $0x108] sm:$0xff] }
 0x6fb   :  { %3537 = vmatprep.subr.mxu0 %v9347_v59  ;;  %10546 = vst [vmem:[#allocation36_spill] sm:$0xff] %v9377_v44  ;;  %v9383_v59 = vld [vmem:[%s10059_s1 + $0xc0] sm:$0xff] }
 0x6fc   :  { %3538 = vmatpush1.msra.mxu0 %v9353_v23  ;;  %10547 = vst [vmem:[#allocation39_spill] sm:$0xff] %v9383_v59  ;;  %v9389_v23 = vld [vmem:[%s10059_s1 + $0xb8] sm:$0xff] }
 0x6fd   :  { %3539 = vmatprep.subr.mxu0 %v9359_v46  ;;  %10548 = vst [vmem:[#allocation42_spill] sm:$0xff] %v9389_v23  ;;  %v9395_v46 = vld [vmem:[%s10059_s1 + $0x70] sm:$0xff] }
 0x6fe   :  { %3540 = vmatpush1.msra.mxu0 %v9365_v38  ;;  %10549 = vst [vmem:[#allocation45_spill] sm:$0xff] %v9395_v46  ;;  %v9401_v38 = vld [vmem:[%s10059_s1 + $0x68] sm:$0xff] }
 0x6ff   :  { %3541 = vmatprep.subr.mxu0 %v9371_v21  ;;  %10550 = vst [vmem:[#allocation48_spill] sm:$0xff] %v9401_v38  ;;  %v9407_v21 = vld [vmem:[%s10059_s1 + $0x20] sm:$0xff] }
 0x700   :  { %3542 = vmatpush1.msra.mxu0 %v9377_v44  ;;  %10551 = vst [vmem:[#allocation51_spill] sm:$0xff] %v9407_v21  ;;  %v9413_v44 = vld [vmem:[%s10059_s1 + $0x18] sm:$0xff] }
 0x701   :  { %3543 = vmatprep.subr.mxu0 %v9383_v59  ;;  %10552 = vst [vmem:[#allocation54_spill] sm:$0xff] %v9413_v44 }
 0x702   :  { %3544 = vmatpush1.msra.mxu0 %v9389_v23 }
 0x703   :  { %3545 = vmatprep.subr.mxu0 %v9395_v46 }
 0x704   :  { %3546 = vmatpush1.msra.mxu0 %v9401_v38 }
 0x705   :  { %3547 = vmatprep.subr.mxu0 %v9407_v21 }
 0x706   :  { %3548 = vmatpush1.msra.mxu0 %v9413_v44 }
 0x707   :  { %3719 = vmatprep.subr.mxu0 %v8791_v54 }
 0x763   :  { %v2948_v23 = vpop.f32.mrf.mxu0  ;;  %v3067_v17 = vpop.f32.mrf.mxu1 }
 0x764   :  { %2952 = vst.msk [vmem:[#allocation2 + $0x8] sm:$0x3] %vm909_vm3, %v2948_v23  ;;  %v3194_v57 = vrot.slane %v3067_v17, 4  ;;  %v9425_v17 = vld [vmem:[%s10061_s2 + $0x3] ss:$0 sm:$0xff] }
 0x765   :  { %v5614_v59 = vpop.f32.mrf.mxu0  ;;  %v3069_v58 = vpop.f32.mrf.mxu1 }
 0x766   :  { %v3200_v9 = vadd.f32 %v3194_v57, %v10513_v20  ;;  %v3195_v51 = vrot.slane %v3069_v58, 4 }
 0x768   :  { %v3201_v54 = vadd.f32 %v3195_v51, %v10514_v48  ;;  %v3375_v48 = vrot.slane %v8846_v4, 6  ;;  %v9445_v4 = vld [vmem:[%s10059_s1 + $0x488] sm:$0xff] }
 0x784   :  { %v3138_v46 = vpop.f32.mrf.mxu0  ;;  %v3269_v45 = vpop.f32.mrf.mxu1 }
 0x785   :  { %v3346_v19 = vrot.slane %v3269_v45, 4  ;;  %v3196_v57 = vrot.slane %v3138_v46, 4 }
 0x786   :  { %v5649_v62 = vpop.f32.mrf.mxu0  ;;  %v3271_v21 = vpop.f32.mrf.mxu1 }
 0x787   :  { %v3350_v38 = vadd.f32 %v3346_v19, %v3200_v9  ;;  %v3347_v44 = vrot.slane %v3271_v21, 4  ;;  %v3202_v21 = vadd.f32 %v3196_v57, %v10476_v37  ;;  %v10583_v57 = vld [vmem:[#allocation33_spill] sm:$0xff] }
 0x789   :  { %v3352_v29 = vmul.f32 0.5, %v3350_v38  ;;  %v3351_v40 = vadd.f32 %v3347_v44, %v3201_v54 }
 0x78b   :  { %5985 = vtanh.f32 %v3352_v29  ;;  %v3353_v23 = vmul.f32 0.5, %v3351_v40 }
 0x78d   :  { %5987 = vtanh.f32 %v3353_v23 }
 0x798   :  { %v5986_v59 = vpop.eup %5985 }
 0x799   :  { %v3356_v62 = vmul.f32 0.5, %v5986_v59 }
 0x79a   :  { %v5988_v40 = vpop.eup %5987 }
 0x79b   :  { %v3358_v58 = vadd.f32 0.5, %v3356_v62  ;;  %v3357_v38 = vmul.f32 0.5, %v5988_v40  ;;  %v9438_v62 = vld [vmem:[%s10059_s1 + $0x4d8] sm:$0xff] }
 0x79c   :  { %v9658_v40 = vld [vmem:[%s10059_s1 + $0x4f8] sm:$0xff] }
 0x79d   :  { %v3359_v54 = vadd.f32 0.5, %v3357_v38  ;;  %v9663_v38 = vld [vmem:[%s10059_s1 + $0x4a8] sm:$0xff] }
 0x79f   :  { %v3373_v23 = vsub.f32 1.0, %v3359_v54  ;;  %v3377_v59 = vmul.f32 %v3375_v48, %v3359_v54  ;;  %v9463_v48 = vld [vmem:[%s10059_s1 + $0x3e8] sm:$0xff]  ;;  %v9672_v54 = vld [vmem:[%s10059_s1 + $0x458] sm:$0xff] }
 0x7a5   :  { %v3340_v45 = vpop.f32.mrf.mxu0 }
 0x7a6   :  { %v3366_v9 = vadd.f32 %v9425_v17, %v3340_v45 }
 0x7a7   :  { %v5684_v19 = vpop.f32.mrf.mxu0 }
 0x7a8   :  { %v3368_v29 = vrot.slane %v3366_v9, 4  ;;  %v10584_v9 = vld [vmem:[#allocation36_spill] sm:$0xff]  ;;  %v10585_v19 = vld [vmem:[#allocation39_spill] sm:$0xff] }
 0x7aa   :  { %v3370_v51 = vmul.f32 %v3368_v29, %v3358_v58  ;;  %v10586_v58 = vld [vmem:[#allocation42_spill] sm:$0xff]  ;;  %v10587_v29 = vld [vmem:[#allocation45_spill] sm:$0xff] }
 0x7ac   :  { %v3371_v44 = vadd.f32 %v3370_v51, %v3202_v21  ;;  %v10588_v21 = vld [vmem:[#allocation48_spill] sm:$0xff]  ;;  %v10589_v51 = vld [vmem:[#allocation51_spill] sm:$0xff] }
 0x7ae   :  { %5989 = vtanh.f32 %v3371_v44  ;;  %v10590_v44 = vld [vmem:[#allocation54_spill] sm:$0xff] }
 0x7bb   :  { %v5990_v20 = vpop.eup %5989 }
 0x7bc   :  { %v3374_v39 = vmul.f32 %v5990_v20, %v3373_v23  ;;  %v9454_v20 = vld [vmem:[%s10059_s1 + $0x438] sm:$0xff]  ;;  %v9679_v23 = vld [vmem:[%s10059_s1 + $0x408] sm:$0xff] }
 0x7be   :  { %v9430_v46 = vadd.f32 %v3377_v59, %v3374_v39  ;;  %v10582_v39 = vld [vmem:[#allocation30_spill] sm:$0xff]  ;;  %v9686_v59 = vld [vmem:[%s10059_s1 + $0x3b8] sm:$0xff] }
 0x7c0   :  { %v9433_v45 = vrot.slane %v9430_v46, 4 }
 0x7c2   :  { %5718 = vmatmul.mubr.f32.vlgmr.msra.gmra.mxu1 %v9433_v45  ;;  %3582 = vmatmul.mubr.f32.vlgmr.msra.gmra.mxu0 %v9433_v45 }
 0x7c3   :  { %5721 = vmatpush3.msra.mxu1 %v9438_v62  ;;  %3720 = vmatpush1.msra.mxu0 %v8854_v18  ;;  %v9472_v18 = vld [vmem:[%s10059_s1 + $0x398] sm:$0xff] }
 0x7c4   :  { %5722 = vmatprep.subr.mxu1 %v10272_v2  ;;  %3721 = vmatprep.subr.mxu0 %v8859_v13  ;;  %v9481_v13 = vld [vmem:[%s10059_s1 + $0x348] sm:$0xff] }
 0x7c5   :  { %5723 = vmatpush3.msra.mxu1 %v9445_v4  ;;  %3722 = vmatpush1.msra.mxu0 %v8866_v27  ;;  %v9490_v27 = vld [vmem:[%s10059_s1 + $0x2f8] sm:$0xff] }
 0x7c6   :  { %5724 = vmatprep.subr.mxu1 %v10272_v2  ;;  %3723 = vmatprep.subr.mxu0 %v8873_v25  ;;  %v9499_v25 = vld [vmem:[%s10059_s1 + $0x2a8] sm:$0xff] }
 0x7c7   :  { %5725 = vmatpush3.msra.mxu1 %v9454_v20  ;;  %3724 = vmatpush1.msra.mxu0 %v8880_v56  ;;  %v9508_v56 = vld [vmem:[%s10059_s1 + $0x258] sm:$0xff] }
 0x7c8   :  { %5726 = vmatprep.subr.mxu1 %v10272_v2  ;;  %3725 = vmatprep.subr.mxu0 %v8887_v30  ;;  %v9517_v30 = vld [vmem:[%s10059_s1 + $0x208] sm:$0xff] }
 0x7c9   :  { %5727 = vmatpush3.msra.mxu1 %v9463_v48  ;;  %3726 = vmatpush1.msra.mxu0 %v8894_v24  ;;  %v9526_v24 = vld [vmem:[%s10059_s1 + $0x1b8] sm:$0xff] }
 0x7ca   :  { %5728 = vmatprep.subr.mxu1 %v10272_v2  ;;  %3727 = vmatprep.subr.mxu0 %v8901_v47  ;;  %v9535_v47 = vld [vmem:[%s10059_s1 + $0x168] sm:$0xff] }
 0x7cb   :  { %5729 = vmatpush3.msra.mxu1 %v9472_v18  ;;  %3728 = vmatpush1.msra.mxu0 %v8908_v26  ;;  %v9544_v26 = vld [vmem:[%s10059_s1 + $0x118] sm:$0xff] }
 0x7cc   :  { %5730 = vmatprep.subr.mxu1 %v10272_v2  ;;  %3729 = vmatprep.subr.mxu0 %v8915_v60  ;;  %v9553_v60 = vld [vmem:[%s10059_s1 + $0xc8] sm:$0xff] }
 0x7cd   :  { %5731 = vmatpush3.msra.mxu1 %v9481_v13  ;;  %3730 = vmatpush1.msra.mxu0 %v8922_v28  ;;  %v9562_v28 = vld [vmem:[%s10059_s1 + $0x78] sm:$0xff] }
 0x7ce   :  { %5732 = vmatprep.subr.mxu1 %v10272_v2  ;;  %3731 = vmatprep.subr.mxu0 %v8929_v50  ;;  %v9571_v50 = vld [vmem:[%s10059_s1 + $0x28] sm:$0xff] }
 0x7cf   :  { %5733 = vmatpush3.msra.mxu1 %v9490_v27  ;;  %3732 = vmatpush1.msra.mxu0 %v8936_v35  ;;  %v10553_v35 = vld [vmem:[#allocation28_spill] sm:$0xff] }
 0x7d0   :  { %5734 = vmatprep.subr.mxu1 %v10272_v2  ;;  %3733 = vmatprep.subr.mxu0 %v8943_v11  ;;  %v10554_v11 = vld [vmem:[#allocation29_spill] sm:$0xff] }
 0x7d1   :  { %5735 = vmatpush3.msra.mxu1 %v9499_v25  ;;  %3734 = vmatpush1.msra.mxu0 %v8950_v14  ;;  %v10555_v14 = vld [vmem:[#allocation31_spill] sm:$0xff] }
 0x7d2   :  { %5736 = vmatprep.subr.mxu1 %v10272_v2  ;;  %3735 = vmatprep.subr.mxu0 %v8957_v5  ;;  %v10556_v5 = vld [vmem:[#allocation32_spill] sm:$0xff] }
 0x7d3   :  { %5737 = vmatpush3.msra.mxu1 %v9508_v56  ;;  %3736 = vmatpush1.msra.mxu0 %v8964_v49  ;;  %v10557_v49 = vld [vmem:[#allocation34_spill] sm:$0xff] }
 0x7d4   :  { %5738 = vmatprep.subr.mxu1 %v10272_v2  ;;  %3737 = vmatprep.subr.mxu0 %v8971_v63  ;;  %v10558_v63 = vld [vmem:[#allocation35_spill] sm:$0xff] }
 0x7d5   :  { %5739 = vmatpush3.msra.mxu1 %v9517_v30  ;;  %3738 = vmatpush1.msra.mxu0 %v8978_v32  ;;  %v10559_v32 = vld [vmem:[#allocation37_spill] sm:$0xff] }
 0x7d6   :  { %5740 = vmatprep.subr.mxu1 %v10272_v2  ;;  %3739 = vmatprep.subr.mxu0 %v8985_v6  ;;  %v10560_v6 = vld [vmem:[#allocation38_spill] sm:$0xff] }
 0x7d7   :  { %5741 = vmatpush3.msra.mxu1 %v9526_v24  ;;  %3740 = vmatpush1.msra.mxu0 %v8992_v41  ;;  %v10561_v41 = vld [vmem:[#allocation40_spill] sm:$0xff] }
 0x7d8   :  { %5742 = vmatprep.subr.mxu1 %v10272_v2  ;;  %3741 = vmatprep.subr.mxu0 %v8999_v10  ;;  %v10562_v10 = vld [vmem:[#allocation41_spill] sm:$0xff] }
 0x7d9   :  { %5743 = vmatpush3.msra.mxu1 %v9535_v47  ;;  %3742 = vmatpush1.msra.mxu0 %v9006_v7  ;;  %v10563_v7 = vld [vmem:[#allocation43_spill] sm:$0xff] }
 0x7da   :  { %5744 = vmatprep.subr.mxu1 %v10272_v2  ;;  %3743 = vmatprep.subr.mxu0 %v9013_v8  ;;  %v10564_v8 = vld [vmem:[#allocation44_spill] sm:$0xff] }
 0x7db   :  { %5745 = vmatpush3.msra.mxu1 %v9544_v26  ;;  %3744 = vmatpush1.msra.mxu0 %v9020_v61  ;;  %v10565_v61 = vld [vmem:[#allocation46_spill] sm:$0xff] }
 0x7dc   :  { %5746 = vmatprep.subr.mxu1 %v10272_v2  ;;  %3745 = vmatprep.subr.mxu0 %v9027_v52  ;;  %v10566_v52 = vld [vmem:[#allocation47_spill] sm:$0xff] }
 0x7dd   :  { %5747 = vmatpush3.msra.mxu1 %v9553_v60  ;;  %3746 = vmatpush1.msra.mxu0 %v9034_v42  ;;  %v10567_v42 = vld [vmem:[#allocation49_spill] sm:$0xff] }
 0x7de   :  { %5748 = vmatprep.subr.mxu1 %v10272_v2  ;;  %3747 = vmatprep.subr.mxu0 %v9041_v3  ;;  %v10568_v3 = vld [vmem:[#allocation50_spill] sm:$0xff] }
 0x7df   :  { %5749 = vmatpush3.msra.mxu1 %v9562_v28  ;;  %3748 = vmatpush1.msra.mxu0 %v9048_v12  ;;  %v10569_v12 = vld [vmem:[#allocation52_spill] sm:$0xff] }
 0x7e0   :  { %5750 = vmatprep.subr.mxu1 %v10272_v2  ;;  %3749 = vmatprep.subr.mxu0 %v9055_v53  ;;  %v10570_v53 = vld [vmem:[#allocation53_spill] sm:$0xff] }
 0x7e1   :  { %5751 = vmatpush3.msra.mxu1 %v9571_v50  ;;  %5752 = vmatprep.mubr.msk.f32.mxu1 %vm6004_vm0, %v10272_v2 }
 0x7e2   :  { %3750 = vmatpush1.msra.mxu0 %v9064_v15  ;;  %3783 = vmatprep.mubr.f32.mxu0 %v10272_v2  ;;  %v10571_v15 = vld [vmem:[#allocation55_spill] sm:$0xff] }
 0x7e3   :  { %5753 = vmatmul.mubr.f32.vlgmr.msra.gmra.mxu1 %v9433_v45  ;;  %3784 = vmatmul.mubr.f32.vlgmr.msra.gmra.mxu0 %v9433_v45 }
 0x7e4   :  { %5755 = vmatprep.subr.mxu1 %v10272_v2  ;;  %5787 = vmatprep.mubr.msk.f32.mxu1 %vm6004_vm0, %v10272_v2 }
 0x7e5   :  { %5756 = vmatpush3.msra.mxu1 %v9076_v16  ;;  %5790 = vmatprep.subr.mxu0 %v10272_v2  ;;  %v10572_v16 = vld [vmem:[#allocation62_spill] sm:$0xff] }
 0x7e6   :  { %5757 = vmatprep.subr.mxu1 %v10272_v2  ;;  %5822 = vmatprep.mubr.msk.f32.mxu0 %vm6004_vm0, %v10272_v2 }
 0x7e7   :  { %5758 = vmatpush3.msra.mxu1 %v9084_v1  ;;  %v10573_v1 = vld [vmem:[#allocation64_spill] sm:$0xff]  ;;  %5791 = vmatpush3.msra.mxu0 %v9658_v40 }
 0x7e8   :  { %5759 = vmatprep.subr.mxu1 %v10272_v2  ;;  %5792 = vmatprep.subr.mxu0 %v10272_v2 }
 0x7e9   :  { %5760 = vmatpush3.msra.mxu1 %v9094_v0  ;;  %v10574_v0 = vld [vmem:[#allocation63_spill] sm:$0xff]  ;;  %5793 = vmatpush3.msra.mxu0 %v9663_v38 }
 0x7ea   :  { %5761 = vmatprep.subr.mxu1 %v10272_v2  ;;  %5794 = vmatprep.subr.mxu0 %v10272_v2 }
 0x7eb   :  { %5762 = vmatpush3.msra.mxu1 %v9103_v43  ;;  %v10575_v43 = vld [vmem:[#allocation56_spill] sm:$0xff]  ;;  %5795 = vmatpush3.msra.mxu0 %v9672_v54 }
 0x7ec   :  { %5763 = vmatprep.subr.mxu1 %v10272_v2  ;;  %5796 = vmatprep.subr.mxu0 %v10272_v2 }
 0x7ed   :  { %5764 = vmatpush3.msra.mxu1 %v9112_v36  ;;  %v10576_v36 = vld [vmem:[#allocation12_spill] sm:$0xff]  ;;  %5797 = vmatpush3.msra.mxu0 %v9679_v23 }
 0x7ee   :  { %5765 = vmatprep.subr.mxu1 %v10272_v2  ;;  %5798 = vmatprep.subr.mxu0 %v10272_v2 }
 0x7ef   :  { %5766 = vmatpush3.msra.mxu1 %v9121_v55  ;;  %v10577_v55 = vld [vmem:[#allocation15_spill] sm:$0xff]  ;;  %5799 = vmatpush3.msra.mxu0 %v9686_v59 }
 0x7f0   :  { %5767 = vmatprep.subr.mxu1 %v10272_v2  ;;  %5800 = vmatprep.subr.mxu0 %v10272_v2 }
 0x7f1   :  { %5768 = vmatpush3.msra.mxu1 %v9130_v33  ;;  %v10578_v33 = vld [vmem:[#allocation18_spill] sm:$0xff] }
 0x7f2   :  { %5769 = vmatprep.subr.mxu1 %v10272_v2 }
 0x7f3   :  { %5770 = vmatpush3.msra.mxu1 %v9139_v34  ;;  %v10579_v34 = vld [vmem:[#allocation21_spill] sm:$0xff] }
 0x7f4   :  { %5771 = vmatprep.subr.mxu1 %v10272_v2 }
 0x7f5   :  { %5772 = vmatpush3.msra.mxu1 %v9148_v22  ;;  %v10580_v22 = vld [vmem:[#allocation24_spill] sm:$0xff] }
 0x7f6   :  { %5773 = vmatprep.subr.mxu1 %v10272_v2 }
 0x7f7   :  { %5774 = vmatpush3.msra.mxu1 %v9157_v31  ;;  %v10581_v31 = vld [vmem:[#allocation27_spill] sm:$0xff] }
 0x7f8   :  { %5775 = vmatprep.subr.mxu1 %v10272_v2 }
 0x7f9   :  { %5776 = vmatpush3.msra.mxu1 %v10553_v35  ;;  %v9700_v35 = vld [vmem:[%s10059_s1 + $0x318] sm:$0xff] }
 0x7fa   :  { %5777 = vmatprep.subr.mxu1 %v10272_v2 }
 0x7fb   :  { %5778 = vmatpush3.msra.mxu1 %v10554_v11  ;;  %v9707_v11 = vld [vmem:[%s10059_s1 + $0x2c8] sm:$0xff] }
 0x7fc   :  { %5779 = vmatprep.subr.mxu1 %v10272_v2 }
 0x7fd   :  { %5780 = vmatpush3.msra.mxu1 %v10555_v14  ;;  %v9714_v14 = vld [vmem:[%s10059_s1 + $0x278] sm:$0xff] }
 0x7fe   :  { %5781 = vmatprep.subr.mxu1 %v10272_v2 }
 0x7ff   :  { %5782 = vmatpush3.msra.mxu1 %v10556_v5  ;;  %v9721_v5 = vld [vmem:[%s10059_s1 + $0x228] sm:$0xff] }
 0x800   :  { %5783 = vmatprep.subr.mxu1 %v10272_v2 }
 0x801   :  { %5784 = vmatpush3.msra.mxu1 %v10557_v49  ;;  %v9728_v49 = vld [vmem:[%s10059_s1 + $0x1d8] sm:$0xff] }
 0x802   :  { %5785 = vmatprep.subr.mxu1 %v10272_v2 }
 0x803   :  { %5786 = vmatpush3.msra.mxu1 %v10558_v63  ;;  %v9735_v63 = vld [vmem:[%s10059_s1 + $0x188] sm:$0xff] }
 0x804   :  { %5788 = vmatmul.mubr.f32.vlgmr.msra.gmra.mxu1 %v9433_v45  ;;  %4033 = vmatprep.subr.mxu1 %v10559_v32  ;;  %v9693_v45 = vld [vmem:[%s10059_s1 + $0x368] sm:$0xff]  ;;  %v9742_v32 = vld [vmem:[%s10059_s1 + $0x138] sm:$0xff] }
 0x805   :  { %4034 = vmatpush1.msra.mxu1 %v10560_v6  ;;  %4097 = vmatprep.mubr.f32.mxu1 %v10272_v2  ;;  %v9749_v6 = vld [vmem:[%s10059_s1 + $0xe8] sm:$0xff] }
 0x806   :  { %4035 = vmatprep.subr.mxu1 %v10561_v41  ;;  %5801 = vmatpush3.msra.mxu0 %v9693_v45  ;;  %v9755_v41 = vld [vmem:[%s10059_s1 + $0x98] sm:$0xff] }
 0x807   :  { %4036 = vmatpush1.msra.mxu1 %v10562_v10  ;;  %5802 = vmatprep.subr.mxu0 %v10272_v2  ;;  %v4220_v10 = vld [vmem:[%s10059_s1 + $0x4b8] sm:$0xff] }
 0x808   :  { %4037 = vmatprep.subr.mxu1 %v10563_v7  ;;  %5803 = vmatpush3.msra.mxu0 %v9700_v35  ;;  %v9764_v7 = vld [vmem:[%s10059_s1 + $0x48] sm:$0xff] }
 0x809   :  { %4038 = vmatpush1.msra.mxu1 %v10564_v8  ;;  %5804 = vmatprep.subr.mxu0 %v10272_v2 }
 0x80a   :  { %4039 = vmatprep.subr.mxu1 %v10565_v61  ;;  %5805 = vmatpush3.msra.mxu0 %v9707_v11 }
 0x80b   :  { %4040 = vmatpush1.msra.mxu1 %v10566_v52  ;;  %5806 = vmatprep.subr.mxu0 %v10272_v2 }
 0x80c   :  { %4041 = vmatprep.subr.mxu1 %v10567_v42  ;;  %5807 = vmatpush3.msra.mxu0 %v9714_v14 }
 0x80d   :  { %4042 = vmatpush1.msra.mxu1 %v10568_v3  ;;  %5808 = vmatprep.subr.mxu0 %v10272_v2 }
 0x80e   :  { %4043 = vmatprep.subr.mxu1 %v10569_v12  ;;  %5809 = vmatpush3.msra.mxu0 %v9721_v5 }
 0x80f   :  { %4044 = vmatpush1.msra.mxu1 %v10570_v53  ;;  %5810 = vmatprep.subr.mxu0 %v10272_v2 }
 0x810   :  { %4045 = vmatprep.subr.mxu1 %v10571_v15  ;;  %5811 = vmatpush3.msra.mxu0 %v9728_v49 }
 0x811   :  { %4046 = vmatpush1.msra.mxu1 %v10572_v16  ;;  %5812 = vmatprep.subr.mxu0 %v10272_v2 }
 0x812   :  { %4047 = vmatprep.subr.mxu1 %v10573_v1  ;;  %5813 = vmatpush3.msra.mxu0 %v9735_v63  ;;  %v10591_v1 = vld [vmem:[#allocation58_spill] sm:$0xff] }
 0x813   :  { %4048 = vmatpush1.msra.mxu1 %v10574_v0  ;;  %5814 = vmatprep.subr.mxu0 %v10272_v2 }
 0x814   :  { %4049 = vmatprep.subr.mxu1 %v10575_v43  ;;  %5815 = vmatpush3.msra.mxu0 %v9742_v32 }
 0x815   :  { %4050 = vmatpush1.msra.mxu1 %v10576_v36  ;;  %5816 = vmatprep.subr.mxu0 %v10272_v2 }
 0x816   :  { %4051 = vmatprep.subr.mxu1 %v10577_v55  ;;  %5817 = vmatpush3.msra.mxu0 %v9749_v6 }
 0x817   :  { %4052 = vmatpush1.msra.mxu1 %v10578_v33  ;;  %5818 = vmatprep.subr.mxu0 %v10272_v2 }
 0x818   :  { %4053 = vmatprep.subr.mxu1 %v10579_v34  ;;  %5819 = vmatpush3.msra.mxu0 %v9755_v41 }
 0x819   :  { %4054 = vmatpush1.msra.mxu1 %v10580_v22  ;;  %5820 = vmatprep.subr.mxu0 %v10272_v2  ;;  %v10592_v22 = vld [vmem:[#allocation59_spill] sm:$0xff] }
 0x81a   :  { %4055 = vmatprep.subr.mxu1 %v10581_v31  ;;  %5821 = vmatpush3.msra.mxu0 %v9764_v7 }
 0x81b   :  { %4056 = vmatpush1.msra.mxu1 %v10582_v39  ;;  %5825 = vmatprep.subr.mxu0 %v10272_v2 }
 0x81c   :  { %4057 = vmatprep.subr.mxu1 %v10583_v57 }
 0x81d   :  { %4058 = vmatpush1.msra.mxu1 %v10584_v9 }
 0x81e   :  { %4059 = vmatprep.subr.mxu1 %v10585_v19 }
 0x81f   :  { %4060 = vmatpush1.msra.mxu1 %v10586_v58 }
 0x820   :  { %4061 = vmatprep.subr.mxu1 %v10587_v29 }
 0x821   :  { %4062 = vmatpush1.msra.mxu1 %v10588_v21 }
 0x822   :  { %4063 = vmatprep.subr.mxu1 %v10589_v51 }
 0x823   :  { %4064 = vmatpush1.msra.mxu1 %v10590_v44 }
 0x824   :  { %4226 = vmatprep.subr.mxu1 %v4220_v10 }
 0x882   :  { %v3464_v8 = vpop.f32.mrf.mxu1  ;;  %v3583_v52 = vpop.f32.mrf.mxu0 }
 0x883   :  { %3468 = vst.msk [vmem:[#allocation2 + $0xa] sm:$0x3] %vm909_vm3, %v3464_v8  ;;  %v3710_v53 = vrot.slane %v3583_v52, 2 }
 0x884   :  { %v5719_v61 = vpop.f32.mrf.mxu1  ;;  %v3585_v42 = vpop.f32.mrf.mxu0 }
 0x885   :  { %v3716_v0 = vadd.f32 %v3710_v53, %v10591_v1  ;;  %v3711_v33 = vrot.slane %v3585_v42, 2 }
 0x887   :  { %v3717_v31 = vadd.f32 %v3711_v33, %v10592_v22  ;;  %v4213_v33 = vld [vmem:[%s10059_s1 + $0x410] sm:$0xff]  ;;  %v4208_v22 = vld [vmem:[%s10059_s1 + $0x378] sm:$0xff] }
 0x8a3   :  { %v3654_v3 = vpop.f32.mrf.mxu1  ;;  %v3785_v12 = vpop.f32.mrf.mxu0 }
 0x8a4   :  { %v3862_v16 = vrot.slane %v3785_v12, 2  ;;  %v3712_v29 = vrot.slane %v3654_v3, 2 }
 0x8a5   :  { %v5754_v15 = vpop.f32.mrf.mxu1  ;;  %v3787_v55 = vpop.f32.mrf.mxu0 }
 0x8a6   :  { %v3866_v43 = vadd.f32 %v3862_v16, %v3716_v0  ;;  %v3863_v34 = vrot.slane %v3787_v55, 2  ;;  %v3718_v8 = vadd.f32 %v3712_v29, %v10476_v37  ;;  %v3891_v16 = vrot.slane %v9430_v46, 6  ;;  %v4217_v37 = vld [vmem:[%s10059_s1 + $0x468] sm:$0xff]  ;;  %v4216_v46 = vld [vmem:[%s10059_s1 + $0x460] sm:$0xff]  ;;  %v4214_v55 = vld [vmem:[%s10059_s1 + $0x418] sm:$0xff] }
 0x8a7   :  { %v4187_v29 = vld [vmem:[%s10059_s1 + $0x148] sm:$0xff] }
 0x8a8   :  { %v3868_v36 = vmul.f32 0.5, %v3866_v43  ;;  %v3867_v39 = vadd.f32 %v3863_v34, %v3717_v31  ;;  %v4211_v34 = vld [vmem:[%s10059_s1 + $0x3c8] sm:$0xff] }
 0x8a9   :  { %v4205_v31 = vld [vmem:[%s10059_s1 + $0x328] sm:$0xff] }
 0x8aa   :  { %5991 = vtanh.f32 %v3868_v36  ;;  %v3869_v57 = vmul.f32 0.5, %v3867_v39  ;;  %v4202_v39 = vld [vmem:[%s10059_s1 + $0x2d8] sm:$0xff] }
 0x8ac   :  { %5993 = vtanh.f32 %v3869_v57  ;;  %v4199_v57 = vld [vmem:[%s10059_s1 + $0x288] sm:$0xff] }
 0x8b7   :  { %v5992_v9 = vpop.eup %5991 }
 0x8b8   :  { %v3872_v19 = vmul.f32 0.5, %v5992_v9  ;;  %v4196_v9 = vld [vmem:[%s10059_s1 + $0x238] sm:$0xff] }
 0x8b9   :  { %v5994_v42 = vpop.eup %5993 }
 0x8ba   :  { %v3874_v44 = vadd.f32 0.5, %v3872_v19  ;;  %v3873_v12 = vmul.f32 0.5, %v5994_v42  ;;  %v4193_v19 = vld [vmem:[%s10059_s1 + $0x1e8] sm:$0xff] }
 0x8bc   :  { %v3875_v53 = vadd.f32 0.5, %v3873_v12 }
 0x8be   :  { %v3889_v15 = vsub.f32 1.0, %v3875_v53  ;;  %v3893_v0 = vmul.f32 %v3891_v16, %v3875_v53 }
 0x8c4   :  { %v3856_v58 = vpop.f32.mrf.mxu1 }
 0x8c5   :  { %v3882_v21 = vadd.f32 %v9425_v17, %v3856_v58  ;;  %v4219_v17 = vld [vmem:[%s10059_s1 + $0x4b0] sm:$0xff]  ;;  %v4190_v58 = vld [vmem:[%s10059_s1 + $0x198] sm:$0xff] }
 0x8c6   :  { %v5789_v51 = vpop.f32.mrf.mxu1 }
 0x8c7   :  { %v3884_v10 = vrot.slane %v3882_v21, 2  ;;  %v4184_v21 = vld [vmem:[%s10059_s1 + $0xf8] sm:$0xff]  ;;  %v4181_v51 = vld [vmem:[%s10059_s1 + $0xa8] sm:$0xff] }
 0x8c9   :  { %v3886_v61 = vmul.f32 %v3884_v10, %v3874_v44  ;;  %v4178_v44 = vld [vmem:[%s10059_s1 + $0x58] sm:$0xff]  ;;  %v4175_v10 = vld [vmem:[%s10059_s1 + $0x8] sm:$0xff] }
 0x8cb   :  { %v3887_v52 = vadd.f32 %v3886_v61, %v3718_v8  ;;  %v4212_v8 = vld [vmem:[%s10059_s1 + $0x3d0] sm:$0xff] }
 0x8cd   :  { %5995 = vtanh.f32 %v3887_v52 }
 0x8da   :  { %v5996_v1 = vpop.eup %5995 }
 0x8db   :  { %v3890_v43 = vmul.f32 %v5996_v1, %v3889_v15 }
 0x8dd   :  { %v3894_v3 = vadd.f32 %v3893_v0, %v3890_v43  ;;  %v10594_v0 = vld [vmem:[#allocation61_spill] sm:$0xff] }
 0x8df   :  { %v9776_v36 = vrot.slane %v3894_v3, 6 }
 0x8e1   :  { %5823 = vmatmul.mubr.f32.vlgmr.msra.gmra.mxu0 %v9776_v36  ;;  %4098 = vmatmul.mubr.f32.vlgmr.msra.gmra.mxu1 %v9776_v36 }
 0x8e2   :  { %5826 = vmatpush3.msra.mxu0 %v9438_v62  ;;  %4227 = vmatpush1.msra.mxu1 %v4219_v17  ;;  %v4210_v62 = vld [vmem:[%s10059_s1 + $0x3c0] sm:$0xff] }
 0x8e3   :  { %5827 = vmatprep.subr.mxu0 %v10272_v2  ;;  %4228 = vmatprep.subr.mxu1 %v4217_v37 }
 0x8e4   :  { %5828 = vmatpush3.msra.mxu0 %v9445_v4  ;;  %4229 = vmatpush1.msra.mxu1 %v4216_v46  ;;  %v4207_v4 = vld [vmem:[%s10059_s1 + $0x370] sm:$0xff] }
 0x8e5   :  { %5829 = vmatprep.subr.mxu0 %v10272_v2  ;;  %4230 = vmatprep.subr.mxu1 %v4214_v55  ;;  %v4597_v55 = vld [vmem:[%s10061_s2 + $0x3] ss:$0 sm:$0xff] }
 0x8e6   :  { %5830 = vmatpush3.msra.mxu0 %v9454_v20  ;;  %4231 = vmatpush1.msra.mxu1 %v4213_v33  ;;  %v4204_v20 = vld [vmem:[%s10059_s1 + $0x320] sm:$0xff] }
 0x8e7   :  { %5831 = vmatprep.subr.mxu0 %v10272_v2  ;;  %4232 = vmatprep.subr.mxu1 %v4211_v34 }
 0x8e8   :  { %5832 = vmatpush3.msra.mxu0 %v9463_v48  ;;  %4233 = vmatpush1.msra.mxu1 %v4210_v62  ;;  %v4201_v48 = vld [vmem:[%s10059_s1 + $0x2d0] sm:$0xff] }
 0x8e9   :  { %5833 = vmatprep.subr.mxu0 %v10272_v2  ;;  %4234 = vmatprep.subr.mxu1 %v4208_v22 }
 0x8ea   :  { %5834 = vmatpush3.msra.mxu0 %v9472_v18  ;;  %4235 = vmatpush1.msra.mxu1 %v4207_v4  ;;  %v4198_v18 = vld [vmem:[%s10059_s1 + $0x280] sm:$0xff] }
 0x8eb   :  { %5835 = vmatprep.subr.mxu0 %v10272_v2  ;;  %4236 = vmatprep.subr.mxu1 %v4205_v31  ;;  %v10595_v4 = vld [vmem:[#allocation65_spill] sm:$0xff] }
 0x8ec   :  { %5836 = vmatpush3.msra.mxu0 %v9481_v13  ;;  %4237 = vmatpush1.msra.mxu1 %v4204_v20  ;;  %v4195_v13 = vld [vmem:[%s10059_s1 + $0x230] sm:$0xff] }
 0x8ed   :  { %5837 = vmatprep.subr.mxu0 %v10272_v2  ;;  %4238 = vmatprep.subr.mxu1 %v4202_v39 }
 0x8ee   :  { %5838 = vmatpush3.msra.mxu0 %v9490_v27  ;;  %4239 = vmatpush1.msra.mxu1 %v4201_v48  ;;  %v4192_v27 = vld [vmem:[%s10059_s1 + $0x1e0] sm:$0xff] }
 0x8ef   :  { %5839 = vmatprep.subr.mxu0 %v10272_v2  ;;  %4240 = vmatprep.subr.mxu1 %v4199_v57 }
 0x8f0   :  { %5840 = vmatpush3.msra.mxu0 %v9499_v25  ;;  %4241 = vmatpush1.msra.mxu1 %v4198_v18  ;;  %v4189_v25 = vld [vmem:[%s10059_s1 + $0x190] sm:$0xff] }
 0x8f1   :  { %5841 = vmatprep.subr.mxu0 %v10272_v2  ;;  %4242 = vmatprep.subr.mxu1 %v4196_v9 }
 0x8f2   :  { %5842 = vmatpush3.msra.mxu0 %v9508_v56  ;;  %4243 = vmatpush1.msra.mxu1 %v4195_v13  ;;  %v4186_v56 = vld [vmem:[%s10059_s1 + $0x140] sm:$0xff] }
 0x8f3   :  { %5843 = vmatprep.subr.mxu0 %v10272_v2  ;;  %4244 = vmatprep.subr.mxu1 %v4193_v19 }
 0x8f4   :  { %5844 = vmatpush3.msra.mxu0 %v9517_v30  ;;  %4245 = vmatpush1.msra.mxu1 %v4192_v27  ;;  %v4183_v30 = vld [vmem:[%s10059_s1 + $0xf0] sm:$0xff] }
 0x8f5   :  { %5845 = vmatprep.subr.mxu0 %v10272_v2  ;;  %4246 = vmatprep.subr.mxu1 %v4190_v58 }
 0x8f6   :  { %5846 = vmatpush3.msra.mxu0 %v9526_v24  ;;  %4247 = vmatpush1.msra.mxu1 %v4189_v25  ;;  %v4180_v24 = vld [vmem:[%s10059_s1 + $0xa0] sm:$0xff] }
 0x8f7   :  { %5847 = vmatprep.subr.mxu0 %v10272_v2  ;;  %4248 = vmatprep.subr.mxu1 %v4187_v29 }
 0x8f8   :  { %5848 = vmatpush3.msra.mxu0 %v9535_v47  ;;  %4249 = vmatpush1.msra.mxu1 %v4186_v56  ;;  %v4177_v47 = vld [vmem:[%s10059_s1 + $0x50] sm:$0xff] }
 0x8f9   :  { %5849 = vmatprep.subr.mxu0 %v10272_v2  ;;  %4250 = vmatprep.subr.mxu1 %v4184_v21  ;;  %v4479_v21 = vld [vmem:[%s10062_s3 + $0x8] sm:$0xff] }
 0x8fa   :  { %5850 = vmatpush3.msra.mxu0 %v9544_v26  ;;  %4251 = vmatpush1.msra.mxu1 %v4183_v30  ;;  %v4174_v26 = vld [vmem:[%s10059_s1] sm:$0xff] }
 0x8fb   :  { %5851 = vmatprep.subr.mxu0 %v10272_v2  ;;  %4252 = vmatprep.subr.mxu1 %v4181_v51  ;;  %v4481_v30 = vld [vmem:[#allocation2] sm:$0xff]  ;;  %v4480_v51 = vld [vmem:[%s10062_s3 + $0x10] sm:$0xff] }
 0x8fc   :  { %5852 = vmatpush3.msra.mxu0 %v9553_v60  ;;  %4253 = vmatpush1.msra.mxu1 %v4180_v24  ;;  %v4221_v60 = vld [vmem:[%s10059_s1 + $0x4c0] sm:$0xff]  ;;  %v4484_v24 = vld [vmem:[%s10063_s4 + $0x8] sm:$0xff] }
 0x8fd   :  { %5853 = vmatprep.subr.mxu0 %v10272_v2  ;;  %4254 = vmatprep.subr.mxu1 %v4178_v44  ;;  %v4483_v44 = vld [vmem:[%s10063_s4] sm:$0xff] }
 0x8fe   :  { %5854 = vmatpush3.msra.mxu0 %v9562_v28  ;;  %4255 = vmatpush1.msra.mxu1 %v4177_v47  ;;  %v4218_v28 = vld [vmem:[%s10059_s1 + $0x470] sm:$0xff] }
 0x8ff   :  { %5855 = vmatprep.subr.mxu0 %v10272_v2  ;;  %4256 = vmatprep.subr.mxu1 %v4175_v10 }
 0x900   :  { %5856 = vmatpush3.msra.mxu0 %v9571_v50  ;;  %5857 = vmatprep.mubr.msk.f32.mxu0 %vm6004_vm0, %v10272_v2  ;;  %v4215_v50 = vld [vmem:[%s10059_s1 + $0x420] sm:$0xff] }
 0x901   :  { %4257 = vmatpush1.msra.mxu1 %v4174_v26  ;;  %4290 = vmatprep.mubr.f32.mxu1 %v10272_v2 }
 0x902   :  { %5858 = vmatmul.mubr.f32.vlgmr.msra.gmra.mxu0 %v9776_v36  ;;  %4291 = vmatmul.mubr.f32.vlgmr.msra.gmra.mxu1 %v9776_v36 }
 0x903   :  { %5860 = vmatprep.subr.mxu0 %v10272_v2  ;;  %5892 = vmatprep.mubr.msk.f32.mxu0 %vm6004_vm0, %v10272_v2 }
 0x904   :  { %5861 = vmatpush3.msra.mxu0 %v4221_v60  ;;  %5895 = vmatprep.subr.mxu1 %v10272_v2 }
 0x905   :  { %5862 = vmatprep.subr.mxu0 %v10272_v2  ;;  %5896 = vmatpush3.msra.mxu1 %v9658_v40  ;;  %v4209_v40 = vld [vmem:[%s10059_s1 + $0x380] sm:$0xff] }
 0x906   :  { %5863 = vmatpush3.msra.mxu0 %v4218_v28  ;;  %5897 = vmatprep.subr.mxu1 %v10272_v2 }
 0x907   :  { %5864 = vmatprep.subr.mxu0 %v10272_v2  ;;  %5898 = vmatpush3.msra.mxu1 %v9663_v38  ;;  %v4206_v38 = vld [vmem:[%s10059_s1 + $0x330] sm:$0xff] }
 0x908   :  { %5865 = vmatpush3.msra.mxu0 %v4215_v50  ;;  %5899 = vmatprep.subr.mxu1 %v10272_v2 }
 0x909   :  { %5866 = vmatprep.subr.mxu0 %v10272_v2  ;;  %5900 = vmatpush3.msra.mxu1 %v9672_v54  ;;  %v4203_v54 = vld [vmem:[%s10059_s1 + $0x2e0] sm:$0xff] }
 0x90a   :  { %5867 = vmatpush3.msra.mxu0 %v4212_v8  ;;  %5901 = vmatprep.subr.mxu1 %v10272_v2 }
 0x90b   :  { %5868 = vmatprep.subr.mxu0 %v10272_v2  ;;  %5902 = vmatpush3.msra.mxu1 %v9679_v23  ;;  %v4200_v23 = vld [vmem:[%s10059_s1 + $0x290] sm:$0xff] }
 0x90c   :  { %5869 = vmatpush3.msra.mxu0 %v4209_v40  ;;  %5903 = vmatprep.subr.mxu1 %v10272_v2 }
 0x90d   :  { %5870 = vmatprep.subr.mxu0 %v10272_v2  ;;  %5904 = vmatpush3.msra.mxu1 %v9686_v59  ;;  %v4197_v59 = vld [vmem:[%s10059_s1 + $0x240] sm:$0xff] }
 0x90e   :  { %5871 = vmatpush3.msra.mxu0 %v4206_v38  ;;  %5905 = vmatprep.subr.mxu1 %v10272_v2 }
 0x90f   :  { %5872 = vmatprep.subr.mxu0 %v10272_v2  ;;  %5906 = vmatpush3.msra.mxu1 %v9693_v45  ;;  %v4194_v45 = vld [vmem:[%s10059_s1 + $0x1f0] sm:$0xff] }
 0x910   :  { %5873 = vmatpush3.msra.mxu0 %v4203_v54  ;;  %5907 = vmatprep.subr.mxu1 %v10272_v2 }
 0x911   :  { %5874 = vmatprep.subr.mxu0 %v10272_v2  ;;  %5908 = vmatpush3.msra.mxu1 %v9700_v35  ;;  %v4191_v35 = vld [vmem:[%s10059_s1 + $0x1a0] sm:$0xff] }
 0x912   :  { %5875 = vmatpush3.msra.mxu0 %v4200_v23  ;;  %5909 = vmatprep.subr.mxu1 %v10272_v2 }
 0x913   :  { %5876 = vmatprep.subr.mxu0 %v10272_v2  ;;  %5910 = vmatpush3.msra.mxu1 %v9707_v11  ;;  %v4188_v11 = vld [vmem:[%s10059_s1 + $0x150] sm:$0xff] }
 0x914   :  { %5877 = vmatpush3.msra.mxu0 %v4197_v59  ;;  %5911 = vmatprep.subr.mxu1 %v10272_v2 }
 0x915   :  { %5878 = vmatprep.subr.mxu0 %v10272_v2  ;;  %5912 = vmatpush3.msra.mxu1 %v9714_v14  ;;  %v4185_v14 = vld [vmem:[%s10059_s1 + $0x100] sm:$0xff] }
 0x916   :  { %5879 = vmatpush3.msra.mxu0 %v4194_v45  ;;  %5913 = vmatprep.subr.mxu1 %v10272_v2 }
 0x917   :  { %5880 = vmatprep.subr.mxu0 %v10272_v2  ;;  %5914 = vmatpush3.msra.mxu1 %v9721_v5  ;;  %v4182_v5 = vld [vmem:[%s10059_s1 + $0xb0] sm:$0xff] }
 0x918   :  { %5881 = vmatpush3.msra.mxu0 %v4191_v35  ;;  %5915 = vmatprep.subr.mxu1 %v10272_v2 }
 0x919   :  { %5882 = vmatprep.subr.mxu0 %v10272_v2  ;;  %5916 = vmatpush3.msra.mxu1 %v9728_v49  ;;  %v4179_v49 = vld [vmem:[%s10059_s1 + $0x60] sm:$0xff] }
 0x91a   :  { %5883 = vmatpush3.msra.mxu0 %v4188_v11  ;;  %5917 = vmatprep.subr.mxu1 %v10272_v2 }
 0x91b   :  { %5884 = vmatprep.subr.mxu0 %v10272_v2  ;;  %5918 = vmatpush3.msra.mxu1 %v9735_v63  ;;  %v4176_v63 = vld [vmem:[%s10059_s1 + $0x10] sm:$0xff] }
 0x91c   :  { %5885 = vmatpush3.msra.mxu0 %v4185_v14  ;;  %5919 = vmatprep.subr.mxu1 %v10272_v2 }
 0x91d   :  { %5886 = vmatprep.subr.mxu0 %v10272_v2  ;;  %5920 = vmatpush3.msra.mxu1 %v9742_v32 }
 0x91e   :  { %5887 = vmatpush3.msra.mxu0 %v4182_v5  ;;  %5921 = vmatprep.subr.mxu1 %v10272_v2 }
 0x91f   :  { %5888 = vmatprep.subr.mxu0 %v10272_v2  ;;  %5922 = vmatpush3.msra.mxu1 %v9749_v6 }
 0x920   :  { %5889 = vmatpush3.msra.mxu0 %v4179_v49  ;;  %5923 = vmatprep.subr.mxu1 %v10272_v2 }
 0x921   :  { %5890 = vmatprep.subr.mxu0 %v10272_v2  ;;  %5924 = vmatpush3.msra.mxu1 %v9755_v41 }
 0x922   :  { %5891 = vmatpush3.msra.mxu0 %v4176_v63  ;;  %5925 = vmatprep.subr.mxu1 %v10272_v2 }
 0x923   :  { %5893 = vmatmul.mubr.f32.vlgmr.msra.gmra.mxu0 %v9776_v36  ;;  %5926 = vmatpush3.msra.mxu1 %v9764_v7  ;;  %v10593_v7 = vld [vmem:[#allocation60_spill] sm:$0xff] }
 0x924   :  { %5927 = vmatprep.mubr.msk.f32.mxu1 %vm6004_vm0, %v10272_v2  ;;  %5930 = vmatprep.subr.mxu0 %v10272_v2 }
 0x925   :  { %5943 = vmatprep.subr.mxu1 %v10272_v2  ;;  %5934 = vmatprep.mubr.msk.f32.mxu0 %vm6004_vm0, %v10272_v2 }
 0x9a1   :  { %v3980_v32 = vpop.f32.mrf.mxu0  ;;  %v4099_v41 = vpop.f32.mrf.mxu1 }
 0x9a2   :  { %3984 = vst.msk [vmem:[#allocation2 + $0xc] sm:$0x3] %vm909_vm3, %v3980_v32  ;;  %v4223_v53 = vadd.f32 %v4099_v41, %v10593_v7 }
 0x9a3   :  { %v5824_v6 = vpop.f32.mrf.mxu0  ;;  %v4101_v52 = vpop.f32.mrf.mxu1 }
 0x9a4   :  { %v4224_v43 = vadd.f32 %v4101_v52, %v10594_v0 }
 0x9c2   :  { %v4170_v61 = vpop.f32.mrf.mxu0  ;;  %v4292_v12 = vpop.f32.mrf.mxu1 }
 0x9c3   :  { %v4367_v15 = vadd.f32 %v4292_v12, %v4223_v53  ;;  %v4225_v31 = vadd.f32 %v4170_v61, %v10595_v4 }
 0x9c4   :  { %v5859_v42 = vpop.f32.mrf.mxu0  ;;  %v4294_v1 = vpop.f32.mrf.mxu1 }
 0x9c5   :  { %v4369_v16 = vmul.f32 0.5, %v4367_v15  ;;  %v4368_v3 = vadd.f32 %v4294_v1, %v4224_v43 }
 0x9c7   :  { %5997 = vtanh.f32 %v4369_v16  ;;  %v4370_v17 = vmul.f32 0.5, %v4368_v3 }
 0x9c9   :  { %5999 = vtanh.f32 %v4370_v17 }
 0x9d4   :  { %v5998_v37 = vpop.eup %5997 }
 0x9d5   :  { %v4373_v46 = vmul.f32 0.5, %v5998_v37 }
 0x9d6   :  { %v6000_v48 = vpop.eup %5999 }
 0x9d7   :  { %v4375_v34 = vadd.f32 0.5, %v4373_v46  ;;  %v4374_v57 = vmul.f32 0.5, %v6000_v48 }
 0x9d9   :  { %v4376_v18 = vadd.f32 0.5, %v4374_v57 }
 0x9db   :  { %v4387_v9 = vsub.f32 1.0, %v4376_v18  ;;  %v4389_v19 = vmul.f32 %v4376_v18, %v9776_v36  ;;  %v4478_v36 = vld [vmem:[%s10062_s3] sm:$0xff] }
 0x9e3   :  { %v4363_v33 = vpop.f32.mrf.mxu0 }
 0x9e4   :  { %v4383_v62 = vadd.f32 %v4597_v55, %v4363_v33 }
 0x9e5   :  { %v5894_v22 = vpop.f32.mrf.mxu0 }
 0x9e6   :  { %v4384_v20 = vmul.f32 %v4383_v62, %v4375_v34 }
 0x9e8   :  { %v4385_v39 = vadd.f32 %v4384_v20, %v4225_v31 }
 0x9ea   :  { %6001 = vtanh.f32 %v4385_v39 }
 0x9f7   :  { %v6002_v13 = vpop.eup %6001 }
 0x9f8   :  { %v4388_v27 = vmul.f32 %v6002_v13, %v4387_v9 }
 0x9fa   :  { %v4390_v58 = vadd.f32 %v4389_v19, %v4388_v27 }
 0x9fc   :  { %5928 = vmatmul.mubr.f32.vlgmr.msra.gmra.mxu1 %v4390_v58 }
 0x9fd   :  { %5937 = vmatprep.mubr.msk.f32.mxu1 %vm6004_vm0, %v10272_v2 }
 0xabc   :  { %v4473_v25 = vpop.f32.mrf.mxu1 }
 0xabd   :  { %4477 = vst.msk [vmem:[#allocation2 + $0xe] sm:$0x3] %vm909_vm3, %v4473_v25 }
 0xabe   :  { %v5929_v29 = vpop.f32.mrf.mxu1 }
 0xac4   :  { %v4482_v56 = vld [vmem:[#allocation2 + $0x8] sm:$0xff] }
 0xac5   :  { %5931 = vmatpush3.msra.mxu0 %v4482_v56  ;;  %5945 = vmatpush3.msra.mxu1 %v4482_v56 }
 0xac6   :  { %5932 = vmatprep.subr.mxu0 %v10272_v2  ;;  %5944 = vmatprep.subr.mxu1 %v10272_v2 }
 0xac7   :  { %5933 = vmatpush3.msra.mxu0 %v4481_v30  ;;  %5946 = vmatpush3.msra.mxu1 %v4481_v30 }
 0xac8   :  { %5938 = vmatmul.mubr.msk.f32.vlgmr.msra.gmra.mxu1 %vm4486_vm4, %v4479_v21  ;;  %5935 = vmatmul.mubr.msk.f32.vlgmr.msra.gmra.mxu0 %vm4486_vm4, %v4478_v36 }
 0xac9   :  { %5940 = vmatprep.mubr.msk.f32.mxu1 %vm6004_vm0, %v10272_v2  ;;  %v4485_v2 = vld [vmem:[%s10063_s4 + $0x10] sm:$0xff] }
 0xacc   :  { %5941 = vmatmul.mubr.msk.f32.gmra.mxu1 %vm4486_vm4, %v4480_v51 }
 0xb88   :  { %v4567_v47 = vpop.f32.mrf.mxu1  ;;  %v4562_v10 = vpop.f32.mrf.mxu0 }
 0xb89   :  { %v4568_v26 = vadd.f32 %v4567_v47, %v4484_v24  ;;  %v4563_v60 = vadd.f32 %v4562_v10, %v4483_v44 }
 0xb8a   :  { %v5939_v28 = vpop.f32.mrf.mxu1  ;;  %v5936_v50 = vpop.f32.mrf.mxu0 }
 0xb8b   :  { %4577 = vst.msk [vmem:[%s10064_s5 + $0x8] sm:$0xff] %vm52_vm1, %v4568_v26  ;;  %4576 = vst.msk [vmem:[%s10064_s5] sm:$0xff] %vm52_vm1, %v4563_v60 }
 0xb8c   :  { %v4572_v8 = vpop.f32.mrf.mxu1 }
 0xb8d   :  { %v4573_v40 = vadd.f32 %v4572_v8, %v4485_v2 }
 0xb8e   :  { %v5942_v38 = vpop.f32.mrf.mxu1 }
 0xb8f   :  { %4578 = vst.msk [vmem:[%s10064_s5 + $0x10] sm:$0xff] %vm52_vm1, %v4573_v40 }

</bundles_post_ra>
